<compile_context>
chip_gen: v6e
topology: v6e:2x2x1
jax: 0.10.0
libtpu: 0.0.40
codegen_flags: <defaults>
</compile_context>

<pallas_src>
import jax
import jax.numpy as jnp
from jax.experimental import pallas as pl
from jax.experimental.pallas import tpu as pltpu


# tap offsets (oy, ox) for a 3x3, stride-1, pad-1 convolution, k = kh*3 + kw
_TAP_OFFSETS = tuple((kh - 1, kw - 1) for kh in range(3) for kw in range(3))


# ----------------------------------------------------------------------------
# Fused Pallas kernel: one full glow step per grid step (one pixel tile per grid step)
# ----------------------------------------------------------------------------

def _build_glow_kernel(W, Ch, ch_pad, num_mid, P):
    """W: image width; Ch: half-channels; ch_pad: padded identity rows; P: pixels per tile."""

    def stacked_taps(h, masks_ref):
        # h: (Cin, P) f32  ->  (9*Cin, P) bf16 of rolled+boundary-masked copies.
        # One MXU push per conv layer instead of 9 tiny ones.
        pieces = []
        for k, (oy, ox) in enumerate(_TAP_OFFSETS):
            if oy == 0 and ox == 0:
                pieces.append(h)                              # center tap: no roll, no mask
            else:
                shift = (-(oy * W + ox)) % P                  # static lane rotation (XLU)
                pieces.append(pltpu.roll(h, shift=shift, axis=1) * masks_ref[k])
        return jnp.concatenate(pieces, axis=0).astype(jnp.bfloat16)

    def kernel(*refs):
        if num_mid > 0:
            (x_ref, masks_ref, w1_ref, b1_ref, wf_ref, bh_ref,
             wm_ref, wl_ref, epi_ref, o_ref) = refs
        else:
            (x_ref, masks_ref, w1_ref, b1_ref, wf_ref, bh_ref,
             wl_ref, epi_ref, o_ref) = refs
            wm_ref = None

        x = x_ref[...]                                        # (C, P) f32, pixels on lanes

        # ActNorm2d folded into the invertible 1x1 conv (W' = W diag(exp(logs)), b' = W' b).
        # Kept in f32 (K=4, negligible MXU time; keeps the identity half exact).  The identity
        # half is emitted pre-padded to `ch_pad` rows: padded weight/bias rows are zero, so the
        # padded activation rows are exactly zero and tap stacking is tile-aligned.
        y = jnp.dot(w1_ref[...], x, preferred_element_type=jnp.float32) + b1_ref[...]
        x_id_pad = y[0:ch_pad]                                # (ch_pad, P); rows >= Ch are 0
        x_chg = y[ch_pad:ch_pad + Ch]                         # (Ch, P)

        # Coupling st-network: each 3x3 conv = ONE bf16 matmul over the 9-tap stacked input.
        h = jnp.dot(wf_ref[...], stacked_taps(x_id_pad, masks_ref),
                    preferred_element_type=jnp.float32) + bh_ref[0]
        h = jnp.maximum(h, 0.0)
        for li in range(num_mid):
            h = jnp.dot(wm_ref[li], stacked_taps(h, masks_ref),
                        preferred_element_type=jnp.float32) + bh_ref[li + 1]
            h = jnp.maximum(h, 0.0)

        # Final conv: s and t produced by ONE merged matmul on the shared stacked h.
        epi = epi_ref[...]                                    # (3*Ch, 1) = [b_last ; rescale]
        st = jnp.dot(wl_ref[...], stacked_taps(h, masks_ref),
                     preferred_element_type=jnp.float32) + epi[0:2 * Ch]
        s = epi[2 * Ch:3 * Ch] * jnp.tanh(st[0:Ch])           # rescale * tanh(s_raw)   (f32)
        t = st[Ch:2 * Ch]

        # Single combined output:  z = [x_id ; x_change * exp(s) + t]
        o_ref[0:Ch, :] = x_id_pad[0:Ch, :]
        o_ref[Ch:2 * Ch, :] = x_chg * jnp.exp(s) + t

    return kernel


# ----------------------------------------------------------------------------
# Wrappers
# ----------------------------------------------------------------------------

def _default_num_pixel_tiles(n_images):
    # v7x has 2 TensorCores per chip -> keep >=2 parallel pixel tiles there.  Single-TC
    # v5e/v6e: one wide tile (widest matmul N-dim, no serial grid-step overhead).
    try:
        kind = jax.devices()[0].device_kind.lower()
    except Exception:
        kind = ""
    n_cores = 2 if ("v7" in kind or "7x" in kind) else 1
    g = min(n_cores, max(int(n_images), 1))
    while g > 1 and n_images % g != 0:
        g -= 1
    return max(g, 1)


def glow_step_forward_packed(x_packed, kp, H, W, num_pixel_tiles=None):
    """One glow step on packed (C, N*HW) data (channels x pixels-on-lanes). Returns same layout."""
    C, NP = x_packed.shape
    Ch = C // 2
    HW = H * W
    n_images = NP // HW
    assert n_images * HW == NP

    G = _default_num_pixel_tiles(n_images) if num_pixel_tiles is None else int(num_pixel_tiles)
    assert n_images % G == 0
    img_per_tile = n_images // G
    P = img_per_tile * HW
    assert P % 128 == 0, "pixel tile must be a multiple of 128 lanes"

    # Structural info derived from shapes (kept out of the traced pytree values).
    ch_pad = kp["w_first"].shape[1] // 9
    num_mid = 0 if kp["w_mid"] is None else kp["w_mid"].shape[0]

    # Per-image boundary masks tiled along lanes for this tile width (zero cross-image taps).
    masks = jnp.tile(kp["masks_img"], (1, 1, img_per_tile))          # (9, 1, P)

    consts = [masks, kp["w1_pack"], kp["b1_pack"], kp["w_first"], kp["b_hidden"]]
    if num_mid > 0:
        consts.append(kp["w_mid"])
    consts += [kp["w_last"], kp["epi"]]

    def const_spec(a):                                               # resident across the grid
        nd = a.ndim
        return pl.BlockSpec(a.shape, lambda g, _nd=nd: (0,) * _nd)

    in_specs = [pl.BlockSpec((C, P), lambda g: (0, g))] + [const_spec(a) for a in consts]

    kernel = _build_glow_kernel(W, Ch, ch_pad, num_mid, P)

    out = pl.pallas_call(
        kernel,
        grid=(G,),
        in_specs=in_specs,
        out_specs=pl.BlockSpec((C, P), lambda g: (0, g)),
        out_shape=jax.ShapeDtypeStruct((C, NP), jnp.float32),
        compiler_params=pltpu.CompilerParams(dimension_semantics=("parallel",)),
    )(x_packed, *consts)
    return out


def glow_step_forward(x_nchw, kp, num_pixel_tiles=None):
    """NCHW entry point. One-time layout change to (C, N*HW); chained glow steps would stay in
    the packed layout (see glow_step_forward_packed) and only convert at the model boundary."""
    N, C, H, W = x_nchw.shape
    HW = H * W
    xp = jnp.transpose(x_nchw.reshape(N, C, HW).astype(jnp.float32), (1, 0, 2)).reshape(C, N * HW)
    zp = glow_step_forward_packed(xp, kp, H, W, num_pixel_tiles)
    return zp.reshape(C, N, H, W).transpose(1, 0, 2, 3)


# ----------------------------------------------------------------------------
# Parameter construction (raw PyTorch-style params + kernel-format packing/folding)
# ----------------------------------------------------------------------------

def init_raw_params(key, C, mid_channels, num_layers, actnorm_scale=1.0):
    assert C % 2 == 0
    Ch = C // 2
    keys = jax.random.split(key, 3 + 2 * num_layers)

    # ActNorm2d (deterministic synthetic init; real module does data-dependent init)
    an_bias = 0.1 * jax.random.normal(keys[0], (C,), jnp.float32)
    an_logs = 0.05 * jax.random.normal(keys[1], (C,), jnp.float32) + jnp.log(
        jnp.float32(actnorm_scale))

    # InvertibleConv1x1: random orthogonal weight W (C, C); per pixel out = W @ x
    q, _ = jnp.linalg.qr(jax.random.normal(keys[2], (C, C), jnp.float32))

    # Coupling st-network: num_layers 3x3 convs (Ch -> mid -> ... -> 2*Ch), ReLU between.
    convs = []
    cin = Ch
    for li in range(num_layers):
        cout = (2 * Ch) if li == num_layers - 1 else mid_channels
        w = jax.random.normal(keys[3 + 2 * li], (cout, cin, 3, 3), jnp.float32)
        w = w / jnp.sqrt(jnp.float32(9 * cin))
        if li == num_layers - 1:
            w = w * 0.1
        b = 0.01 * jax.random.normal(keys[4 + 2 * li], (cout,), jnp.float32)
        convs.append((w, b))
        cin = cout

    rescale = jnp.ones((Ch,), jnp.float32)               # learned rescale on tanh(s), init 1
    return dict(an_bias=an_bias, an_logs=an_logs, q=q, convs=convs, rescale=rescale)


def to_kernel_params(raw, H, W):
    q = raw["q"]
    C = q.shape[0]
    Ch = C // 2
    num_layers = len(raw["convs"])
    assert num_layers >= 2
    ch_pad = max(8, ((Ch + 7) // 8) * 8)                  # pad identity half to 8-row tiles

    # Fold ActNorm into the 1x1 conv:  W @ ((x + b) * exp(logs)) == W' @ x + b'
    w1 = q * jnp.exp(raw["an_logs"])[None, :]             # (C, C)
    b1 = w1 @ raw["an_bias"]                              # (C,)

    # Merged, padded 1x1 weight: rows [0:Ch] -> identity half, rows [Ch:ch_pad] -> zero pad,
    # rows [ch_pad:ch_pad+Ch] -> change half. Kept f32 (precision of the identity output).
    w1_pack = jnp.zeros((ch_pad + Ch, C), jnp.float32)
    w1_pack = w1_pack.at[:Ch].set(w1[:Ch]).at[ch_pad:].set(w1[Ch:])
    b1_pack = jnp.zeros((ch_pad + Ch, 1), jnp.float32)
    b1_pack = b1_pack.at[:Ch, 0].set(b1[:Ch]).at[ch_pad:, 0].set(b1[Ch:])

    def pack_conv(w_oihw, cin_pad):                       # (Cout,Cin,3,3) -> (Cout, 9*cin_pad)
        co, ci = w_oihw.shape[0], w_oihw.shape[1]
        t = jnp.transpose(w_oihw, (2, 3, 0, 1)).reshape(9, co, ci)     # tap-major
        t = jnp.pad(t, ((0, 0), (0, 0), (0, cin_pad - ci)))
        return jnp.transpose(t, (1, 0, 2)).reshape(co, 9 * cin_pad)

    w0, _ = raw["convs"][0]
    w_first = pack_conv(w0, ch_pad).astype(jnp.bfloat16)               # (mid, 9*ch_pad)

    b_hidden = jnp.stack([raw["convs"][li][1][:, None]                  # (L-1, mid, 1) f32
                          for li in range(num_layers - 1)], axis=0)

    w_mid = None
    if num_layers > 2:
        w_mid = jnp.stack([pack_conv(raw["convs"][li][0], raw["convs"][li][0].shape[1])
                           for li in range(1, num_layers - 1)], axis=0).astype(jnp.bfloat16)

    wl, bl = raw["convs"][-1]                                           # merged s/t last layer
    w_last = pack_conv(wl, wl.shape[1]).astype(jnp.bfloat16)            # (2*Ch, 9*mid)
    epi = jnp.concatenate([bl[:, None], raw["rescale"][:, None]], axis=0)   # (3*Ch, 1) f32

    # Per-image boundary-validity masks for the 9 taps over flattened (H, W) pixels.
    hh, ww = jnp.meshgrid(jnp.arange(H), jnp.arange(W), indexing="ij")
    hh = hh.reshape(1, H * W)
    ww = ww.reshape(1, H * W)
    mlist = []
    for oy, ox in _TAP_OFFSETS:
        valid = (hh + oy >= 0) & (hh + oy < H) & (ww + ox >= 0) & (ww + ox < W)
        mlist.append(valid.astype(jnp.float32))
    masks_img = jnp.stack(mlist, axis=0)                   # (9, 1, HW)

    return dict(masks_img=masks_img, w1_pack=w1_pack, b1_pack=b1_pack,
                w_first=w_first, b_hidden=b_hidden, w_mid=w_mid,
                w_last=w_last, epi=epi)


# ----------------------------------------------------------------------------
# Pure-JAX reference (no Pallas, independent f32 formulation) for correctness check
# ----------------------------------------------------------------------------

def reference_forward(x_nchw, raw):
    N, C, H, W = x_nchw.shape
    Ch = C // 2
    hp = jax.lax.Precision.HIGHEST
    x = x_nchw.astype(jnp.float32)
    y = (x + raw["an_bias"][None, :, None, None]) * jnp.exp(raw["an_logs"])[None, :, None, None]
    y = jnp.einsum("cd,ndhw->nchw", raw["q"], y, precision=hp)
    x_id, x_chg = y[:, :Ch], y[:, Ch:]
    h = x_id
    for li, (w, b) in enumerate(raw["convs"]):
        h = jax.lax.conv_general_dilated(
            h, w, window_strides=(1, 1), padding="SAME",
            dimension_numbers=("NCHW", "OIHW", "NCHW"), precision=hp)
        h = h + b[None, :, None, None]
        if li != len(raw["convs"]) - 1:
            h = jnp.maximum(h, 0.0)
    s = raw["rescale"][None, :, None, None] * jnp.tanh(h[:, :Ch])
    t = h[:, Ch:]
    z = jnp.concatenate([x_id, x_chg * jnp.exp(s) + t], axis=1)
    return z


# ----------------------------------------------------------------------------
# Main
# ----------------------------------------------------------------------------

if __name__ == "__main__":
    key = jax.random.PRNGKey(0)
    kx, kparam = jax.random.split(key)

    N, C, H, W = 2, 4, 16, 16              # NCHW, as in the PyTorch module
    mid_channels, num_layers = 32, 3
    x = jax.random.normal(kx, (N, C, H, W), jnp.float32)

    raw = init_raw_params(kparam, C, mid_channels, num_layers, actnorm_scale=1.0)
    kparams = to_kernel_params(raw, H, W)

    fwd = jax.jit(glow_step_forward)
    out = jax.block_until_ready(fwd(x, kparams))
    ref = jax.block_until_ready(reference_forward(x, raw))

    assert out.shape == (N, C, H, W)
    assert bool(jnp.all(jnp.isfinite(out)))
    # Tolerance sized for bf16 MXU operands in the st-network (f32 accumulation everywhere).
    max_err = float(jnp.max(jnp.abs(out - ref)))
    assert bool(jnp.allclose(out, ref, rtol=1e-2, atol=1e-2)), (
        f"mismatch vs JAX reference, max_abs_err={max_err}")

    print("KERNEL_OK")
</pallas_src>

<mosaic_0001>
module attributes {stable_mosaic.version = 11 : i64} {
  func.func @kernel(%arg0: i32, %arg1: memref<4x512xf32, #tpu.memory_space<vmem>>, %arg2: memref<9x1x512xf32, #tpu.memory_space<vmem>>, %arg3: memref<10x4xf32, #tpu.memory_space<vmem>>, %arg4: memref<10x1xf32, #tpu.memory_space<vmem>>, %arg5: memref<32x72xbf16, #tpu.memory_space<vmem>>, %arg6: memref<2x32x1xf32, #tpu.memory_space<vmem>>, %arg7: memref<1x32x288xbf16, #tpu.memory_space<vmem>>, %arg8: memref<4x288xbf16, #tpu.memory_space<vmem>>, %arg9: memref<6x1xf32, #tpu.memory_space<vmem>>, %arg10: memref<4x512xf32, #tpu.memory_space<vmem>>) attributes {dimension_semantics = [#tpu.dimension_semantics<parallel>], iteration_bounds = array<i64: 1>, scalar_prefetch = 0 : i64, scratch_operands = 0 : i64, tpu.core_type = #tpu.core_type<tc>, window_params = [{transform_indices = @transform_0, window_bounds = array<i64: 4, 512>}, {pipeline_mode = #tpu.pipeline_mode<synchronous>, transform_indices = @transform_1, window_bounds = array<i64: 9, 1, 512>}, {pipeline_mode = #tpu.pipeline_mode<synchronous>, transform_indices = @transform_2, window_bounds = array<i64: 10, 4>}, {pipeline_mode = #tpu.pipeline_mode<synchronous>, transform_indices = @transform_3, window_bounds = array<i64: 10, 1>}, {pipeline_mode = #tpu.pipeline_mode<synchronous>, transform_indices = @transform_4, window_bounds = array<i64: 32, 72>}, {pipeline_mode = #tpu.pipeline_mode<synchronous>, transform_indices = @transform_5, window_bounds = array<i64: 2, 32, 1>}, {pipeline_mode = #tpu.pipeline_mode<synchronous>, transform_indices = @transform_6, window_bounds = array<i64: 1, 32, 288>}, {pipeline_mode = #tpu.pipeline_mode<synchronous>, transform_indices = @transform_7, window_bounds = array<i64: 4, 288>}, {pipeline_mode = #tpu.pipeline_mode<synchronous>, transform_indices = @transform_8, window_bounds = array<i64: 6, 1>}, {transform_indices = @transform_9, window_bounds = array<i64: 4, 512>}]} {
    %c0 = arith.constant 0 : index
    %c0_0 = arith.constant 0 : index
    %0 = vector.load %arg1[%c0, %c0_0] : memref<4x512xf32, #tpu.memory_space<vmem>>, vector<4x512xf32>
    %c0_1 = arith.constant 0 : index
    %c0_2 = arith.constant 0 : index
    %1 = vector.load %arg3[%c0_1, %c0_2] : memref<10x4xf32, #tpu.memory_space<vmem>>, vector<10x4xf32>
    %cst = arith.constant dense<0.000000e+00> : vector<10x512xf32>
    %2 = tpu.matmul %1, %0, %cst {dimension_numbers = #tpu.dot_dimension_numbers<[1], [0], [0], [1], [0, 0, 1, 1], [], []>} : vector<10x4xf32>, vector<4x512xf32>, vector<10x512xf32> -> vector<10x512xf32>
    %c0_3 = arith.constant 0 : index
    %c0_4 = arith.constant 0 : index
    %3 = vector.load %arg4[%c0_3, %c0_4] : memref<10x1xf32, #tpu.memory_space<vmem>>, vector<10x1xf32>
    %4 = vector.broadcast %3 : vector<10x1xf32> to vector<10x512xf32>
    %5 = arith.addf %2, %4 : vector<10x512xf32>
    %6 = vector.extract_strided_slice %5 {offsets = [0, 0], sizes = [8, 512], strides = [1, 1]} : vector<10x512xf32> to vector<8x512xf32>
    %7 = vector.extract_strided_slice %5 {offsets = [8, 0], sizes = [2, 512], strides = [1, 1]} : vector<10x512xf32> to vector<2x512xf32>
    %c0_5 = arith.constant 0 : index
    %c0_6 = arith.constant 0 : index
    %8 = vector.load %arg5[%c0_5, %c0_6] : memref<32x72xbf16, #tpu.memory_space<vmem>>, vector<32x72xbf16>
    %c17_i32 = arith.constant 17 : i32
    %9 = tpu.dynamic_rotate %6 by %c17_i32 dim 1 : vector<8x512xf32>, i32 -> vector<8x512xf32>
    %c0_7 = arith.constant 0 : index
    %c0_8 = arith.constant 0 : index
    %c0_9 = arith.constant 0 : index
    %10 = vector.load %arg2[%c0_7, %c0_8, %c0_9] : memref<9x1x512xf32, #tpu.memory_space<vmem>>, vector<1x1x512xf32>
    %11 = vector.shape_cast %10 : vector<1x1x512xf32> to vector<1x512xf32>
    %12 = vector.broadcast %11 : vector<1x512xf32> to vector<8x512xf32>
    %13 = arith.mulf %9, %12 : vector<8x512xf32>
    %c16_i32 = arith.constant 16 : i32
    %14 = tpu.dynamic_rotate %6 by %c16_i32 dim 1 : vector<8x512xf32>, i32 -> vector<8x512xf32>
    %c1 = arith.constant 1 : index
    %c0_10 = arith.constant 0 : index
    %c0_11 = arith.constant 0 : index
    %15 = vector.load %arg2[%c1, %c0_10, %c0_11] : memref<9x1x512xf32, #tpu.memory_space<vmem>>, vector<1x1x512xf32>
    %16 = vector.shape_cast %15 : vector<1x1x512xf32> to vector<1x512xf32>
    %17 = vector.broadcast %16 : vector<1x512xf32> to vector<8x512xf32>
    %18 = arith.mulf %14, %17 : vector<8x512xf32>
    %c15_i32 = arith.constant 15 : i32
    %19 = tpu.dynamic_rotate %6 by %c15_i32 dim 1 : vector<8x512xf32>, i32 -> vector<8x512xf32>
    %c2 = arith.constant 2 : index
    %c0_12 = arith.constant 0 : index
    %c0_13 = arith.constant 0 : index
    %20 = vector.load %arg2[%c2, %c0_12, %c0_13] : memref<9x1x512xf32, #tpu.memory_space<vmem>>, vector<1x1x512xf32>
    %21 = vector.shape_cast %20 : vector<1x1x512xf32> to vector<1x512xf32>
    %22 = vector.broadcast %21 : vector<1x512xf32> to vector<8x512xf32>
    %23 = arith.mulf %19, %22 : vector<8x512xf32>
    %c1_i32 = arith.constant 1 : i32
    %24 = tpu.dynamic_rotate %6 by %c1_i32 dim 1 : vector<8x512xf32>, i32 -> vector<8x512xf32>
    %c3 = arith.constant 3 : index
    %c0_14 = arith.constant 0 : index
    %c0_15 = arith.constant 0 : index
    %25 = vector.load %arg2[%c3, %c0_14, %c0_15] : memref<9x1x512xf32, #tpu.memory_space<vmem>>, vector<1x1x512xf32>
    %26 = vector.shape_cast %25 : vector<1x1x512xf32> to vector<1x512xf32>
    %27 = vector.broadcast %26 : vector<1x512xf32> to vector<8x512xf32>
    %28 = arith.mulf %24, %27 : vector<8x512xf32>
    %c511_i32 = arith.constant 511 : i32
    %29 = tpu.dynamic_rotate %6 by %c511_i32 dim 1 : vector<8x512xf32>, i32 -> vector<8x512xf32>
    %c5 = arith.constant 5 : index
    %c0_16 = arith.constant 0 : index
    %c0_17 = arith.constant 0 : index
    %30 = vector.load %arg2[%c5, %c0_16, %c0_17] : memref<9x1x512xf32, #tpu.memory_space<vmem>>, vector<1x1x512xf32>
    %31 = vector.shape_cast %30 : vector<1x1x512xf32> to vector<1x512xf32>
    %32 = vector.broadcast %31 : vector<1x512xf32> to vector<8x512xf32>
    %33 = arith.mulf %29, %32 : vector<8x512xf32>
    %c497_i32 = arith.constant 497 : i32
    %34 = tpu.dynamic_rotate %6 by %c497_i32 dim 1 : vector<8x512xf32>, i32 -> vector<8x512xf32>
    %c6 = arith.constant 6 : index
    %c0_18 = arith.constant 0 : index
    %c0_19 = arith.constant 0 : index
    %35 = vector.load %arg2[%c6, %c0_18, %c0_19] : memref<9x1x512xf32, #tpu.memory_space<vmem>>, vector<1x1x512xf32>
    %36 = vector.shape_cast %35 : vector<1x1x512xf32> to vector<1x512xf32>
    %37 = vector.broadcast %36 : vector<1x512xf32> to vector<8x512xf32>
    %38 = arith.mulf %34, %37 : vector<8x512xf32>
    %c496_i32 = arith.constant 496 : i32
    %39 = tpu.dynamic_rotate %6 by %c496_i32 dim 1 : vector<8x512xf32>, i32 -> vector<8x512xf32>
    %c7 = arith.constant 7 : index
    %c0_20 = arith.constant 0 : index
    %c0_21 = arith.constant 0 : index
    %40 = vector.load %arg2[%c7, %c0_20, %c0_21] : memref<9x1x512xf32, #tpu.memory_space<vmem>>, vector<1x1x512xf32>
    %41 = vector.shape_cast %40 : vector<1x1x512xf32> to vector<1x512xf32>
    %42 = vector.broadcast %41 : vector<1x512xf32> to vector<8x512xf32>
    %43 = arith.mulf %39, %42 : vector<8x512xf32>
    %c495_i32 = arith.constant 495 : i32
    %44 = tpu.dynamic_rotate %6 by %c495_i32 dim 1 : vector<8x512xf32>, i32 -> vector<8x512xf32>
    %c8 = arith.constant 8 : index
    %c0_22 = arith.constant 0 : index
    %c0_23 = arith.constant 0 : index
    %45 = vector.load %arg2[%c8, %c0_22, %c0_23] : memref<9x1x512xf32, #tpu.memory_space<vmem>>, vector<1x1x512xf32>
    %46 = vector.shape_cast %45 : vector<1x1x512xf32> to vector<1x512xf32>
    %47 = vector.broadcast %46 : vector<1x512xf32> to vector<8x512xf32>
    %48 = arith.mulf %44, %47 : vector<8x512xf32>
    %49 = tpu.concatenate %13, %18, %23, %28, %6, %33, %38, %43, %48 in 0 : vector<8x512xf32>, vector<8x512xf32>, vector<8x512xf32>, vector<8x512xf32>, vector<8x512xf32>, vector<8x512xf32>, vector<8x512xf32>, vector<8x512xf32>, vector<8x512xf32> -> vector<72x512xf32>
    %50 = arith.truncf %49 : vector<72x512xf32> to vector<72x512xbf16>
    %cst_24 = arith.constant dense<0.000000e+00> : vector<32x512xf32>
    %51 = tpu.matmul %8, %50, %cst_24 {dimension_numbers = #tpu.dot_dimension_numbers<[1], [0], [0], [1], [0, 0, 1, 1], [], []>} : vector<32x72xbf16>, vector<72x512xbf16>, vector<32x512xf32> -> vector<32x512xf32>
    %c0_25 = arith.constant 0 : index
    %c0_26 = arith.constant 0 : index
    %c0_27 = arith.constant 0 : index
    %52 = vector.load %arg6[%c0_25, %c0_26, %c0_27] : memref<2x32x1xf32, #tpu.memory_space<vmem>>, vector<1x32x1xf32>
    %53 = vector.shape_cast %52 : vector<1x32x1xf32> to vector<32x1xf32>
    %54 = vector.broadcast %53 : vector<32x1xf32> to vector<32x512xf32>
    %55 = arith.addf %51, %54 : vector<32x512xf32>
    %cst_28 = arith.constant 0.000000e+00 : f32
    %56 = vector.broadcast %cst_28 : f32 to vector<32x512xf32>
    %57 = arith.maximumf %55, %56 : vector<32x512xf32>
    %c0_29 = arith.constant 0 : index
    %c0_30 = arith.constant 0 : index
    %c0_31 = arith.constant 0 : index
    %58 = vector.load %arg7[%c0_29, %c0_30, %c0_31] : memref<1x32x288xbf16, #tpu.memory_space<vmem>>, vector<1x32x288xbf16>
    %59 = vector.shape_cast %58 : vector<1x32x288xbf16> to vector<32x288xbf16>
    %c17_i32_32 = arith.constant 17 : i32
    %60 = tpu.dynamic_rotate %57 by %c17_i32_32 dim 1 : vector<32x512xf32>, i32 -> vector<32x512xf32>
    %c0_33 = arith.constant 0 : index
    %c0_34 = arith.constant 0 : index
    %c0_35 = arith.constant 0 : index
    %61 = vector.load %arg2[%c0_33, %c0_34, %c0_35] : memref<9x1x512xf32, #tpu.memory_space<vmem>>, vector<1x1x512xf32>
    %62 = vector.shape_cast %61 : vector<1x1x512xf32> to vector<1x512xf32>
    %63 = vector.broadcast %62 : vector<1x512xf32> to vector<32x512xf32>
    %64 = arith.mulf %60, %63 : vector<32x512xf32>
    %c16_i32_36 = arith.constant 16 : i32
    %65 = tpu.dynamic_rotate %57 by %c16_i32_36 dim 1 : vector<32x512xf32>, i32 -> vector<32x512xf32>
    %c1_37 = arith.constant 1 : index
    %c0_38 = arith.constant 0 : index
    %c0_39 = arith.constant 0 : index
    %66 = vector.load %arg2[%c1_37, %c0_38, %c0_39] : memref<9x1x512xf32, #tpu.memory_space<vmem>>, vector<1x1x512xf32>
    %67 = vector.shape_cast %66 : vector<1x1x512xf32> to vector<1x512xf32>
    %68 = vector.broadcast %67 : vector<1x512xf32> to vector<32x512xf32>
    %69 = arith.mulf %65, %68 : vector<32x512xf32>
    %c15_i32_40 = arith.constant 15 : i32
    %70 = tpu.dynamic_rotate %57 by %c15_i32_40 dim 1 : vector<32x512xf32>, i32 -> vector<32x512xf32>
    %c2_41 = arith.constant 2 : index
    %c0_42 = arith.constant 0 : index
    %c0_43 = arith.constant 0 : index
    %71 = vector.load %arg2[%c2_41, %c0_42, %c0_43] : memref<9x1x512xf32, #tpu.memory_space<vmem>>, vector<1x1x512xf32>
    %72 = vector.shape_cast %71 : vector<1x1x512xf32> to vector<1x512xf32>
    %73 = vector.broadcast %72 : vector<1x512xf32> to vector<32x512xf32>
    %74 = arith.mulf %70, %73 : vector<32x512xf32>
    %c1_i32_44 = arith.constant 1 : i32
    %75 = tpu.dynamic_rotate %57 by %c1_i32_44 dim 1 : vector<32x512xf32>, i32 -> vector<32x512xf32>
    %c3_45 = arith.constant 3 : index
    %c0_46 = arith.constant 0 : index
    %c0_47 = arith.constant 0 : index
    %76 = vector.load %arg2[%c3_45, %c0_46, %c0_47] : memref<9x1x512xf32, #tpu.memory_space<vmem>>, vector<1x1x512xf32>
    %77 = vector.shape_cast %76 : vector<1x1x512xf32> to vector<1x512xf32>
    %78 = vector.broadcast %77 : vector<1x512xf32> to vector<32x512xf32>
    %79 = arith.mulf %75, %78 : vector<32x512xf32>
    %c511_i32_48 = arith.constant 511 : i32
    %80 = tpu.dynamic_rotate %57 by %c511_i32_48 dim 1 : vector<32x512xf32>, i32 -> vector<32x512xf32>
    %c5_49 = arith.constant 5 : index
    %c0_50 = arith.constant 0 : index
    %c0_51 = arith.constant 0 : index
    %81 = vector.load %arg2[%c5_49, %c0_50, %c0_51] : memref<9x1x512xf32, #tpu.memory_space<vmem>>, vector<1x1x512xf32>
    %82 = vector.shape_cast %81 : vector<1x1x512xf32> to vector<1x512xf32>
    %83 = vector.broadcast %82 : vector<1x512xf32> to vector<32x512xf32>
    %84 = arith.mulf %80, %83 : vector<32x512xf32>
    %c497_i32_52 = arith.constant 497 : i32
    %85 = tpu.dynamic_rotate %57 by %c497_i32_52 dim 1 : vector<32x512xf32>, i32 -> vector<32x512xf32>
    %c6_53 = arith.constant 6 : index
    %c0_54 = arith.constant 0 : index
    %c0_55 = arith.constant 0 : index
    %86 = vector.load %arg2[%c6_53, %c0_54, %c0_55] : memref<9x1x512xf32, #tpu.memory_space<vmem>>, vector<1x1x512xf32>
    %87 = vector.shape_cast %86 : vector<1x1x512xf32> to vector<1x512xf32>
    %88 = vector.broadcast %87 : vector<1x512xf32> to vector<32x512xf32>
    %89 = arith.mulf %85, %88 : vector<32x512xf32>
    %c496_i32_56 = arith.constant 496 : i32
    %90 = tpu.dynamic_rotate %57 by %c496_i32_56 dim 1 : vector<32x512xf32>, i32 -> vector<32x512xf32>
    %c7_57 = arith.constant 7 : index
    %c0_58 = arith.constant 0 : index
    %c0_59 = arith.constant 0 : index
    %91 = vector.load %arg2[%c7_57, %c0_58, %c0_59] : memref<9x1x512xf32, #tpu.memory_space<vmem>>, vector<1x1x512xf32>
    %92 = vector.shape_cast %91 : vector<1x1x512xf32> to vector<1x512xf32>
    %93 = vector.broadcast %92 : vector<1x512xf32> to vector<32x512xf32>
    %94 = arith.mulf %90, %93 : vector<32x512xf32>
    %c495_i32_60 = arith.constant 495 : i32
    %95 = tpu.dynamic_rotate %57 by %c495_i32_60 dim 1 : vector<32x512xf32>, i32 -> vector<32x512xf32>
    %c8_61 = arith.constant 8 : index
    %c0_62 = arith.constant 0 : index
    %c0_63 = arith.constant 0 : index
    %96 = vector.load %arg2[%c8_61, %c0_62, %c0_63] : memref<9x1x512xf32, #tpu.memory_space<vmem>>, vector<1x1x512xf32>
    %97 = vector.shape_cast %96 : vector<1x1x512xf32> to vector<1x512xf32>
    %98 = vector.broadcast %97 : vector<1x512xf32> to vector<32x512xf32>
    %99 = arith.mulf %95, %98 : vector<32x512xf32>
    %100 = tpu.concatenate %64, %69, %74, %79, %57, %84, %89, %94, %99 in 0 : vector<32x512xf32>, vector<32x512xf32>, vector<32x512xf32>, vector<32x512xf32>, vector<32x512xf32>, vector<32x512xf32>, vector<32x512xf32>, vector<32x512xf32>, vector<32x512xf32> -> vector<288x512xf32>
    %101 = arith.truncf %100 : vector<288x512xf32> to vector<288x512xbf16>
    %cst_64 = arith.constant dense<0.000000e+00> : vector<32x512xf32>
    %102 = tpu.matmul %59, %101, %cst_64 {dimension_numbers = #tpu.dot_dimension_numbers<[1], [0], [0], [1], [0, 0, 1, 1], [], []>} : vector<32x288xbf16>, vector<288x512xbf16>, vector<32x512xf32> -> vector<32x512xf32>
    %c1_65 = arith.constant 1 : index
    %c0_66 = arith.constant 0 : index
    %c0_67 = arith.constant 0 : index
    %103 = vector.load %arg6[%c1_65, %c0_66, %c0_67] : memref<2x32x1xf32, #tpu.memory_space<vmem>>, vector<1x32x1xf32>
    %104 = vector.shape_cast %103 : vector<1x32x1xf32> to vector<32x1xf32>
    %105 = vector.broadcast %104 : vector<32x1xf32> to vector<32x512xf32>
    %106 = arith.addf %102, %105 : vector<32x512xf32>
    %cst_68 = arith.constant 0.000000e+00 : f32
    %107 = vector.broadcast %cst_68 : f32 to vector<32x512xf32>
    %108 = arith.maximumf %106, %107 : vector<32x512xf32>
    %c0_69 = arith.constant 0 : index
    %c0_70 = arith.constant 0 : index
    %109 = vector.load %arg9[%c0_69, %c0_70] : memref<6x1xf32, #tpu.memory_space<vmem>>, vector<6x1xf32>
    %c0_71 = arith.constant 0 : index
    %c0_72 = arith.constant 0 : index
    %110 = vector.load %arg8[%c0_71, %c0_72] : memref<4x288xbf16, #tpu.memory_space<vmem>>, vector<4x288xbf16>
    %c17_i32_73 = arith.constant 17 : i32
    %111 = tpu.dynamic_rotate %108 by %c17_i32_73 dim 1 : vector<32x512xf32>, i32 -> vector<32x512xf32>
    %c0_74 = arith.constant 0 : index
    %c0_75 = arith.constant 0 : index
    %c0_76 = arith.constant 0 : index
    %112 = vector.load %arg2[%c0_74, %c0_75, %c0_76] : memref<9x1x512xf32, #tpu.memory_space<vmem>>, vector<1x1x512xf32>
    %113 = vector.shape_cast %112 : vector<1x1x512xf32> to vector<1x512xf32>
    %114 = vector.broadcast %113 : vector<1x512xf32> to vector<32x512xf32>
    %115 = arith.mulf %111, %114 : vector<32x512xf32>
    %c16_i32_77 = arith.constant 16 : i32
    %116 = tpu.dynamic_rotate %108 by %c16_i32_77 dim 1 : vector<32x512xf32>, i32 -> vector<32x512xf32>
    %c1_78 = arith.constant 1 : index
    %c0_79 = arith.constant 0 : index
    %c0_80 = arith.constant 0 : index
    %117 = vector.load %arg2[%c1_78, %c0_79, %c0_80] : memref<9x1x512xf32, #tpu.memory_space<vmem>>, vector<1x1x512xf32>
    %118 = vector.shape_cast %117 : vector<1x1x512xf32> to vector<1x512xf32>
    %119 = vector.broadcast %118 : vector<1x512xf32> to vector<32x512xf32>
    %120 = arith.mulf %116, %119 : vector<32x512xf32>
    %c15_i32_81 = arith.constant 15 : i32
    %121 = tpu.dynamic_rotate %108 by %c15_i32_81 dim 1 : vector<32x512xf32>, i32 -> vector<32x512xf32>
    %c2_82 = arith.constant 2 : index
    %c0_83 = arith.constant 0 : index
    %c0_84 = arith.constant 0 : index
    %122 = vector.load %arg2[%c2_82, %c0_83, %c0_84] : memref<9x1x512xf32, #tpu.memory_space<vmem>>, vector<1x1x512xf32>
    %123 = vector.shape_cast %122 : vector<1x1x512xf32> to vector<1x512xf32>
    %124 = vector.broadcast %123 : vector<1x512xf32> to vector<32x512xf32>
    %125 = arith.mulf %121, %124 : vector<32x512xf32>
    %c1_i32_85 = arith.constant 1 : i32
    %126 = tpu.dynamic_rotate %108 by %c1_i32_85 dim 1 : vector<32x512xf32>, i32 -> vector<32x512xf32>
    %c3_86 = arith.constant 3 : index
    %c0_87 = arith.constant 0 : index
    %c0_88 = arith.constant 0 : index
    %127 = vector.load %arg2[%c3_86, %c0_87, %c0_88] : memref<9x1x512xf32, #tpu.memory_space<vmem>>, vector<1x1x512xf32>
    %128 = vector.shape_cast %127 : vector<1x1x512xf32> to vector<1x512xf32>
    %129 = vector.broadcast %128 : vector<1x512xf32> to vector<32x512xf32>
    %130 = arith.mulf %126, %129 : vector<32x512xf32>
    %c511_i32_89 = arith.constant 511 : i32
    %131 = tpu.dynamic_rotate %108 by %c511_i32_89 dim 1 : vector<32x512xf32>, i32 -> vector<32x512xf32>
    %c5_90 = arith.constant 5 : index
    %c0_91 = arith.constant 0 : index
    %c0_92 = arith.constant 0 : index
    %132 = vector.load %arg2[%c5_90, %c0_91, %c0_92] : memref<9x1x512xf32, #tpu.memory_space<vmem>>, vector<1x1x512xf32>
    %133 = vector.shape_cast %132 : vector<1x1x512xf32> to vector<1x512xf32>
    %134 = vector.broadcast %133 : vector<1x512xf32> to vector<32x512xf32>
    %135 = arith.mulf %131, %134 : vector<32x512xf32>
    %c497_i32_93 = arith.constant 497 : i32
    %136 = tpu.dynamic_rotate %108 by %c497_i32_93 dim 1 : vector<32x512xf32>, i32 -> vector<32x512xf32>
    %c6_94 = arith.constant 6 : index
    %c0_95 = arith.constant 0 : index
    %c0_96 = arith.constant 0 : index
    %137 = vector.load %arg2[%c6_94, %c0_95, %c0_96] : memref<9x1x512xf32, #tpu.memory_space<vmem>>, vector<1x1x512xf32>
    %138 = vector.shape_cast %137 : vector<1x1x512xf32> to vector<1x512xf32>
    %139 = vector.broadcast %138 : vector<1x512xf32> to vector<32x512xf32>
    %140 = arith.mulf %136, %139 : vector<32x512xf32>
    %c496_i32_97 = arith.constant 496 : i32
    %141 = tpu.dynamic_rotate %108 by %c496_i32_97 dim 1 : vector<32x512xf32>, i32 -> vector<32x512xf32>
    %c7_98 = arith.constant 7 : index
    %c0_99 = arith.constant 0 : index
    %c0_100 = arith.constant 0 : index
    %142 = vector.load %arg2[%c7_98, %c0_99, %c0_100] : memref<9x1x512xf32, #tpu.memory_space<vmem>>, vector<1x1x512xf32>
    %143 = vector.shape_cast %142 : vector<1x1x512xf32> to vector<1x512xf32>
    %144 = vector.broadcast %143 : vector<1x512xf32> to vector<32x512xf32>
    %145 = arith.mulf %141, %144 : vector<32x512xf32>
    %c495_i32_101 = arith.constant 495 : i32
    %146 = tpu.dynamic_rotate %108 by %c495_i32_101 dim 1 : vector<32x512xf32>, i32 -> vector<32x512xf32>
    %c8_102 = arith.constant 8 : index
    %c0_103 = arith.constant 0 : index
    %c0_104 = arith.constant 0 : index
    %147 = vector.load %arg2[%c8_102, %c0_103, %c0_104] : memref<9x1x512xf32, #tpu.memory_space<vmem>>, vector<1x1x512xf32>
    %148 = vector.shape_cast %147 : vector<1x1x512xf32> to vector<1x512xf32>
    %149 = vector.broadcast %148 : vector<1x512xf32> to vector<32x512xf32>
    %150 = arith.mulf %146, %149 : vector<32x512xf32>
    %151 = tpu.concatenate %115, %120, %125, %130, %108, %135, %140, %145, %150 in 0 : vector<32x512xf32>, vector<32x512xf32>, vector<32x512xf32>, vector<32x512xf32>, vector<32x512xf32>, vector<32x512xf32>, vector<32x512xf32>, vector<32x512xf32>, vector<32x512xf32> -> vector<288x512xf32>
    %152 = arith.truncf %151 : vector<288x512xf32> to vector<288x512xbf16>
    %cst_105 = arith.constant dense<0.000000e+00> : vector<4x512xf32>
    %153 = tpu.matmul %110, %152, %cst_105 {dimension_numbers = #tpu.dot_dimension_numbers<[1], [0], [0], [1], [0, 0, 1, 1], [], []>} : vector<4x288xbf16>, vector<288x512xbf16>, vector<4x512xf32> -> vector<4x512xf32>
    %154 = vector.extract_strided_slice %109 {offsets = [0, 0], sizes = [4, 1], strides = [1, 1]} : vector<6x1xf32> to vector<4x1xf32>
    %155 = vector.broadcast %154 : vector<4x1xf32> to vector<4x512xf32>
    %156 = arith.addf %153, %155 : vector<4x512xf32>
    %157 = vector.extract_strided_slice %109 {offsets = [4, 0], sizes = [2, 1], strides = [1, 1]} : vector<6x1xf32> to vector<2x1xf32>
    %158 = vector.extract_strided_slice %156 {offsets = [0, 0], sizes = [2, 512], strides = [1, 1]} : vector<4x512xf32> to vector<2x512xf32>
    %159 = math.tanh %158 : vector<2x512xf32>
    %160 = vector.broadcast %157 : vector<2x1xf32> to vector<2x512xf32>
    %161 = arith.mulf %160, %159 : vector<2x512xf32>
    %162 = vector.extract_strided_slice %156 {offsets = [2, 0], sizes = [2, 512], strides = [1, 1]} : vector<4x512xf32> to vector<2x512xf32>
    %163 = vector.extract_strided_slice %6 {offsets = [0, 0], sizes = [2, 512], strides = [1, 1]} : vector<8x512xf32> to vector<2x512xf32>
    %c0_106 = arith.constant 0 : index
    %c0_107 = arith.constant 0 : index
    %164 = vector.load %arg10[%c0_106, %c0_107] : memref<4x512xf32, #tpu.memory_space<vmem>>, vector<2x512xf32>
    tpu.vector_store %arg10[%c0_106, %c0_107], %163 {strides = array<i32>} : memref<4x512xf32, #tpu.memory_space<vmem>>, vector<2x512xf32>,
    %165 = math.exp %161 : vector<2x512xf32>
    %166 = arith.mulf %7, %165 : vector<2x512xf32>
    %167 = arith.addf %166, %162 : vector<2x512xf32>
    %c2_108 = arith.constant 2 : index
    %c0_109 = arith.constant 0 : index
    %168 = vector.load %arg10[%c2_108, %c0_109] : memref<4x512xf32, #tpu.memory_space<vmem>>, vector<2x512xf32>
    tpu.vector_store %arg10[%c2_108, %c0_109], %167 {strides = array<i32>} : memref<4x512xf32, #tpu.memory_space<vmem>>, vector<2x512xf32>,
    return
  }
  func.func @transform_0(%arg0: i32) -> (i32, i32) {
    %c0_i32 = arith.constant 0 : i32
    %c0_i32_0 = arith.constant 0 : i32
    return %c0_i32, %arg0 : i32, i32
  }
  func.func @transform_1(%arg0: i32) -> (i32, i32, i32) {
    %c0_i32 = arith.constant 0 : i32
    %c0_i32_0 = arith.constant 0 : i32
    %c0_i32_1 = arith.constant 0 : i32
    %c0_i32_2 = arith.constant 0 : i32
    return %c0_i32, %c0_i32_0, %c0_i32_1 : i32, i32, i32
  }
  func.func @transform_2(%arg0: i32) -> (i32, i32) {
    %c0_i32 = arith.constant 0 : i32
    %c0_i32_0 = arith.constant 0 : i32
    %c0_i32_1 = arith.constant 0 : i32
    return %c0_i32, %c0_i32_0 : i32, i32
  }
  func.func @transform_3(%arg0: i32) -> (i32, i32) {
    %c0_i32 = arith.constant 0 : i32
    %c0_i32_0 = arith.constant 0 : i32
    %c0_i32_1 = arith.constant 0 : i32
    return %c0_i32, %c0_i32_0 : i32, i32
  }
  func.func @transform_4(%arg0: i32) -> (i32, i32) {
    %c0_i32 = arith.constant 0 : i32
    %c0_i32_0 = arith.constant 0 : i32
    %c0_i32_1 = arith.constant 0 : i32
    return %c0_i32, %c0_i32_0 : i32, i32
  }
  func.func @transform_5(%arg0: i32) -> (i32, i32, i32) {
    %c0_i32 = arith.constant 0 : i32
    %c0_i32_0 = arith.constant 0 : i32
    %c0_i32_1 = arith.constant 0 : i32
    %c0_i32_2 = arith.constant 0 : i32
    return %c0_i32, %c0_i32_0, %c0_i32_1 : i32, i32, i32
  }
  func.func @transform_6(%arg0: i32) -> (i32, i32, i32) {
    %c0_i32 = arith.constant 0 : i32
    %c0_i32_0 = arith.constant 0 : i32
    %c0_i32_1 = arith.constant 0 : i32
    %c0_i32_2 = arith.constant 0 : i32
    return %c0_i32, %c0_i32_0, %c0_i32_1 : i32, i32, i32
  }
  func.func @transform_7(%arg0: i32) -> (i32, i32) {
    %c0_i32 = arith.constant 0 : i32
    %c0_i32_0 = arith.constant 0 : i32
    %c0_i32_1 = arith.constant 0 : i32
    return %c0_i32, %c0_i32_0 : i32, i32
  }
  func.func @transform_8(%arg0: i32) -> (i32, i32) {
    %c0_i32 = arith.constant 0 : i32
    %c0_i32_0 = arith.constant 0 : i32
    %c0_i32_1 = arith.constant 0 : i32
    return %c0_i32, %c0_i32_0 : i32, i32
  }
  func.func @transform_9(%arg0: i32) -> (i32, i32) {
    %c0_i32 = arith.constant 0 : i32
    %c0_i32_0 = arith.constant 0 : i32
    return %c0_i32, %arg0 : i32, i32
  }
}

</mosaic_0001>

<bundles_post_ra>
// kernel: glow_step_forward.1
= control target key start
LH: loop header
LB: loop body
LE: loop exit
PB: predicated region body
PF: predicated region fallthrough
CT: control target
= control target key end

     0   :  { %vm60_vm0 = vcmask 1043456   ;;  %v2569_v2 = vmov 0.0   ;;  %v5613_v5 = vmov 0   ;;  %vm53_vm1 = vcmask 31744   ;;  %s2572_s17 = smov 113   ;;  %s2573_s22 = smov 112   ;;  %s5603_s0 = inlined_call_operand.vmem [shape: f32[4,512], index: 0, kind: input, shape index: {}]   ;;  %s5604_s2 = inlined_call_operand.vmem [shape: f32[10,4], index: 2, kind: input, shape index: {}]   ;;  %s5605_s3 = inlined_call_operand.vmem [shape: f32[10,1], index: 3, kind: input, shape index: {}]   ;;  %s5606_s9 = inlined_call_operand.vmem [shape: f32[4,512], index: 9, kind: output, shape index: {}]   ;;  %s5607_s4 = inlined_call_operand.vmem [shape: bf16[32,72], index: 4, kind: input, shape index: {}]   ;;  %s5608_s5 = inlined_call_operand.vmem [shape: f32[2,32,1], index: 5, kind: input, shape index: {}]   ;;  %s5609_s1 = inlined_call_operand.vmem [shape: f32[9,1,512], index: 1, kind: input, shape index: {}]   ;;  %s5610_s6 = inlined_call_operand.vmem [shape: bf16[1,32,288], index: 6, kind: input, shape index: {}]   ;;  %s5611_s7 = inlined_call_operand.vmem [shape: bf16[4,288], index: 7, kind: input, shape index: {}]   ;;  %s5612_s8 = inlined_call_operand.vmem [shape: f32[6,1], index: 8, kind: input, shape index: {}]  }
   0x1   :  { %v33_v0 = vld [vmem:[%s5603_s0] sm:$0xff]  ;;  %v34_v1 = vld [vmem:[%s5603_s0 + $0x8] sm:$0xff]  ;;  %133 = vmatprep.mubr.f32.mxu0 %v2569_v2  ;;  %210 = vmatprep.mubr.f32.mxu1 %v2569_v2  ;;  %s2571_s0 = smov 111   ;;  %s2574_s23 = smov 127   ;;  %v571_v20 = vld [vmem:[%s5608_s5 + $0x18] sm:$0xff]  ;;  %v235_v26 = vlaneseq  ;;  %vm602_vm10 = vcmask 588800  }
   0x2   :  { %v51_v3 = vcombine.high %v33_v0, %v33_v0  ;;  %v52_v4 = vcombine.high %v34_v1, %v34_v1  ;;  %2538 = vset.pattern.permute.xlu0 %v5613_v5  ;;  %v37_v6 = vld [vmem:[%s5605_s3] sm:$0xff]  ;;  %2539 = vset.pattern.permute.xlu1 %v5613_v5  ;;  %s2575_s24 = smov 15   ;;  %s2576_s25 = smov 1   ;;  %v36_v19 = vld [vmem:[%s5604_s2 + $0x8] sm:$0x3]  ;;  %v570_v21 = vld [vmem:[%s5608_s5 + $0x10] sm:$0xff] }
   0x3   :  { %v35_v7 = vld [vmem:[%s5604_s2] sm:$0xff]  ;;  %41 = vperm.xlu0 %2538, %v37_v6   ;;  %s2577_s26 = smov 17   ;;  %s2578_s29 = smov 16   ;;  %v569_v22 = vld [vmem:[%s5608_s5 + $0x8] sm:$0xff]  ;;  %v2759_v29 = vshrl.u32 %v235_v26, 7  ;;  %v2765_v32 = vand.u32 127, %v235_v26 }
   0x4   :  { %2488 = vmatprep.subr.msk.mxu0 %vm60_vm0, %v51_v3  ;;  %2492 = vmatprep.subr.msk.mxu1 %vm60_vm0, %v52_v4  ;;  %v568_v23 = vld [vmem:[%s5608_s5] sm:$0xff]  ;;  %v2800_v46 = vld [vmem:[%s5609_s1 + $0x18] sm:$0xf]  ;;  %v2805_v47 = vld [vmem:[%s5609_s1 + $0x1c] sm:$0xf]  ;;  %vm1390_vm11 = vcmask 261120  }
   0x5   :  { %2489 = vmatpush1.msk.msra.mxu0 %vm60_vm0, %v33_v0  ;;  %2493 = vmatpush1.msk.msra.mxu1 %vm60_vm0, %v34_v1  ;;  %5835 = vst [vmem:[#allocation2_spill] sm:$0xff] %v2759_v29  ;;  %v2768_v33 = vsub.s32 2, %v2759_v29  ;;  %v2771_v34 = vsub.s32 3, %v2759_v29  ;;  %v2502_v35 = vld [vmem:[%s5609_s1 + $0x20] sm:$0xf]  ;;  %vm516_vm2 = vcmp.lt.s32.totalorder %v2765_v32, 111 }
   0x6   :  { %2490 = vmatmul.mubr.msk.f32.vlgmr.msra.gmra.mxu0 %vm53_vm1, %v35_v7  ;;  %2494 = vmatmul.mubr.msk.f32.vlgmr.msra.gmra.mxu1 %vm53_vm1, %v35_v7  ;;  %vm436_vm3 = vcmp.lt.s32.totalorder %v2765_v32, 113  ;;  %vm476_vm4 = vcmp.lt.s32.totalorder %v2765_v32, 112  ;;  %v2832_v57 = vld [vmem:[%s5609_s1 + $0x14] sm:$0xf]  ;;  %vm396_vm5 = vcmp.lt.s32.totalorder %v2765_v32, 127  ;;  %vm356_vm6 = vcmp.lt.s32.totalorder %v2765_v32, 1 }
   0x7   :  { %139 = vmatprep.mubr.f32.mxu0 %v2569_v2  ;;  %216 = vmatprep.mubr.f32.mxu1 %v2569_v2  ;;  %v2782_v38 = vrot.slane %v2502_v35, %v2768_v33  ;;  %v2785_v39 = vrot.slane %v2502_v35, %v2771_v34  ;;  %v2813_v52 = vrot.slane %v2800_v46, %v2768_v33  ;;  %vm316_vm7 = vcmp.lt.s32.totalorder %v2765_v32, 15 }
   0x8   :  { %v2817_v53 = vrot.slane %v2800_v46, %v2771_v34  ;;  %v2823_v55 = vrot.slane %v2805_v47, %v2768_v33  ;;  %v2827_v56 = vrot.slane %v2805_v47, %v2771_v34  ;;  %v2851_v0 = vrot.slane %v2832_v57, %v2768_v33 }
   0x9   :  { %5836 = vst [vmem:[#allocation3_spill] sm:$0xff] %v2782_v38  ;;  %5837 = vst [vmem:[#allocation4_spill] sm:$0xff] %v2785_v39  ;;  %v2855_v1 = vrot.slane %v2832_v57, %v2771_v34  ;;  %vm237_vm8 = vcmp.lt.s32.totalorder %v2765_v32, 17  ;;  %vm276_vm9 = vcmp.lt.s32.totalorder %v2765_v32, 16 }
   0xa   :  { %2491 = vmatmul.mubr.msk.f32.gmra.mxu0 %vm53_vm1, %v36_v19  ;;  %2495 = vmatmul.mubr.msk.f32.gmra.mxu1 %vm53_vm1, %v36_v19  ;;  %5838 = vst [vmem:[#allocation5_spill] sm:$0xff] %v2813_v52  ;;  %5839 = vst [vmem:[#allocation6_spill] sm:$0xff] %v2817_v53  ;;  %v2872_v19 = vsub.s32 0, %v2759_v29 }
   0xb   :  { %653 = vmatprep.mubr.bf16.mxu0 %v5613_v5  ;;  %706 = vmatprep.mubr.bf16.mxu1 %v5613_v5  ;;  %5840 = vst [vmem:[#allocation7_spill] sm:$0xff] %v2823_v55  ;;  %5841 = vst [vmem:[#allocation8_spill] sm:$0xff] %v2827_v56 }
   0xc   :  { %5842 = vst [vmem:[#allocation9_spill] sm:$0xff] %v2851_v0  ;;  %5843 = vst [vmem:[#allocation10_spill] sm:$0xff] %v2855_v1 }
  0x7e   :  { %v42_v8 = vpop.permute.xlu0 %41 }
  0xc6   :  { %v135_v9 = vpop.f32.mrf.mxu0  ;;  %v212_v10 = vpop.f32.mrf.mxu1 }
  0xc7   :  { %v2650_v11 = vadd.f32 %v135_v9, %v42_v8  ;;  %v2652_v12 = vadd.f32 %v212_v10, %v42_v8 }
  0xc8   :  { %v137_v13 = vpop.f32.mrf.mxu0  ;;  %v214_v14 = vpop.f32.mrf.mxu1 }
  0xc9   :  { %v2654_v15 = vadd.f32 %v137_v13, %v42_v8  ;;  %512 = vrot.lane.b32.xlu1 %v2652_v12, %s2571_s0  ;;  %508 = vrot.lane.b32.xlu0 %v2650_v11, %s2571_s0  ;;  %v2660_v16 = vadd.f32 %v214_v14, %v42_v8 }
  0xcb   :  { %v2426_v17 = vcombine.low %v2650_v11, %v2654_v15  ;;  %v2427_v18 = vcombine.low %v2652_v12, %v2660_v16 }
  0xcd   :  { %428 = vrot.lane.b32.xlu1 %v2650_v11, %s2572_s17  ;;  %432 = vrot.lane.b32.xlu0 %v2652_v12, %s2572_s17  ;;  %2430 = vst [vmem:[%s5606_s9] sm:$0x33] %v2426_v17  ;;  %2431 = vst [vmem:[%s5606_s9 + $0x8] sm:$0x33] %v2427_v18 }
  0xd1   :  { %468 = vrot.lane.b32.xlu1 %v2650_v11, %s2573_s22  ;;  %472 = vrot.lane.b32.xlu0 %v2652_v12, %s2573_s22 }
  0xd5   :  { %388 = vrot.lane.b32.xlu1 %v2650_v11, %s2574_s23  ;;  %392 = vrot.lane.b32.xlu0 %v2652_v12, %s2574_s23 }
  0xd9   :  { %308 = vrot.lane.b32.xlu1 %v2650_v11, %s2575_s24  ;;  %514 = vrot.lane.b32.xlu0 %v2660_v16, %s2571_s0 }
  0xdd   :  { %348 = vrot.lane.b32.xlu1 %v2650_v11, %s2576_s25  ;;  %434 = vrot.lane.b32.xlu0 %v2660_v16, %s2572_s17 }
  0xe1   :  { %312 = vrot.lane.b32.xlu1 %v2652_v12, %s2575_s24  ;;  %474 = vrot.lane.b32.xlu0 %v2660_v16, %s2573_s22 }
  0xe5   :  { %352 = vrot.lane.b32.xlu1 %v2652_v12, %s2576_s25  ;;  %394 = vrot.lane.b32.xlu0 %v2660_v16, %s2574_s23 }
  0xe9   :  { %227 = vrot.lane.b32.xlu1 %v2650_v11, %s2577_s26  ;;  %310 = vrot.lane.b32.xlu0 %v2654_v15, %s2575_s24 }
  0xed   :  { %510 = vrot.lane.b32.xlu1 %v2654_v15, %s2571_s0  ;;  %350 = vrot.lane.b32.xlu0 %v2654_v15, %s2576_s25 }
  0xf1   :  { %430 = vrot.lane.b32.xlu1 %v2654_v15, %s2572_s17  ;;  %314 = vrot.lane.b32.xlu0 %v2660_v16, %s2575_s24 }
  0xf5   :  { %470 = vrot.lane.b32.xlu1 %v2654_v15, %s2573_s22  ;;  %354 = vrot.lane.b32.xlu0 %v2660_v16, %s2576_s25 }
  0xf9   :  { %390 = vrot.lane.b32.xlu1 %v2654_v15, %s2574_s23  ;;  %229 = vrot.lane.b32.xlu0 %v2654_v15, %s2577_s26 }
  0xfd   :  { %268 = vrot.lane.b32.xlu1 %v2650_v11, %s2578_s29  ;;  %270 = vrot.lane.b32.xlu0 %v2654_v15, %s2578_s29 }
 0x101   :  { %231 = vrot.lane.b32.xlu1 %v2652_v12, %s2577_s26  ;;  %233 = vrot.lane.b32.xlu0 %v2660_v16, %s2577_s26 }
 0x105   :  { %272 = vrot.lane.b32.xlu1 %v2652_v12, %s2578_s29  ;;  %274 = vrot.lane.b32.xlu0 %v2660_v16, %s2578_s29 }
 0x109   :  { %589 = vperm.xlu0 %2538, %v571_v20   ;;  %584 = vperm.xlu1 %2539, %v570_v21  }
 0x10d   :  { %579 = vperm.xlu0 %2538, %v569_v22   ;;  %574 = vperm.xlu1 %2539, %v568_v23   ;;  %v2878_v22 = vsub.s32 1, %v2759_v29 }
 0x13b   :  { %v2751_v24 = vpop.permute.xlu1 %512  ;;  %v2753_v25 = vpop.permute.xlu0 %508 }
 0x13f   :  { %v2755_v27 = vpop.permute.xlu1 %428  ;;  %v2757_v28 = vpop.permute.xlu0 %432 }
 0x143   :  { %v2761_v30 = vpop.permute.xlu1 %468  ;;  %v2763_v31 = vpop.permute.xlu0 %472 }
 0x147   :  { %v2776_v36 = vpop.permute.xlu1 %388  ;;  %v2778_v37 = vpop.permute.xlu0 %392 }
 0x14b   :  { %v2787_v40 = vpop.permute.xlu1 %308  ;;  %v515_v41 = vpop.permute.xlu0 %514 }
 0x14c   :  { %v517_v42 = vsel %vm516_vm2, %v2751_v24, %v515_v41  ;;  %v520_v43 = vsel %vm516_vm2, %v515_v41, %v2753_v25  ;;  %v2882_v41 = vrot.slane %v2502_v35, %v2872_v19 }
 0x14d   :  { %v546_v44 = vmul.f32 %v2782_v38, %v517_v42  ;;  %v547_v45 = vmul.f32 %v2785_v39, %v520_v43  ;;  %v2885_v42 = vrot.slane %v2502_v35, %v2878_v22 }
 0x14f   :  { %v566_v48 = vpack.c.bf16 %v546_v44, %v546_v44  ;;  %v567_v49 = vpack.c.bf16 %v547_v45, %v547_v45  ;;  %v2808_v50 = vpop.permute.xlu1 %348  ;;  %v435_v51 = vpop.permute.xlu0 %434  ;;  %5844 = vst [vmem:[#allocation11_spill] sm:$0xff] %v2885_v42  ;;  %v2498_v44 = vld [vmem:[%s5609_s1 + $0xc] sm:$0xf] }
 0x150   :  { %v437_v58 = vsel %vm436_vm3, %v2757_v28, %v435_v51  ;;  %v440_v59 = vsel %vm436_vm3, %v435_v51, %v2755_v27 }
 0x151   :  { %2508 = vmatprep.subr.msk.bf16.mxu1 %vm60_vm0, %v567_v49  ;;  %v616_v54 = vsel %vm60_vm0, %v566_v48, 0  ;;  %v466_v2 = vmul.f32 %v2813_v52, %v437_v58  ;;  %v467_v3 = vmul.f32 %v2817_v53, %v440_v59  ;;  %v2913_v59 = vrot.slane %v2498_v44, %v2768_v33 }
 0x152   :  { %681 = vmatpush1.bf16.msra.mxu1 %v616_v54  ;;  %v2910_v54 = vrot.slane %v2498_v44, %v2878_v22 }
 0x153   :  { %v2841_v60 = vpop.permute.xlu1 %312  ;;  %v475_v61 = vpop.permute.xlu0 %474 }
 0x154   :  { %v477_v62 = vsel %vm476_vm4, %v2763_v31, %v475_v61  ;;  %v480_v63 = vsel %vm476_vm4, %v475_v61, %v2761_v30 }
 0x155   :  { %v506_v4 = vmul.f32 %v2823_v55, %v477_v62  ;;  %v507_v6 = vmul.f32 %v2827_v56, %v480_v63 }
 0x157   :  { %v562_v7 = vpack.c.bf16 %v506_v4, %v466_v2  ;;  %v2861_v8 = vpop.permute.xlu1 %352  ;;  %v395_v9 = vpop.permute.xlu0 %394  ;;  %v563_v10 = vpack.c.bf16 %v507_v6, %v467_v3  ;;  %v2924_v2 = vrot.slane %v2800_v46, %v2878_v22 }
 0x158   :  { %v397_v13 = vsel %vm396_vm5, %v2778_v37, %v395_v9  ;;  %v400_v14 = vsel %vm396_vm5, %v395_v9, %v2776_v36 }
 0x159   :  { %v426_v17 = vmul.f32 %v2851_v0, %v397_v13  ;;  %v427_v18 = vmul.f32 %v2855_v1, %v400_v14  ;;  %682 = vmatprep.subr.bf16.mxu1 %v563_v10  ;;  %5847 = vst [vmem:[#allocation14_spill] sm:$0xff] %v2924_v2  ;;  %v2959_v13 = vrot.slane %v2832_v57, %v2878_v22 }
 0x15a   :  { %683 = vmatpush1.bf16.msra.mxu1 %v562_v7  ;;  %v2944_v7 = vrot.slane %v2805_v47, %v2878_v22 }
 0x15b   :  { %v558_v20 = vpack.c.bf16 %v426_v17, %v2652_v12  ;;  %v2875_v21 = vpop.permute.xlu1 %227  ;;  %v311_v23 = vpop.permute.xlu0 %310  ;;  %v559_v26 = vpack.c.bf16 %v427_v18, %v2660_v16  ;;  %v2890_v12 = vld [vmem:[%s5609_s1 + $0x8] sm:$0xf]  ;;  %5851 = vst [vmem:[#allocation18_spill] sm:$0xff] %v2959_v13 }
 0x15c   :  { %v2907_v51 = vrot.slane %v2890_v12, %v2768_v33  ;;  %v2931_v4 = vrot.slane %v2890_v12, %v2771_v34  ;;  %5849 = vst [vmem:[#allocation16_spill] sm:$0xff] %v2944_v7 }
 0x15d   :  { %684 = vmatprep.subr.bf16.mxu1 %v559_v26 }
 0x15e   :  { %685 = vmatpush1.bf16.msra.mxu1 %v558_v20  ;;  %5845 = vst [vmem:[#allocation12_spill] sm:$0xff] %v2907_v51 }
 0x15f   :  { %v511_v43 = vpop.permute.xlu1 %510  ;;  %v351_v45 = vpop.permute.xlu0 %350 }
 0x160   :  { %v518_v16 = vsel %vm516_vm2, %v511_v43, %v2751_v24  ;;  %v519_v35 = vsel %vm516_vm2, %v2753_v25, %v511_v43  ;;  %v2917_v25 = vrot.slane %v2800_v46, %v2872_v19  ;;  %v358_v63 = vsel %vm356_vm6, %v351_v45, %v2861_v8 }
 0x161   :  { %v544_v48 = vmul.f32 %v2882_v41, %v519_v35  ;;  %v545_v49 = vmul.f32 %v2885_v42, %v518_v16  ;;  %v2940_v46 = vrot.slane %v2805_v47, %v2872_v19  ;;  %v318_v47 = vsel %vm316_vm7, %v311_v23, %v2841_v60 }
 0x162   :  { %5846 = vst [vmem:[#allocation13_spill] sm:$0xff] %v2917_v25  ;;  %v359_v14 = vsel %vm356_vm6, %v2808_v50, %v351_v45  ;;  %v386_v17 = vmul.f32 %v2913_v59, %v358_v63 }
 0x163   :  { %v564_v24 = vpack.c.bf16 %v544_v48, %v544_v48  ;;  %v565_v58 = vpack.c.bf16 %v545_v49, %v545_v49  ;;  %v431_v61 = vpop.permute.xlu1 %430  ;;  %v315_v62 = vpop.permute.xlu0 %314  ;;  %5848 = vst [vmem:[#allocation15_spill] sm:$0xff] %v2940_v46 }
 0x164   :  { %v439_v3 = vsel %vm436_vm3, %v2755_v27, %v431_v61  ;;  %v438_v6 = vsel %vm436_vm3, %v431_v61, %v2757_v28  ;;  %v2947_v27 = vrot.slane %v2498_v44, %v2771_v34  ;;  %v317_v9 = vsel %vm316_vm7, %v2841_v60, %v315_v62 }
 0x165   :  { %2505 = vmatprep.subr.msk.bf16.mxu0 %vm60_vm0, %v565_v58  ;;  %v610_v10 = vsel %vm60_vm0, %v564_v24, 0  ;;  %v2955_v28 = vrot.slane %v2832_v57, %v2872_v19  ;;  %v464_v18 = vmul.f32 %v2917_v25, %v439_v3  ;;  %v2496_v57 = vld [vmem:[%s5609_s1 + $0x4] sm:$0xf]  ;;  %v465_v43 = vmul.f32 %v2924_v2, %v438_v6  ;;  %v242_v6 = vld [vmem:[%s5609_s1] sm:$0xf] }
 0x166   :  { %628 = vmatpush1.bf16.msra.mxu0 %v610_v10  ;;  %v347_v35 = vmul.f32 %v2931_v4, %v317_v9  ;;  %v2988_v58 = vrot.slane %v2890_v12, %v2878_v22  ;;  %v2995_v61 = vrot.slane %v2496_v57, %v2878_v22 }
 0x167   :  { %5850 = vst [vmem:[#allocation17_spill] sm:$0xff] %v2955_v28  ;;  %v471_v20 = vpop.permute.xlu1 %470  ;;  %v355_v26 = vpop.permute.xlu0 %354 }
 0x168   :  { %v478_v60 = vsel %vm476_vm4, %v471_v20, %v2763_v31  ;;  %v479_v45 = vsel %vm476_vm4, %v2761_v30, %v471_v20  ;;  %v357_v16 = vsel %vm356_vm6, %v2861_v8, %v355_v26  ;;  %5852 = vst [vmem:[#allocation19_spill] sm:$0xff] %v2988_v58  ;;  %v346_v31 = vmul.f32 %v2907_v51, %v318_v47 }
 0x169   :  { %v504_v48 = vmul.f32 %v2940_v46, %v479_v45  ;;  %v505_v49 = vmul.f32 %v2944_v7, %v478_v60  ;;  %v387_v24 = vmul.f32 %v2947_v27, %v357_v16  ;;  %v2992_v30 = vrot.slane %v2498_v44, %v2872_v19  ;;  %5854 = vst [vmem:[#allocation21_spill] sm:$0xff] %v2995_v61 }
 0x16a   :  { %v319_v8 = vsel %vm316_vm7, %v2787_v40, %v311_v23  ;;  %v385_v47 = vmul.f32 %v2910_v54, %v359_v14  ;;  %v554_v44 = vpack.c.bf16 %v386_v17, %v346_v31  ;;  %v3018_v14 = vrot.slane %v2890_v12, %v2872_v19 }
 0x16b   :  { %5853 = vst [vmem:[#allocation20_spill] sm:$0xff] %v2992_v30  ;;  %v560_v63 = vpack.c.bf16 %v504_v48, %v464_v18  ;;  %v391_v3 = vpop.permute.xlu1 %390  ;;  %v230_v9 = vpop.permute.xlu0 %229  ;;  %v561_v10 = vpack.c.bf16 %v505_v49, %v465_v43  ;;  %v555_v20 = vpack.c.bf16 %v387_v24, %v347_v35  ;;  %v360_v18 = vsel %vm356_vm6, %v355_v26, %v2808_v50 }
 0x16c   :  { %v398_v60 = vsel %vm396_vm5, %v391_v3, %v2778_v37  ;;  %v399_v23 = vsel %vm396_vm5, %v2776_v36, %v391_v3  ;;  %5855 = vst [vmem:[#allocation22_spill] sm:$0xff] %v3018_v14  ;;  %v3021_v37 = vrot.slane %v242_v6, %v2878_v22  ;;  %v345_v36 = vmul.f32 %v2988_v58, %v319_v8 }
 0x16d   :  { %v424_v43 = vmul.f32 %v2955_v28, %v399_v23  ;;  %v425_v45 = vmul.f32 %v2959_v13, %v398_v60  ;;  %629 = vmatprep.subr.bf16.mxu0 %v561_v10  ;;  %686 = vmatprep.subr.bf16.mxu1 %v555_v20  ;;  %v320_v50 = vsel %vm316_vm7, %v315_v62, %v2787_v40 }
 0x16e   :  { %5856 = vst [vmem:[#allocation23_spill] sm:$0xff] %v3021_v37  ;;  %630 = vmatpush1.bf16.msra.mxu0 %v560_v63  ;;  %687 = vmatpush1.bf16.msra.mxu1 %v554_v44  ;;  %v384_v12 = vmul.f32 %v2992_v30, %v360_v18  ;;  %v240_v22 = vsel %vm237_vm8, %v2875_v21, %v230_v9 }
 0x16f   :  { %v556_v17 = vpack.c.bf16 %v424_v43, %v2650_v11  ;;  %v269_v26 = vpop.permute.xlu1 %268  ;;  %v271_v16 = vpop.permute.xlu0 %270  ;;  %v557_v35 = vpack.c.bf16 %v425_v45, %v2654_v15  ;;  %v553_v24 = vpack.c.bf16 %v385_v47, %v345_v36  ;;  %v344_v40 = vmul.f32 %v3018_v14, %v320_v50 }
 0x170   :  { %v279_v48 = vsel %vm276_vm9, %v269_v26, %v271_v16  ;;  %v265_v11 = vmul.f32 %v3021_v37, %v240_v22  ;;  %v3039_v15 = vrot.slane %v242_v6, %v2768_v33  ;;  %v3042_v31 = vrot.slane %v242_v6, %v2872_v19 }
 0x171   :  { %v305_v49 = vmul.f32 %v2995_v61, %v279_v48  ;;  %631 = vmatprep.subr.bf16.mxu0 %v557_v35  ;;  %v552_v63 = vpack.c.bf16 %v384_v12, %v344_v40  ;;  %v3047_v10 = vrot.slane %v242_v6, %v2771_v34  ;;  %v3050_v20 = vrot.slane %v2496_v57, %v2768_v33  ;;  %v3086_v48 = vpop.f32.mrf.mxu1 }
 0x172   :  { %632 = vmatpush1.bf16.msra.mxu0 %v556_v17  ;;  %5857 = vst [vmem:[#allocation24_spill] sm:$0xff] %v3039_v15  ;;  %5858 = vst [vmem:[#allocation25_spill] sm:$0xff] %v3042_v31  ;;  %v3056_v60 = vrot.slane %v2496_v57, %v2872_v19  ;;  %v3059_v23 = vrot.slane %v2496_v57, %v2771_v34 }
 0x173   :  { %v232_v62 = vpop.permute.xlu1 %231  ;;  %633 = vmatprep.subr.bf16.mxu0 %v553_v24  ;;  %v234_v8 = vpop.permute.xlu0 %233  ;;  %5859 = vst [vmem:[#allocation26_spill] sm:$0xff] %v3047_v10  ;;  %5860 = vst [vmem:[#allocation27_spill] sm:$0xff] %v3050_v20  ;;  %v549_v44 = vpack.c.bf16 %v305_v49, %v265_v11 }
 0x174   :  { %v239_v3 = vsel %vm237_vm8, %v230_v9, %v232_v62  ;;  %v241_v47 = vsel %vm237_vm8, %v234_v8, %v2875_v21  ;;  %5861 = vst [vmem:[#allocation28_spill] sm:$0xff] %v3056_v60  ;;  %v238_v9 = vsel %vm237_vm8, %v232_v62, %v234_v8  ;;  %5862 = vst [vmem:[#allocation29_spill] sm:$0xff] %v3086_v48  ;;  %v3088_v49 = vpop.f32.mrf.mxu0  ;;  %v3092_v40 = vpop.f32.mrf.mxu1 }
 0x175   :  { %v266_v6 = vmul.f32 %v3039_v15, %v239_v3  ;;  %v264_v43 = vmul.f32 %v3042_v31, %v241_v47  ;;  %v267_v57 = vmul.f32 %v3047_v10, %v238_v9  ;;  %5863 = vst [vmem:[#allocation30_spill] sm:$0xff] %v3088_v49  ;;  %5864 = vst [vmem:[#allocation31_spill] sm:$0xff] %v3092_v40 }
 0x176   :  { %634 = vmatpush1.bf16.msra.mxu0 %v552_v63  ;;  %v3094_v11 = vpop.f32.mrf.mxu0 }
 0x177   :  { %v273_v18 = vpop.permute.xlu1 %272  ;;  %635 = vmatprep.subr.bf16.mxu0 %v549_v44  ;;  %v275_v33 = vpop.permute.xlu0 %274  ;;  %5865 = vst [vmem:[#allocation32_spill] sm:$0xff] %v3094_v11 }
 0x178   :  { %v278_v21 = vsel %vm276_vm9, %v271_v16, %v273_v18  ;;  %v277_v19 = vsel %vm276_vm9, %v273_v18, %v275_v33  ;;  %v280_v34 = vsel %vm276_vm9, %v275_v33, %v269_v26  ;;  %v2542_v16 = vld [vmem:[%s5607_s4] sm:$0xff]   ;;  %v2543_v26 = vld [vmem:[%s5607_s4 + $0x8] sm:$0xff]  }
 0x179   :  { %v306_v45 = vmul.f32 %v3050_v20, %v278_v21  ;;  %v304_v36 = vmul.f32 %v3056_v60, %v280_v34  ;;  %v307_v50 = vmul.f32 %v3059_v23, %v277_v19 }
 0x17b   :  { %v550_v17 = vpack.c.bf16 %v306_v45, %v266_v6  ;;  %v548_v35 = vpack.c.bf16 %v304_v36, %v264_v43  ;;  %v551_v12 = vpack.c.bf16 %v307_v50, %v267_v57 }
 0x17d   :  { %636 = vmatpush1.bf16.msra.mxu0 %v548_v35  ;;  %688 = vmatprep.subr.bf16.mxu1 %v551_v12 }
 0x17e   :  { %689 = vmatpush1.bf16.msra.mxu1 %v550_v17 }
 0x180   :  { %2506 = vmatmul.mubr.msk.bf16.vlgmr.msra.gmra.mxu0 %vm602_vm10, %v2542_v16 }
 0x181   :  { %2509 = vmatmul.mubr.msk.bf16.vlgmr.msra.gmra.mxu1 %vm602_vm10, %v2542_v16  ;;  %663 = vmatprep.mubr.bf16.mxu0 %v5613_v5 }
 0x182   :  { %716 = vmatprep.mubr.bf16.mxu1 %v5613_v5 }
 0x184   :  { %v3084_v22 = vpop.permute.xlu1 %584  ;;  %v3090_v24 = vpop.permute.xlu0 %589 }
 0x188   :  { %2507 = vmatmul.mubr.msk.bf16.gmra.mxu0 %vm602_vm10, %v2543_v26  ;;  %v575_v62 = vpop.permute.xlu1 %574  ;;  %v580_v18 = vpop.permute.xlu0 %579 }
 0x189   :  { %2510 = vmatmul.mubr.msk.bf16.gmra.mxu1 %vm602_vm10, %v2543_v26 }
 0x18a   :  { %1482 = vmatprep.mubr.bf16.mxu1 %v5613_v5 }
 0x240   :  { %v655_v8 = vpop.f32.mrf.mxu0 }
 0x241   :  { %v656_v63 = vadd.f32 %v655_v8, %v575_v62  ;;  %v708_v3 = vpop.f32.mrf.mxu1 }
 0x242   :  { %v657_v47 = vpop.f32.mrf.mxu0  ;;  %v709_v9 = vadd.f32 %v708_v3, %v575_v62 }
 0x243   :  { %v3096_v44 = vmax.f32 %v656_v63, 0.0  ;;  %v710_v6 = vpop.f32.mrf.mxu1  ;;  %v658_v36 = vadd.f32 %v657_v47, %v575_v62 }
 0x244   :  { %v659_v33 = vpop.f32.mrf.mxu0  ;;  %v3100_v19 = vmax.f32 %v709_v9, 0.0  ;;  %v711_v35 = vadd.f32 %v710_v6, %v575_v62 }
 0x245   :  { %5866 = vst [vmem:[#allocation33_spill] sm:$0xff] %v3096_v44  ;;  %v660_v43 = vadd.f32 %v659_v33, %v580_v18  ;;  %943 = vrot.lane.b32.xlu1 %v3096_v44, %s2576_s25  ;;  %v712_v21 = vpop.f32.mrf.mxu1  ;;  %v3158_v17 = vmax.f32 %v658_v36, 0.0 }
 0x246   :  { %5867 = vst [vmem:[#allocation34_spill] sm:$0xff] %v3100_v19  ;;  %v713_v57 = vadd.f32 %v712_v21, %v580_v18  ;;  %v661_v50 = vpop.f32.mrf.mxu0  ;;  %v3164_v26 = vmax.f32 %v711_v35, 0.0 }
 0x247   :  { %v3102_v34 = vmax.f32 %v660_v43, 0.0  ;;  %5870 = vst [vmem:[#allocation37_spill] sm:$0xff] %v3158_v17  ;;  %v662_v12 = vadd.f32 %v661_v50, %v580_v18  ;;  %v714_v16 = vpop.f32.mrf.mxu1 }
 0x248   :  { %v3108_v45 = vmax.f32 %v713_v57, 0.0  ;;  %5871 = vst [vmem:[#allocation38_spill] sm:$0xff] %v3164_v26  ;;  %v715_v63 = vadd.f32 %v714_v16, %v580_v18  ;;  %v665_v3 = vpop.f32.mrf.mxu0 }
 0x249   :  { %5868 = vst [vmem:[#allocation35_spill] sm:$0xff] %v3102_v34  ;;  %1215 = vrot.lane.b32.xlu1 %v3100_v19, %s2571_s0  ;;  %945 = vrot.lane.b32.xlu0 %v3102_v34, %s2576_s25  ;;  %v3166_v8 = vmax.f32 %v662_v12, 0.0  ;;  %v718_v47 = vpop.f32.mrf.mxu1  ;;  %v666_v6 = vadd.f32 %v665_v3, %v3084_v22 }
 0x24a   :  { %5869 = vst [vmem:[#allocation36_spill] sm:$0xff] %v3108_v45  ;;  %v3172_v62 = vmax.f32 %v715_v63, 0.0  ;;  %v3206_v9 = vpop.f32.mrf.mxu0  ;;  %v719_v21 = vadd.f32 %v718_v47, %v3084_v22 }
 0x24b   :  { %5872 = vst [vmem:[#allocation39_spill] sm:$0xff] %v3166_v8  ;;  %v3213_v18 = vpop.f32.mrf.mxu1  ;;  %v3219_v43 = vmax.f32 %v666_v6, 0.0  ;;  %v668_v55 = vadd.f32 %v3206_v9, %v3084_v22 }
 0x24c   :  { %5873 = vst [vmem:[#allocation40_spill] sm:$0xff] %v3172_v62  ;;  %v669_v33 = vpop.f32.mrf.mxu0  ;;  %v3227_v50 = vmax.f32 %v719_v21, 0.0 }
 0x24d   :  { %1199 = vrot.lane.b32.xlu1 %v3096_v44, %s2571_s0  ;;  %1217 = vrot.lane.b32.xlu0 %v3108_v45, %s2571_s0  ;;  %5874 = vst [vmem:[#allocation41_spill] sm:$0xff] %v3219_v43  ;;  %v670_v57 = vadd.f32 %v669_v33, %v3090_v24  ;;  %v722_v36 = vpop.f32.mrf.mxu1  ;;  %v3346_v46 = vmax.f32 %v668_v55, 0.0 }
 0x24e   :  { %5875 = vst [vmem:[#allocation42_spill] sm:$0xff] %v3227_v50  ;;  %v723_v12 = vadd.f32 %v722_v36, %v3090_v24  ;;  %v671_v25 = vpop.f32.mrf.mxu0 }
 0x24f   :  { %v3229_v35 = vmax.f32 %v670_v57, 0.0  ;;  %5891 = vst [vmem:[#allocation58_spill] sm:$0xff] %v3346_v46  ;;  %v672_v7 = vadd.f32 %v671_v25, %v3090_v24 }
 0x250   :  { %v3236_v16 = vmax.f32 %v723_v12, 0.0 }
 0x251   :  { %879 = vrot.lane.b32.xlu1 %v3096_v44, %s2575_s24  ;;  %1201 = vrot.lane.b32.xlu0 %v3102_v34, %s2571_s0  ;;  %5876 = vst [vmem:[#allocation43_spill] sm:$0xff] %v3229_v35  ;;  %v3361_v55 = vmax.f32 %v672_v7, 0.0 }
 0x252   :  { %5877 = vst [vmem:[#allocation44_spill] sm:$0xff] %v3236_v16 }
 0x253   :  { %5895 = vst [vmem:[#allocation62_spill] sm:$0xff] %v3361_v55 }
 0x255   :  { %959 = vrot.lane.b32.xlu1 %v3100_v19, %s2576_s25  ;;  %881 = vrot.lane.b32.xlu0 %v3102_v34, %s2575_s24 }
 0x259   :  { %815 = vrot.lane.b32.xlu1 %v3096_v44, %s2578_s29  ;;  %961 = vrot.lane.b32.xlu0 %v3108_v45, %s2576_s25 }
 0x25d   :  { %895 = vrot.lane.b32.xlu1 %v3100_v19, %s2575_s24  ;;  %817 = vrot.lane.b32.xlu0 %v3102_v34, %s2578_s29 }
 0x261   :  { %751 = vrot.lane.b32.xlu1 %v3096_v44, %s2577_s26  ;;  %897 = vrot.lane.b32.xlu0 %v3108_v45, %s2575_s24 }
 0x265   :  { %831 = vrot.lane.b32.xlu1 %v3100_v19, %s2578_s29  ;;  %753 = vrot.lane.b32.xlu0 %v3102_v34, %s2577_s26 }
 0x269   :  { %1151 = vrot.lane.b32.xlu1 %v3100_v19, %s2573_s22  ;;  %833 = vrot.lane.b32.xlu0 %v3108_v45, %s2578_s29 }
 0x26d   :  { %1135 = vrot.lane.b32.xlu1 %v3096_v44, %s2573_s22  ;;  %1153 = vrot.lane.b32.xlu0 %v3108_v45, %s2573_s22 }
 0x271   :  { %767 = vrot.lane.b32.xlu1 %v3100_v19, %s2577_s26  ;;  %1137 = vrot.lane.b32.xlu0 %v3102_v34, %s2573_s22 }
 0x275   :  { %1087 = vrot.lane.b32.xlu1 %v3100_v19, %s2572_s17  ;;  %769 = vrot.lane.b32.xlu0 %v3108_v45, %s2577_s26 }
 0x279   :  { %1071 = vrot.lane.b32.xlu1 %v3096_v44, %s2572_s17  ;;  %1089 = vrot.lane.b32.xlu0 %v3108_v45, %s2572_s17 }
 0x27d   :  { %951 = vrot.lane.b32.xlu1 %v3158_v17, %s2576_s25  ;;  %1073 = vrot.lane.b32.xlu0 %v3102_v34, %s2572_s17 }
 0x281   :  { %967 = vrot.lane.b32.xlu1 %v3164_v26, %s2576_s25  ;;  %953 = vrot.lane.b32.xlu0 %v3166_v8, %s2576_s25 }
 0x285   :  { %1207 = vrot.lane.b32.xlu1 %v3158_v17, %s2571_s0  ;;  %969 = vrot.lane.b32.xlu0 %v3172_v62, %s2576_s25 }
 0x289   :  { %887 = vrot.lane.b32.xlu1 %v3158_v17, %s2575_s24  ;;  %1209 = vrot.lane.b32.xlu0 %v3166_v8, %s2571_s0 }
 0x28d   :  { %903 = vrot.lane.b32.xlu1 %v3164_v26, %s2575_s24  ;;  %889 = vrot.lane.b32.xlu0 %v3166_v8, %s2575_s24 }
 0x291   :  { %823 = vrot.lane.b32.xlu1 %v3158_v17, %s2578_s29  ;;  %905 = vrot.lane.b32.xlu0 %v3172_v62, %s2575_s24 }
 0x295   :  { %839 = vrot.lane.b32.xlu1 %v3164_v26, %s2578_s29  ;;  %825 = vrot.lane.b32.xlu0 %v3166_v8, %s2578_s29 }
 0x299   :  { %759 = vrot.lane.b32.xlu1 %v3158_v17, %s2577_s26  ;;  %841 = vrot.lane.b32.xlu0 %v3172_v62, %s2578_s29 }
 0x29d   :  { %775 = vrot.lane.b32.xlu1 %v3164_v26, %s2577_s26  ;;  %761 = vrot.lane.b32.xlu0 %v3166_v8, %s2577_s26 }
 0x2a1   :  { %1143 = vrot.lane.b32.xlu1 %v3158_v17, %s2573_s22  ;;  %777 = vrot.lane.b32.xlu0 %v3172_v62, %s2577_s26 }
 0x2a5   :  { %1079 = vrot.lane.b32.xlu1 %v3158_v17, %s2572_s17  ;;  %1145 = vrot.lane.b32.xlu0 %v3166_v8, %s2573_s22 }
 0x2a9   :  { %1159 = vrot.lane.b32.xlu1 %v3164_v26, %s2573_s22  ;;  %1081 = vrot.lane.b32.xlu0 %v3166_v8, %s2572_s17 }
 0x2ad   :  { %947 = vrot.lane.b32.xlu1 %v3219_v43, %s2576_s25  ;;  %1161 = vrot.lane.b32.xlu0 %v3172_v62, %s2573_s22 }
 0x2b1   :  { %1219 = vrot.lane.b32.xlu1 %v3227_v50, %s2571_s0  ;;  %949 = vrot.lane.b32.xlu0 %v3229_v35, %s2576_s25 }
 0x2b5   :  { %1203 = vrot.lane.b32.xlu1 %v3219_v43, %s2571_s0  ;;  %1221 = vrot.lane.b32.xlu0 %v3236_v16, %s2571_s0 }
 0x2b7   :  { %v3242_v63 = vpop.permute.xlu1 %943 }
 0x2b9   :  { %883 = vrot.lane.b32.xlu1 %v3219_v43, %s2575_s24  ;;  %1205 = vrot.lane.b32.xlu0 %v3229_v35, %s2571_s0 }
 0x2bb   :  { %v3248_v3 = vpop.permute.xlu1 %1215  ;;  %v3250_v47 = vpop.permute.xlu0 %945 }
 0x2bc   :  { %5878 = vst [vmem:[#allocation45_spill] sm:$0xff] %v3248_v3 }
 0x2bd   :  { %963 = vrot.lane.b32.xlu1 %v3227_v50, %s2576_s25  ;;  %885 = vrot.lane.b32.xlu0 %v3229_v35, %s2575_s24 }
 0x2bf   :  { %v3256_v6 = vpop.permute.xlu1 %1199  ;;  %v3258_v33 = vpop.permute.xlu0 %1217 }
 0x2c0   :  { %5879 = vst [vmem:[#allocation46_spill] sm:$0xff] %v3256_v6  ;;  %5880 = vst [vmem:[#allocation47_spill] sm:$0xff] %v3258_v33 }
 0x2c1   :  { %819 = vrot.lane.b32.xlu1 %v3219_v43, %s2578_s29  ;;  %965 = vrot.lane.b32.xlu0 %v3236_v16, %s2576_s25 }
 0x2c3   :  { %v3264_v21 = vpop.permute.xlu1 %879  ;;  %v3266_v57 = vpop.permute.xlu0 %1201 }
 0x2c4   :  { %5881 = vst [vmem:[#allocation48_spill] sm:$0xff] %v3266_v57 }
 0x2c5   :  { %899 = vrot.lane.b32.xlu1 %v3227_v50, %s2575_s24  ;;  %821 = vrot.lane.b32.xlu0 %v3229_v35, %s2578_s29 }
 0x2c7   :  { %v3272_v36 = vpop.permute.xlu1 %959  ;;  %v3274_v12 = vpop.permute.xlu0 %881 }
 0x2c9   :  { %755 = vrot.lane.b32.xlu1 %v3219_v43, %s2577_s26  ;;  %901 = vrot.lane.b32.xlu0 %v3236_v16, %s2575_s24 }
 0x2cb   :  { %v3280_v5 = vpop.permute.xlu1 %815  ;;  %v3282_v40 = vpop.permute.xlu0 %961 }
 0x2cd   :  { %835 = vrot.lane.b32.xlu1 %v3227_v50, %s2578_s29  ;;  %757 = vrot.lane.b32.xlu0 %v3229_v35, %s2577_s26 }
 0x2cf   :  { %v3288_v48 = vpop.permute.xlu1 %895  ;;  %v3290_v11 = vpop.permute.xlu0 %817 }
 0x2d1   :  { %1155 = vrot.lane.b32.xlu1 %v3227_v50, %s2573_s22  ;;  %837 = vrot.lane.b32.xlu0 %v3236_v16, %s2578_s29 }
 0x2d3   :  { %v3296_v49 = vpop.permute.xlu1 %751  ;;  %v3298_v29 = vpop.permute.xlu0 %897 }
 0x2d4   :  { %5882 = vst [vmem:[#allocation49_spill] sm:$0xff] %v3296_v49 }
 0x2d5   :  { %1139 = vrot.lane.b32.xlu1 %v3219_v43, %s2573_s22  ;;  %1157 = vrot.lane.b32.xlu0 %v3236_v16, %s2573_s22 }
 0x2d7   :  { %v3304_v39 = vpop.permute.xlu1 %831  ;;  %v3306_v38 = vpop.permute.xlu0 %753 }
 0x2d8   :  { %5883 = vst [vmem:[#allocation50_spill] sm:$0xff] %v3306_v38 }
 0x2d9   :  { %771 = vrot.lane.b32.xlu1 %v3227_v50, %s2577_s26  ;;  %1141 = vrot.lane.b32.xlu0 %v3229_v35, %s2573_s22 }
 0x2db   :  { %v3312_v1 = vpop.permute.xlu1 %1151  ;;  %v3314_v0 = vpop.permute.xlu0 %833 }
 0x2dc   :  { %5884 = vst [vmem:[#allocation51_spill] sm:$0xff] %v3312_v1 }
 0x2dd   :  { %1091 = vrot.lane.b32.xlu1 %v3227_v50, %s2572_s17  ;;  %773 = vrot.lane.b32.xlu0 %v3236_v16, %s2577_s26 }
 0x2df   :  { %v3320_v53 = vpop.permute.xlu1 %1135  ;;  %v3322_v52 = vpop.permute.xlu0 %1153 }
 0x2e0   :  { %5885 = vst [vmem:[#allocation52_spill] sm:$0xff] %v3320_v53  ;;  %5886 = vst [vmem:[#allocation53_spill] sm:$0xff] %v3322_v52 }
 0x2e1   :  { %1075 = vrot.lane.b32.xlu1 %v3219_v43, %s2572_s17  ;;  %1093 = vrot.lane.b32.xlu0 %v3236_v16, %s2572_s17 }
 0x2e3   :  { %v3328_v28 = vpop.permute.xlu1 %767  ;;  %v3330_v13 = vpop.permute.xlu0 %1137 }
 0x2e4   :  { %5887 = vst [vmem:[#allocation54_spill] sm:$0xff] %v3328_v28  ;;  %5888 = vst [vmem:[#allocation55_spill] sm:$0xff] %v3330_v13 }
 0x2e5   :  { %1027 = vrot.lane.b32.xlu1 %v3227_v50, %s2574_s23  ;;  %1077 = vrot.lane.b32.xlu0 %v3229_v35, %s2572_s17  ;;  %v721_v50 = vadd.f32 %v3213_v18, %v3084_v22 }
 0x2e7   :  { %v3338_v56 = vpop.permute.xlu1 %1087  ;;  %v3340_v2 = vpop.permute.xlu0 %769 }
 0x2e8   :  { %5889 = vst [vmem:[#allocation56_spill] sm:$0xff] %v3338_v56  ;;  %5890 = vst [vmem:[#allocation57_spill] sm:$0xff] %v3340_v2  ;;  %v724_v56 = vpop.f32.mrf.mxu1 }
 0x2e9   :  { %1011 = vrot.lane.b32.xlu1 %v3219_v43, %s2574_s23  ;;  %1029 = vrot.lane.b32.xlu0 %v3236_v16, %s2574_s23  ;;  %v3359_v43 = vmax.f32 %v721_v50, 0.0  ;;  %v725_v25 = vadd.f32 %v724_v56, %v3090_v24 }
 0x2eb   :  { %v3351_v13 = vpop.permute.xlu1 %1071  ;;  %v3353_v9 = vpop.permute.xlu0 %1089  ;;  %5894 = vst [vmem:[#allocation61_spill] sm:$0xff] %v3359_v43  ;;  %v3376_v50 = vmax.f32 %v725_v25, 0.0 }
 0x2ec   :  { %5892 = vst [vmem:[#allocation59_spill] sm:$0xff] %v3351_v13  ;;  %5893 = vst [vmem:[#allocation60_spill] sm:$0xff] %v3353_v9 }
 0x2ed   :  { %955 = vrot.lane.b32.xlu1 %v3346_v46, %s2576_s25  ;;  %1013 = vrot.lane.b32.xlu0 %v3229_v35, %s2574_s23  ;;  %5897 = vst [vmem:[#allocation64_spill] sm:$0xff] %v3376_v50 }
 0x2ef   :  { %v3363_v16 = vpop.permute.xlu1 %951  ;;  %v3365_v22 = vpop.permute.xlu0 %1073 }
 0x2f0   :  { %5896 = vst [vmem:[#allocation63_spill] sm:$0xff] %v3365_v22 }
 0x2f1   :  { %971 = vrot.lane.b32.xlu1 %v3359_v43, %s2576_s25  ;;  %957 = vrot.lane.b32.xlu0 %v3361_v55, %s2576_s25 }
 0x2f3   :  { %v3372_v18 = vpop.permute.xlu1 %967  ;;  %v3374_v9 = vpop.permute.xlu0 %953 }
 0x2f5   :  { %1211 = vrot.lane.b32.xlu1 %v3346_v46, %s2571_s0  ;;  %973 = vrot.lane.b32.xlu0 %v3376_v50, %s2576_s25 }
 0x2f7   :  { %v3382_v7 = vpop.permute.xlu1 %1207  ;;  %v3384_v56 = vpop.permute.xlu0 %969 }
 0x2f9   :  { %891 = vrot.lane.b32.xlu1 %v3346_v46, %s2575_s24  ;;  %1213 = vrot.lane.b32.xlu0 %v3361_v55, %s2571_s0 }
 0x2fb   :  { %v3390_v24 = vpop.permute.xlu1 %887  ;;  %v3392_v25 = vpop.permute.xlu0 %1209 }
 0x2fd   :  { %907 = vrot.lane.b32.xlu1 %v3359_v43, %s2575_s24  ;;  %893 = vrot.lane.b32.xlu0 %v3361_v55, %s2575_s24 }
 0x2ff   :  { %v3398_v35 = vpop.permute.xlu1 %903  ;;  %v3400_v22 = vpop.permute.xlu0 %889 }
 0x301   :  { %827 = vrot.lane.b32.xlu1 %v3346_v46, %s2578_s29  ;;  %909 = vrot.lane.b32.xlu0 %v3376_v50, %s2575_s24 }
 0x303   :  { %v3406_v13 = vpop.permute.xlu1 %823  ;;  %v3408_v53 = vpop.permute.xlu0 %905 }
 0x305   :  { %843 = vrot.lane.b32.xlu1 %v3359_v43, %s2578_s29  ;;  %829 = vrot.lane.b32.xlu0 %v3361_v55, %s2578_s29 }
 0x307   :  { %v3414_v1 = vpop.permute.xlu1 %839  ;;  %v3416_v10 = vpop.permute.xlu0 %825 }
 0x309   :  { %763 = vrot.lane.b32.xlu1 %v3346_v46, %s2577_s26  ;;  %845 = vrot.lane.b32.xlu0 %v3376_v50, %s2578_s29 }
 0x30b   :  { %v3422_v52 = vpop.permute.xlu1 %759  ;;  %v3424_v31 = vpop.permute.xlu0 %841 }
 0x30c   :  { %5898 = vst [vmem:[#allocation65_spill] sm:$0xff] %v3422_v52  ;;  %5899 = vst [vmem:[#allocation66_spill] sm:$0xff] %v3424_v31 }
 0x30d   :  { %779 = vrot.lane.b32.xlu1 %v3359_v43, %s2577_s26  ;;  %765 = vrot.lane.b32.xlu0 %v3361_v55, %s2577_s26 }
 0x30f   :  { %v3430_v2 = vpop.permute.xlu1 %775  ;;  %v3432_v38 = vpop.permute.xlu0 %761 }
 0x310   :  { %5900 = vst [vmem:[#allocation67_spill] sm:$0xff] %v3430_v2  ;;  %5901 = vst [vmem:[#allocation68_spill] sm:$0xff] %v3432_v38 }
 0x311   :  { %1015 = vrot.lane.b32.xlu1 %v3158_v17, %s2574_s23  ;;  %781 = vrot.lane.b32.xlu0 %v3376_v50, %s2577_s26 }
 0x313   :  { %v3438_v15 = vpop.permute.xlu1 %1143  ;;  %v3440_v37 = vpop.permute.xlu0 %777 }
 0x314   :  { %5902 = vst [vmem:[#allocation69_spill] sm:$0xff] %v3438_v15  ;;  %5903 = vst [vmem:[#allocation70_spill] sm:$0xff] %v3440_v37 }
 0x315   :  { %1147 = vrot.lane.b32.xlu1 %v3346_v46, %s2573_s22  ;;  %1017 = vrot.lane.b32.xlu0 %v3166_v8, %s2574_s23 }
 0x317   :  { %v3446_v49 = vpop.permute.xlu1 %1079  ;;  %v3448_v2 = vpop.permute.xlu0 %1145 }
 0x318   :  { %5904 = vst [vmem:[#allocation71_spill] sm:$0xff] %v3446_v49  ;;  %5905 = vst [vmem:[#allocation72_spill] sm:$0xff] %v3448_v2 }
 0x319   :  { %1083 = vrot.lane.b32.xlu1 %v3346_v46, %s2572_s17  ;;  %1149 = vrot.lane.b32.xlu0 %v3361_v55, %s2573_s22 }
 0x31b   :  { %v3454_v17 = vpop.permute.xlu1 %1159  ;;  %v3456_v15 = vpop.permute.xlu0 %1081 }
 0x31c   :  { %5906 = vst [vmem:[#allocation73_spill] sm:$0xff] %v3454_v17  ;;  %5907 = vst [vmem:[#allocation74_spill] sm:$0xff] %v3456_v15 }
 0x31d   :  { %1163 = vrot.lane.b32.xlu1 %v3359_v43, %s2573_s22  ;;  %1025 = vrot.lane.b32.xlu0 %v3108_v45, %s2574_s23 }
 0x31f   :  { %v3462_v8 = vpop.permute.xlu1 %947  ;;  %v3464_v49 = vpop.permute.xlu0 %1161 }
 0x320   :  { %5908 = vst [vmem:[#allocation75_spill] sm:$0xff] %v3464_v49 }
 0x321   :  { %1019 = vrot.lane.b32.xlu1 %v3346_v46, %s2574_s23  ;;  %1085 = vrot.lane.b32.xlu0 %v3361_v55, %s2572_s17 }
 0x323   :  { %v3470_v2 = vpop.permute.xlu1 %1219  ;;  %v3472_v17 = vpop.permute.xlu0 %949 }
 0x325   :  { %1023 = vrot.lane.b32.xlu1 %v3100_v19, %s2574_s23  ;;  %1165 = vrot.lane.b32.xlu0 %v3376_v50, %s2573_s22 }
 0x327   :  { %v3478_v45 = vpop.permute.xlu1 %1203  ;;  %v3480_v15 = vpop.permute.xlu0 %1221 }
 0x329   :  { %1007 = vrot.lane.b32.xlu1 %v3096_v44, %s2574_s23  ;;  %1021 = vrot.lane.b32.xlu0 %v3361_v55, %s2574_s23  ;;  %v3501_v44 = vld [vmem:[%s5610_s6 + $0x4] ss:$12 sps:$4 sm:$0xff]  }
 0x32a   :  { %5909 = vst [vmem:[#allocation76_spill] sm:$0xff] %v3501_v44  ;;  %1429 = vmatprep.mubr.bf16.mxu0 %v3501_v44 }
 0x32b   :  { %v3486_v46 = vpop.permute.xlu1 %883  ;;  %v3488_v49 = vpop.permute.xlu0 %1205 }
 0x32d   :  { %1099 = vrot.lane.b32.xlu1 %v3359_v43, %s2572_s17  ;;  %1009 = vrot.lane.b32.xlu0 %v3102_v34, %s2574_s23 }
 0x32f   :  { %v3494_v19 = vpop.permute.xlu1 %963  ;;  %v3496_v37 = vpop.permute.xlu0 %885 }
 0x331   :  { %1095 = vrot.lane.b32.xlu1 %v3164_v26, %s2572_s17  ;;  %1101 = vrot.lane.b32.xlu0 %v3376_v50, %s2572_s17 }
 0x333   :  { %v3508_v55 = vpop.permute.xlu1 %819  ;;  %v3510_v34 = vpop.permute.xlu0 %965 }
 0x334   :  { %5910 = vst [vmem:[#allocation77_spill] sm:$0xff] %v3508_v55 }
 0x335   :  { %1035 = vrot.lane.b32.xlu1 %v3359_v43, %s2574_s23  ;;  %1097 = vrot.lane.b32.xlu0 %v3172_v62, %s2572_s17 }
 0x337   :  { %v3516_v38 = vpop.permute.xlu1 %899  ;;  %v3518_v52 = vpop.permute.xlu0 %821 }
 0x338   :  { %5911 = vst [vmem:[#allocation78_spill] sm:$0xff] %v3516_v38  ;;  %5912 = vst [vmem:[#allocation79_spill] sm:$0xff] %v3518_v52 }
 0x339   :  { %1031 = vrot.lane.b32.xlu1 %v3164_v26, %s2574_s23  ;;  %1037 = vrot.lane.b32.xlu0 %v3376_v50, %s2574_s23 }
 0x33b   :  { %v3524_v44 = vpop.permute.xlu1 %755  ;;  %v3526_v55 = vpop.permute.xlu0 %901 }
 0x33c   :  { %5913 = vst [vmem:[#allocation80_spill] sm:$0xff] %v3524_v44  ;;  %5914 = vst [vmem:[#allocation81_spill] sm:$0xff] %v3526_v55  ;;  %v2513_v44 = vld [vmem:[%s5608_s5 + $0x30] sm:$0xff] }
 0x33d   :  { %1227 = vrot.lane.b32.xlu1 %v3359_v43, %s2571_s0  ;;  %1033 = vrot.lane.b32.xlu0 %v3172_v62, %s2574_s23 }
 0x33f   :  { %v3532_v28 = vpop.permute.xlu1 %835  ;;  %v3534_v38 = vpop.permute.xlu0 %757 }
 0x340   :  { %5915 = vst [vmem:[#allocation82_spill] sm:$0xff] %v3532_v28  ;;  %5916 = vst [vmem:[#allocation83_spill] sm:$0xff] %v3534_v38  ;;  %v2511_v38 = vld [vmem:[%s5608_s5 + $0x20] sm:$0xff] }
 0x341   :  { %1223 = vrot.lane.b32.xlu1 %v3164_v26, %s2571_s0  ;;  %1229 = vrot.lane.b32.xlu0 %v3376_v50, %s2571_s0  ;;  %v2514_v50 = vld [vmem:[%s5608_s5 + $0x38] sm:$0xff] }
 0x343   :  { %v3543_v52 = vpop.permute.xlu1 %1155  ;;  %v3545_v43 = vpop.permute.xlu0 %837 }
 0x344   :  { %5917 = vst [vmem:[#allocation84_spill] sm:$0xff] %v3543_v52  ;;  %5918 = vst [vmem:[#allocation85_spill] sm:$0xff] %v3545_v43 }
 0x345   :  { %1352 = vperm.xlu1 %2539, %v2513_v44   ;;  %1225 = vrot.lane.b32.xlu0 %v3172_v62, %s2571_s0  ;;  %v2512_v62 = vld [vmem:[%s5608_s5 + $0x28] sm:$0xff] }
 0x347   :  { %v3552_v26 = vpop.permute.xlu1 %1139  ;;  %v3554_v28 = vpop.permute.xlu0 %1157 }
 0x348   :  { %5919 = vst [vmem:[#allocation86_spill] sm:$0xff] %v3552_v26  ;;  %5920 = vst [vmem:[#allocation87_spill] sm:$0xff] %v3554_v28 }
 0x349   :  { %1342 = vperm.xlu1 %2539, %v2511_v38   ;;  %1357 = vperm.xlu0 %2538, %v2514_v50   ;;  %v980_v50 = vsel %vm356_vm6, %v3374_v9, %v3282_v40 }
 0x34b   :  { %v3559_v52 = vpop.permute.xlu1 %771  ;;  %v3561_v44 = vpop.permute.xlu0 %1141 }
 0x34c   :  { %5921 = vst [vmem:[#allocation88_spill] sm:$0xff] %v3559_v52  ;;  %5922 = vst [vmem:[#allocation89_spill] sm:$0xff] %v3561_v44 }
 0x34d   :  { %1347 = vperm.xlu0 %2538, %v2512_v62  }
 0x34f   :  { %v3566_v43 = vpop.permute.xlu1 %1091  ;;  %v3568_v26 = vpop.permute.xlu0 %773 }
 0x350   :  { %5923 = vst [vmem:[#allocation90_spill] sm:$0xff] %v3566_v43  ;;  %5924 = vst [vmem:[#allocation91_spill] sm:$0xff] %v3568_v26  ;;  %v984_v43 = vsel %vm356_vm6, %v3250_v47, %v3374_v9  ;;  %v987_v9 = vsel %vm356_vm6, %v3372_v18, %v3242_v63  ;;  %v923_v26 = vsel %vm316_vm7, %v3398_v35, %v3264_v21 }
 0x353   :  { %v3570_v28 = vpop.permute.xlu1 %1075  ;;  %v3572_v55 = vpop.permute.xlu0 %1093 }
 0x354   :  { %5925 = vst [vmem:[#allocation92_spill] sm:$0xff] %v3570_v28  ;;  %5926 = vst [vmem:[#allocation93_spill] sm:$0xff] %v3572_v55  ;;  %v3610_v55 = vmul.f32 %v984_v43, %v2910_v54 }
 0x357   :  { %v3574_v31 = vpop.permute.xlu1 %1027  ;;  %v3576_v38 = vpop.permute.xlu0 %1077 }
 0x358   :  { %5927 = vst [vmem:[#allocation94_spill] sm:$0xff] %v3574_v31  ;;  %5928 = vst [vmem:[#allocation95_spill] sm:$0xff] %v3576_v38  ;;  %v979_v31 = vsel %vm356_vm6, %v3363_v16, %v3272_v36  ;;  %v983_v38 = vsel %vm356_vm6, %v3242_v63, %v3363_v16  ;;  %v976_v16 = vsel %vm356_vm6, %v3282_v40, %v3384_v56 }
 0x359   :  { %v3625_v63 = vmul.f32 %v983_v38, %v2910_v54  ;;  %v3628_v43 = vmul.f32 %v979_v31, %v2913_v59  ;;  %v1239_v40 = vsel %vm516_vm2, %v3256_v6, %v3382_v7  ;;  %v1240_v31 = vsel %vm516_vm2, %v3266_v57, %v3392_v25 }
 0x35b   :  { %v3582_v44 = vpop.permute.xlu1 %1011  ;;  %v3584_v62 = vpop.permute.xlu0 %1029  ;;  %5932 = vst [vmem:[#allocation99_spill] sm:$0xff] %v3628_v43  ;;  %v1288_v57 = vpack.c.bf16 %v3610_v55, %v3625_v63  ;;  %v916_v55 = vsel %vm316_vm7, %v3400_v22, %v3298_v29 }
 0x35c   :  { %5929 = vst [vmem:[#allocation96_spill] sm:$0xff] %v3582_v44  ;;  %5930 = vst [vmem:[#allocation97_spill] sm:$0xff] %v3584_v62  ;;  %v975_v62 = vsel %vm356_vm6, %v3272_v36, %v3372_v18  ;;  %v3607_v44 = vmul.f32 %v980_v50, %v2913_v59  ;;  %v988_v36 = vsel %vm356_vm6, %v3384_v56, %v3250_v47 }
 0x35d   :  { %v3635_v18 = vmul.f32 %v987_v9, %v2992_v30  ;;  %v3638_v47 = vmul.f32 %v975_v62, %v2947_v27  ;;  %v1236_v56 = vsel %vm516_vm2, %v3392_v25, %v3258_v33  ;;  %v3651_v50 = vmul.f32 %v988_v36, %v2992_v30 }
 0x35e   :  { %v3654_v9 = vmul.f32 %v976_v16, %v2947_v27  ;;  %v1235_v33 = vsel %vm516_vm2, %v3382_v7, %v3248_v3  ;;  %v3665_v25 = vmul.f32 %v1239_v40, %v2882_v41  ;;  %v915_v36 = vsel %vm316_vm7, %v3390_v24, %v3288_v48 }
 0x35f   :  { %v3620_v28 = vpop.permute.xlu1 %955  ;;  %v3622_v52 = vpop.permute.xlu0 %1013  ;;  %v919_v7 = vsel %vm316_vm7, %v3264_v21, %v3390_v24  ;;  %v3682_v40 = vmul.f32 %v1240_v31, %v2882_v41  ;;  %v3685_v6 = vmul.f32 %v1236_v56, %v2885_v42  ;;  %v920_v24 = vsel %vm316_vm7, %v3274_v12, %v3400_v22 }
 0x360   :  { %5931 = vst [vmem:[#allocation98_spill] sm:$0xff] %v3622_v52  ;;  %v985_v62 = vsel %vm356_vm6, %v3462_v8, %v3620_v28  ;;  %v3702_v31 = vmul.f32 %v1235_v33, %v2885_v42  ;;  %v1287_v52 = vpack.c.bf16 %v3651_v50, %v3635_v18  ;;  %v3713_v22 = vmul.f32 %v919_v7, %v2988_v58 }
 0x361   :  { %v1000_v63 = vmul.f32 %v985_v62, %v2910_v54  ;;  %v3716_v62 = vmul.f32 %v915_v36, %v2907_v51  ;;  %v911_v21 = vsel %vm316_vm7, %v3288_v48, %v3398_v35  ;;  %v3727_v50 = vmul.f32 %v920_v24, %v2988_v58 }
 0x362   :  { %v3730_v7 = vmul.f32 %v916_v55, %v2907_v51  ;;  %v924_v36 = vsel %vm316_vm7, %v3408_v53, %v3274_v12  ;;  %v1328_v35 = vpack.c.bf16 %v3685_v6, %v3702_v31  ;;  %v851_v12 = vsel %vm276_vm9, %v3406_v13, %v3304_v39 }
 0x363   :  { %v3671_v16 = vpop.permute.xlu1 %971  ;;  %v3673_v38 = vpop.permute.xlu0 %957  ;;  %v855_v55 = vsel %vm276_vm9, %v3280_v5, %v3406_v13 }
 0x364   :  { %v986_v3 = vsel %vm356_vm6, %v3472_v17, %v3673_v38 }
 0x365   :  { %v1004_v56 = vmul.f32 %v986_v3, %v2910_v54  ;;  %v989_v3 = vsel %vm356_vm6, %v3671_v16, %v3462_v8  ;;  %v3779_v8 = vmul.f32 %v855_v55, %v2995_v61 }
 0x367   :  { %v1212_v33 = vpop.permute.xlu1 %1211  ;;  %v1292_v18 = vpack.c.bf16 %v1004_v56, %v1000_v63  ;;  %v974_v43 = vpop.permute.xlu0 %973  ;;  %v3739_v63 = vmul.f32 %v923_v26, %v3018_v14  ;;  %v999_v26 = vmul.f32 %v989_v3, %v2992_v30  ;;  %v3760_v56 = vmul.f32 %v924_v36, %v3018_v14 }
 0x368   :  { %v990_v48 = vsel %vm356_vm6, %v974_v43, %v3472_v17  ;;  %v3757_v17 = vmul.f32 %v911_v21, %v2931_v4  ;;  %v1237_v6 = vsel %vm516_vm2, %v1212_v33, %v3470_v2  ;;  %v1241_v31 = vsel %vm516_vm2, %v3478_v45, %v1212_v33 }
 0x369   :  { %1397 = vmatprep.subr.bf16.mxu0 %v1292_v18  ;;  %v1003_v24 = vmul.f32 %v990_v48, %v2992_v30  ;;  %v912_v3 = vsel %vm316_vm7, %v3298_v29, %v3408_v53  ;;  %v3782_v33 = vmul.f32 %v851_v12, %v3050_v20  ;;  %v1255_v29 = vmul.f32 %v1241_v31, %v2882_v41 }
 0x36a   :  { %v1256_v53 = vmul.f32 %v1237_v6, %v2885_v42  ;;  %v3795_v12 = vmul.f32 %v912_v3, %v2931_v4  ;;  %v978_v48 = vsel %vm356_vm6, %v3510_v34, %v974_v43  ;;  %v847_v31 = vsel %vm276_vm9, %v3304_v39, %v3414_v1 }
 0x36b   :  { %v3768_v18 = vpop.permute.xlu1 %891  ;;  %v1291_v21 = vpack.c.bf16 %v1003_v24, %v999_v26  ;;  %v1214_v36 = vpop.permute.xlu0 %1213  ;;  %v982_v39 = vsel %vm356_vm6, %v3673_v38, %v3510_v34  ;;  %v852_v34 = vsel %vm276_vm9, %v3416_v10, %v3314_v0 }
 0x36c   :  { %v1238_v13 = vsel %vm516_vm2, %v1214_v36, %v3480_v15  ;;  %v1242_v30 = vsel %vm516_vm2, %v3488_v49, %v1214_v36  ;;  %v921_v6 = vsel %vm316_vm7, %v3486_v46, %v3768_v18  ;;  %v856_v36 = vsel %vm276_vm9, %v3290_v11, %v3416_v10 }
 0x36d   :  { %v1259_v26 = vmul.f32 %v1242_v30, %v2882_v41  ;;  %v1260_v55 = vmul.f32 %v1238_v13, %v2885_v42  ;;  %1398 = vmatpush1.bf16.msra.mxu0 %v1291_v21  ;;  %v859_v13 = vsel %vm276_vm9, %v3414_v1, %v3280_v5  ;;  %v1006_v1 = vmul.f32 %v978_v48, %v2947_v27 }
 0x36e   :  { %1399 = vmatprep.subr.bf16.mxu0 %v1288_v57  ;;  %v977_v57 = vsel %vm356_vm6, %v3494_v19, %v3671_v16  ;;  %v3833_v16 = vmul.f32 %v859_v13, %v3056_v60 }
 0x36f   :  { %v908_v30 = vpop.permute.xlu1 %907  ;;  %v1331_v3 = vpack.c.bf16 %v1259_v26, %v1255_v29  ;;  %v894_v21 = vpop.permute.xlu0 %893  ;;  %v1332_v43 = vpack.c.bf16 %v1260_v55, %v1256_v53  ;;  %v936_v29 = vmul.f32 %v921_v6, %v2988_v58  ;;  %v3847_v26 = vmul.f32 %v847_v31, %v3059_v23 }
 0x370   :  { %v922_v5 = vsel %vm316_vm7, %v3496_v37, %v894_v21  ;;  %v925_v38 = vsel %vm316_vm7, %v908_v30, %v3486_v46  ;;  %v981_v55 = vsel %vm356_vm6, %v3620_v28, %v3494_v19  ;;  %v1002_v10 = vmul.f32 %v977_v57, %v2947_v27  ;;  %v3873_v57 = vld [vmem:[%s5610_s6 + $0x8] ss:$12 sps:$4 sm:$0xff]  }
 0x371   :  { %v940_v53 = vmul.f32 %v922_v5, %v2988_v58  ;;  %1400 = vmatpush1.bf16.msra.mxu0 %v1287_v52  ;;  %1462 = vmatprep.subr.bf16.mxu1 %v1332_v43  ;;  %v3855_v46 = vmul.f32 %v856_v36, %v2995_v61  ;;  %v1005_v31 = vmul.f32 %v982_v39, %v2913_v59  ;;  %v5935_v39 = vld [vmem:[#allocation65_spill] sm:$0xff] }
 0x372   :  { %1463 = vmatpush1.bf16.msra.mxu1 %v1331_v3  ;;  %v5933_v3 = vld [vmem:[#allocation66_spill] sm:$0xff]  ;;  %v3866_v28 = vmul.f32 %v852_v34, %v3050_v20  ;;  %v935_v19 = vmul.f32 %v925_v38, %v3018_v14  ;;  %v1294_v36 = vpack.c.bf16 %v1006_v1, %v1002_v10  ;;  %v5937_v38 = vld [vmem:[#allocation81_spill] sm:$0xff]  ;;  %v5938_v10 = vpack.c.bf16 %v3682_v40, %v3665_v25 }
 0x373   :  { %v3842_v48 = vpop.permute.xlu1 %827  ;;  %1464 = vmatprep.subr.bf16.mxu1 %v1328_v35  ;;  %v910_v6 = vpop.permute.xlu0 %909  ;;  %v1284_v13 = vpack.c.bf16 %v940_v53, %v936_v29  ;;  %v860_v43 = vsel %vm276_vm9, %v5933_v3, %v3290_v11  ;;  %v5934_v11 = vld [vmem:[#allocation54_spill] sm:$0xff]  ;;  %v5936_v53 = vld [vmem:[#allocation77_spill] sm:$0xff] }
 0x374   :  { %v926_v5 = vsel %vm316_vm7, %v910_v6, %v3496_v37  ;;  %v787_v29 = vsel %vm237_vm8, %v5935_v39, %v5934_v11  ;;  %v1001_v37 = vmul.f32 %v981_v55, %v2913_v59  ;;  %v857_v34 = vsel %vm276_vm9, %v5936_v53, %v3842_v48  ;;  %v5940_v25 = vld [vmem:[#allocation78_spill] sm:$0xff] }
 0x375   :  { %v939_v35 = vmul.f32 %v926_v5, %v3018_v14  ;;  %1401 = vmatprep.subr.bf16.mxu0 %v1284_v13  ;;  %v914_v1 = vsel %vm316_vm7, %v5937_v38, %v910_v6  ;;  %v5939_v5 = vld [vmem:[#allocation49_spill] sm:$0xff]  ;;  %v848_v55 = vsel %vm276_vm9, %v3314_v0, %v5933_v3  ;;  %v3899_v24 = vmul.f32 %v860_v43, %v3056_v60 }
 0x376   :  { %1465 = vmatpush1.bf16.msra.mxu1 %v5938_v10  ;;  %v791_v52 = vsel %vm237_vm8, %v5939_v5, %v5935_v39  ;;  %v1293_v58 = vpack.c.bf16 %v1005_v31, %v1001_v37  ;;  %v913_v40 = vsel %vm316_vm7, %v5940_v25, %v908_v30  ;;  %v918_v39 = vsel %vm316_vm7, %v894_v21, %v5937_v38  ;;  %v5941_v10 = vld [vmem:[#allocation79_spill] sm:$0xff] }
 0x377   :  { %v844_v13 = vpop.permute.xlu1 %843  ;;  %v1283_v14 = vpack.c.bf16 %v939_v35, %v935_v19  ;;  %1503 = vmatprep.subr.bf16.mxu1 %v1294_v36  ;;  %v830_v6 = vpop.permute.xlu0 %829  ;;  %v872_v0 = vmul.f32 %v857_v34, %v2995_v61  ;;  %v942_v3 = vmul.f32 %v914_v1, %v2931_v4  ;;  %v5942_v31 = vpack.c.bf16 %v3727_v50, %v3713_v22  ;;  %v5944_v37 = vld [vmem:[#allocation23_spill] sm:$0xff] }
 0x378   :  { %v858_v42 = vsel %vm276_vm9, %v5941_v10, %v830_v6  ;;  %v861_v21 = vsel %vm276_vm9, %v844_v13, %v5936_v53  ;;  %v917_v35 = vsel %vm316_vm7, %v3768_v18, %v5940_v25  ;;  %v938_v36 = vmul.f32 %v913_v40, %v2931_v4  ;;  %v5948_v40 = vld [vmem:[#allocation80_spill] sm:$0xff] }
 0x379   :  { %v876_v43 = vmul.f32 %v858_v42, %v2995_v61  ;;  %1402 = vmatpush1.bf16.msra.mxu0 %v1283_v14  ;;  %2521 = vmatmul.mubr.msk.bf16.vlgmr.msra.gmra.mxu1 %vm1390_vm11, %v3873_v57  ;;  %v1272_v42 = vpack.c.bf16 %v3855_v46, %v3779_v8  ;;  %v3928_v14 = vmul.f32 %v848_v55, %v3059_v23  ;;  %v5945_v8 = vld [vmem:[#allocation24_spill] sm:$0xff]  ;;  %v5946_v38 = vmov 0   ;;  %v3959_v55 = vld [vmem:[%s5610_s6 + $0x20] ss:$12 sps:$4 sm:$0xff]  }
 0x37a   :  { %1403 = vmatprep.subr.bf16.mxu0 %v5942_v31  ;;  %1504 = vmatpush1.bf16.msra.mxu1 %v1293_v58  ;;  %v5943_v22 = vpack.c.bf16 %v3654_v9, %v3638_v47  ;;  %v3939_v53 = vmul.f32 %v791_v52, %v5944_v37  ;;  %v3942_v46 = vmul.f32 %v787_v29, %v5945_v8 }
 0x37b   :  { %v3923_v19 = vpop.permute.xlu1 %763  ;;  %v846_v58 = vpop.permute.xlu0 %845  ;;  %v1276_v50 = vpack.c.bf16 %v876_v43, %v872_v0  ;;  %v941_v34 = vmul.f32 %v918_v39, %v2907_v51  ;;  %1492 = vmatprep.mubr.bf16.mxu1 %v5946_v38  ;;  %v1271_v47 = vpack.c.bf16 %v3899_v24, %v3833_v16  ;;  %v871_v9 = vmul.f32 %v861_v21, %v3056_v60  ;;  %v5949_v16 = vld [vmem:[#allocation85_spill] sm:$0xff]  ;;  %v5952_v0 = vld [vmem:[#allocation67_spill] sm:$0xff]  ;;  %v5953_v43 = vld [vmem:[#allocation68_spill] sm:$0xff] }
 0x37c   :  { %1505 = vmatprep.subr.bf16.mxu1 %v5943_v22  ;;  %v862_v18 = vsel %vm276_vm9, %v846_v58, %v5941_v10  ;;  %v5947_v52 = vpack.c.bf16 %v3760_v56, %v3739_v63  ;;  %v1286_v29 = vpack.c.bf16 %v942_v3, %v938_v36  ;;  %v937_v25 = vmul.f32 %v917_v35, %v2907_v51  ;;  %v5950_v63 = vld [vmem:[#allocation99_spill] sm:$0xff]  ;;  %v5954_v21 = vld [vmem:[#allocation50_spill] sm:$0xff] }
 0x37d   :  { %v875_v1 = vmul.f32 %v862_v18, %v3056_v60  ;;  %v793_v24 = vsel %vm237_vm8, %v5948_v40, %v3923_v19  ;;  %v850_v39 = vsel %vm276_vm9, %v5949_v16, %v846_v58  ;;  %v5951_v56 = vpack.c.bf16 %v3607_v44, %v5950_v63  ;;  %v5955_v58 = vld [vmem:[#allocation82_spill] sm:$0xff]  ;;  %v5956_v18 = vld [vmem:[#allocation83_spill] sm:$0xff]  ;;  %v5984_v60 = vld [vmem:[#allocation13_spill] sm:$0xff] }
 0x37e   :  { %1404 = vmatpush1.bf16.msra.mxu0 %v5947_v52  ;;  %v3976_v3 = vsel %vm237_vm8, %v5934_v11, %v5952_v0  ;;  %v792_v31 = vsel %vm237_vm8, %v5954_v21, %v5953_v43  ;;  %v1274_v22 = vpack.c.bf16 %v3928_v14, %v3847_v26  ;;  %v1285_v44 = vpack.c.bf16 %v941_v34, %v937_v25 }
 0x37f   :  { %1405 = vmatprep.subr.bf16.mxu0 %v1276_v50  ;;  %1506 = vmatpush1.bf16.msra.mxu1 %v5951_v56  ;;  %v780_v10 = vpop.permute.xlu1 %779  ;;  %v1275_v35 = vpack.c.bf16 %v875_v1, %v871_v9  ;;  %v766_v36 = vpop.permute.xlu0 %765  ;;  %v849_v50 = vsel %vm276_vm9, %v5955_v58, %v844_v13  ;;  %v854_v11 = vsel %vm276_vm9, %v830_v6, %v5949_v16  ;;  %v5957_v6 = vld [vmem:[#allocation57_spill] sm:$0xff] }
 0x380   :  { %1507 = vmatprep.subr.bf16.mxu1 %v1286_v29  ;;  %v794_v52 = vsel %vm237_vm8, %v5956_v18, %v766_v36  ;;  %v808_v9 = vmul.f32 %v793_v24, %v5944_v37  ;;  %v878_v1 = vmul.f32 %v850_v39, %v3059_v23  ;;  %v795_v13 = vsel %vm237_vm8, %v5952_v0, %v5939_v5  ;;  %v5959_v0 = vld [vmem:[#allocation76_spill] sm:$0xff] }
 0x381   :  { %v812_v29 = vmul.f32 %v794_v52, %v5944_v37  ;;  %2522 = vmatmul.mubr.msk.bf16.gmra.mxu1 %vm1390_vm11, %v3959_v55  ;;  %v788_v34 = vsel %vm237_vm8, %v5953_v43, %v5957_v6  ;;  %v797_v25 = vsel %vm237_vm8, %v780_v10, %v5948_v40  ;;  %v853_v16 = vsel %vm276_vm9, %v3842_v48, %v5955_v58  ;;  %v5960_v40 = vld [vmem:[#allocation70_spill] sm:$0xff] }
 0x382   :  { %1406 = vmatpush1.bf16.msra.mxu0 %v1275_v35  ;;  %v874_v5 = vmul.f32 %v849_v50, %v3059_v23  ;;  %v5958_v39 = vpack.c.bf16 %v3795_v12, %v3757_v17  ;;  %1535 = vmatprep.mubr.bf16.mxu1 %v5959_v0  ;;  %v796_v43 = vsel %vm237_vm8, %v5960_v40, %v5954_v21  ;;  %v5962_v12 = vld [vmem:[#allocation91_spill] sm:$0xff]  ;;  %v5969_v0 = vld [vmem:[#allocation69_spill] sm:$0xff] }
 0x383   :  { %1407 = vmatprep.subr.bf16.mxu0 %v1272_v42  ;;  %1508 = vmatpush1.bf16.msra.mxu1 %v1285_v44  ;;  %v4009_v24 = vpop.permute.xlu1 %1015  ;;  %v782_v63 = vpop.permute.xlu0 %781  ;;  %v1268_v56 = vpack.c.bf16 %v812_v29, %v808_v9  ;;  %v804_v42 = vmul.f32 %v792_v31, %v5944_v37  ;;  %v877_v35 = vmul.f32 %v854_v11, %v3050_v20  ;;  %v5961_v44 = vld [vmem:[#allocation25_spill] sm:$0xff] }
 0x384   :  { %1509 = vmatprep.subr.bf16.mxu1 %v5958_v39  ;;  %v798_v48 = vsel %vm237_vm8, %v782_v63, %v5956_v18  ;;  %v807_v17 = vmul.f32 %v797_v25, %v5961_v44  ;;  %v786_v58 = vsel %vm237_vm8, %v5962_v12, %v782_v63  ;;  %v1278_v31 = vpack.c.bf16 %v878_v1, %v874_v5  ;;  %v5964_v1 = vld [vmem:[#allocation88_spill] sm:$0xff]  ;;  %v5967_v39 = vld [vmem:[#allocation26_spill] sm:$0xff] }
 0x385   :  { %v811_v50 = vmul.f32 %v798_v48, %v5961_v44  ;;  %v799_v52 = vmul.f32 %v795_v13, %v5961_v44  ;;  %v784_v21 = vsel %vm237_vm8, %v5957_v6, %v5960_v40  ;;  %v873_v11 = vmul.f32 %v853_v16, %v3050_v20  ;;  %v5965_v16 = vld [vmem:[#allocation53_spill] sm:$0xff]  ;;  %v5966_v5 = vld [vmem:[#allocation72_spill] sm:$0xff] }
 0x386   :  { %1408 = vmatpush1.bf16.msra.mxu0 %v1271_v47  ;;  %v5963_v18 = vpack.c.bf16 %v3730_v7, %v3716_v62  ;;  %v4044_v29 = vmul.f32 %v788_v34, %v5945_v8  ;;  %v803_v47 = vmul.f32 %v796_v43, %v5961_v44  ;;  %v785_v13 = vsel %vm237_vm8, %v5964_v1, %v780_v10  ;;  %v5970_v10 = vld [vmem:[#allocation52_spill] sm:$0xff] }
 0x387   :  { %1409 = vmatprep.subr.bf16.mxu0 %v1268_v56  ;;  %v1148_v9 = vpop.permute.xlu1 %1147  ;;  %v1267_v25 = vpack.c.bf16 %v811_v50, %v807_v17  ;;  %v4050_v6 = vpop.permute.xlu0 %1017  ;;  %v1172_v62 = vsel %vm476_vm4, %v5966_v5, %v5965_v16  ;;  %v1277_v7 = vpack.c.bf16 %v877_v35, %v873_v11  ;;  %v814_v63 = vmul.f32 %v786_v58, %v5967_v39  ;;  %v5968_v56 = vld [vmem:[#allocation51_spill] sm:$0xff]  ;;  %v5972_v58 = vld [vmem:[#allocation86_spill] sm:$0xff] }
 0x388   :  { %1510 = vmatpush1.bf16.msra.mxu1 %v5963_v18  ;;  %v1264_v34 = vpack.c.bf16 %v804_v42, %v3939_v53  ;;  %v1171_v40 = vsel %vm476_vm4, %v5969_v0, %v5968_v56  ;;  %v1175_v43 = vsel %vm476_vm4, %v5970_v10, %v5969_v0  ;;  %v806_v48 = vmul.f32 %v784_v21, %v5967_v39  ;;  %v5971_v53 = vld [vmem:[#allocation84_spill] sm:$0xff]  ;;  %v5973_v21 = vld [vmem:[#allocation55_spill] sm:$0xff] }
 0x389   :  { %1511 = vmatprep.subr.bf16.mxu1 %v1278_v31  ;;  %v790_v35 = vsel %vm237_vm8, %v766_v36, %v5962_v12  ;;  %v810_v17 = vmul.f32 %v785_v13, %v5967_v39  ;;  %v1173_v42 = vsel %vm476_vm4, %v1148_v9, %v5971_v53  ;;  %v1177_v50 = vsel %vm476_vm4, %v5972_v58, %v1148_v9  ;;  %v5974_v12 = vld [vmem:[#allocation16_spill] sm:$0xff] }
 0x38a   :  { %1410 = vmatpush1.bf16.msra.mxu0 %v1267_v25  ;;  %v1263_v11 = vpack.c.bf16 %v803_v47, %v799_v52  ;;  %v1176_v36 = vsel %vm476_vm4, %v5973_v21, %v5966_v5  ;;  %v1188_v18 = vmul.f32 %v1172_v62, %v5974_v12  ;;  %v789_v13 = vsel %vm237_vm8, %v3923_v19, %v5964_v1  ;;  %v5975_v52 = vld [vmem:[#allocation87_spill] sm:$0xff] }
 0x38b   :  { %1411 = vmatprep.subr.bf16.mxu0 %v1264_v34  ;;  %v1084_v31 = vpop.permute.xlu1 %1083  ;;  %v1150_v9 = vpop.permute.xlu0 %1149  ;;  %v813_v25 = vmul.f32 %v790_v35, %v5945_v8  ;;  %v1270_v62 = vpack.c.bf16 %v814_v63, %v810_v17  ;;  %v5977_v34 = vld [vmem:[#allocation15_spill] sm:$0xff]  ;;  %v1192_v19 = vmul.f32 %v1173_v42, %v5974_v12  ;;  %v802_v14 = vmul.f32 %v3976_v3, %v5967_v39 }
 0x38c   :  { %1512 = vmatpush1.bf16.msra.mxu1 %v1277_v7  ;;  %v1174_v47 = vsel %vm476_vm4, %v1150_v9, %v5975_v52  ;;  %v5976_v7 = vld [vmem:[#allocation89_spill] sm:$0xff]  ;;  %v1191_v0 = vmul.f32 %v1177_v50, %v5977_v34  ;;  %v5979_v35 = vld [vmem:[#allocation59_spill] sm:$0xff]  ;;  %v809_v63 = vmul.f32 %v789_v13, %v5945_v8  ;;  %v5980_v17 = vpack.c.bf16 %v3866_v28, %v3782_v33  ;;  %v5982_v33 = vld [vmem:[#allocation60_spill] sm:$0xff] }
 0x38d   :  { %1513 = vmatprep.subr.bf16.mxu1 %v1274_v22  ;;  %v1178_v5 = vsel %vm476_vm4, %v5976_v7, %v1150_v9  ;;  %v1196_v26 = vmul.f32 %v1174_v47, %v5974_v12  ;;  %v5978_v22 = vld [vmem:[#allocation71_spill] sm:$0xff]  ;;  %v1187_v9 = vmul.f32 %v1176_v36, %v5977_v34  ;;  %v1184_v50 = vmul.f32 %v1171_v40, %v5974_v12  ;;  %v5983_v28 = vld [vmem:[#allocation74_spill] sm:$0xff] }
 0x38e   :  { %v1195_v1 = vmul.f32 %v1178_v5, %v5977_v34  ;;  %1412 = vmatpush1.bf16.msra.mxu0 %v1263_v11  ;;  %v1111_v30 = vsel %vm436_vm3, %v5979_v35, %v5978_v22  ;;  %v5981_v11 = vld [vmem:[#allocation56_spill] sm:$0xff]  ;;  %v1265_v36 = vpack.c.bf16 %v4044_v29, %v3942_v46  ;;  %v1183_v13 = vmul.f32 %v1175_v43, %v5977_v34  ;;  %v5987_v43 = vld [vmem:[#allocation90_spill] sm:$0xff]  ;;  %v5989_v34 = vld [vmem:[#allocation63_spill] sm:$0xff] }
 0x38f   :  { %v1164_v42 = vpop.permute.xlu1 %1163  ;;  %v1107_v3 = vsel %vm436_vm3, %v5978_v22, %v5981_v11  ;;  %v4116_v5 = vpop.permute.xlu0 %1025  ;;  %v1324_v37 = vpack.c.bf16 %v1196_v26, %v1192_v19  ;;  %v1108_v40 = vsel %vm436_vm3, %v5983_v28, %v5982_v33  ;;  %v4126_v61 = vmul.f32 %v1111_v30, %v5984_v60  ;;  %v5985_v22 = vld [vmem:[#allocation92_spill] sm:$0xff] }
 0x390   :  { %1514 = vmatpush1.bf16.msra.mxu1 %v5980_v17  ;;  %v1323_v47 = vpack.c.bf16 %v1195_v1, %v1191_v0  ;;  %v1269_v17 = vpack.c.bf16 %v813_v25, %v809_v63  ;;  %v1320_v0 = vpack.c.bf16 %v1188_v18, %v1184_v50  ;;  %v1266_v19 = vpack.c.bf16 %v806_v48, %v802_v14  ;;  %v5986_v1 = vld [vmem:[#allocation14_spill] sm:$0xff]  ;;  %v5988_v63 = vld [vmem:[#allocation73_spill] sm:$0xff] }
 0x391   :  { %1515 = vmatprep.subr.bf16.mxu1 %v1270_v62  ;;  %v1113_v62 = vsel %vm436_vm3, %v5985_v22, %v1084_v31  ;;  %1413 = vmatprep.subr.bf16.mxu0 %v1324_v37  ;;  %v1120_v46 = vmul.f32 %v1107_v3, %v5986_v1  ;;  %v1319_v29 = vpack.c.bf16 %v1187_v9, %v1183_v13  ;;  %v5991_v50 = vld [vmem:[#allocation93_spill] sm:$0xff]  ;;  %v5992_v3 = vld [vmem:[#allocation95_spill] sm:$0xff] }
 0x392   :  { %v1109_v26 = vsel %vm436_vm3, %v1084_v31, %v5987_v43  ;;  %1414 = vmatpush2.bf16.msra.mxu0 %v1323_v47  ;;  %v1167_v30 = vsel %vm476_vm4, %v5968_v56, %v5988_v63  ;;  %v1112_v37 = vsel %vm436_vm3, %v5989_v34, %v5983_v28  ;;  %v1124_v48 = vmul.f32 %v1108_v40, %v5986_v1  ;;  %v5990_v31 = vld [vmem:[#allocation75_spill] sm:$0xff] }
 0x393   :  { %v1020_v25 = vpop.permute.xlu1 %1019  ;;  %1415 = vmatprep.subr.bf16.mxu0 %v1320_v0  ;;  %v1086_v18 = vpop.permute.xlu0 %1085  ;;  %v1180_v14 = vsel %vm476_vm4, %v5990_v31, %v5973_v21  ;;  %v1127_v9 = vmul.f32 %v1113_v62, %v5984_v60  ;;  %v1128_v13 = vmul.f32 %v1109_v26, %v5986_v1  ;;  %v1169_v28 = vsel %vm476_vm4, %v5971_v53, %v1164_v42 }
 0x394   :  { %1516 = vmatpush1.bf16.msra.mxu1 %v1269_v17  ;;  %v1110_v56 = vsel %vm436_vm3, %v1086_v18, %v5991_v50  ;;  %v1114_v47 = vsel %vm436_vm3, %v5992_v3, %v1086_v18  ;;  %v1179_v17 = vsel %vm476_vm4, %v5988_v63, %v5970_v10  ;;  %v1123_v62 = vmul.f32 %v1112_v37, %v5984_v60  ;;  %v5993_v10 = vld [vmem:[#allocation8_spill] sm:$0xff]  ;;  %v5994_v37 = vld [vmem:[#allocation7_spill] sm:$0xff] }
 0x395   :  { %1517 = vmatprep.subr.bf16.mxu1 %v1266_v19  ;;  %v1131_v40 = vmul.f32 %v1114_v47, %v5984_v60  ;;  %v1132_v21 = vmul.f32 %v1110_v56, %v5986_v1  ;;  %v1181_v0 = vsel %vm476_vm4, %v1164_v42, %v5972_v58  ;;  %v1168_v53 = vsel %vm476_vm4, %v5965_v16, %v5990_v31  ;;  %v5995_v31 = vld [vmem:[#allocation94_spill] sm:$0xff] }
 0x396   :  { %1416 = vmatpush2.bf16.msra.mxu0 %v1319_v29  ;;  %v1312_v47 = vpack.c.bf16 %v1124_v48, %v1120_v46  ;;  %v1190_v63 = vmul.f32 %v1180_v14, %v5993_v10  ;;  %v1193_v1 = vmul.f32 %v1169_v28, %v5994_v37  ;;  %v1186_v48 = vmul.f32 %v1179_v17, %v5993_v10  ;;  %v5996_v14 = vld [vmem:[#allocation96_spill] sm:$0xff] }
 0x397   :  { %v4169_v19 = vpop.permute.xlu1 %1023  ;;  %v1315_v26 = vpack.c.bf16 %v1131_v40, %v1127_v9  ;;  %v1166_v18 = vpop.permute.xlu0 %1165  ;;  %v1316_v56 = vpack.c.bf16 %v1132_v21, %v1128_v13  ;;  %v1049_v9 = vsel %vm396_vm5, %v5996_v14, %v1020_v25  ;;  %v1189_v28 = vmul.f32 %v1168_v53, %v5994_v37 }
 0x398   :  { %1518 = vmatpush1.bf16.msra.mxu1 %v1265_v36  ;;  %v1170_v58 = vsel %vm476_vm4, %v5975_v52, %v1166_v18  ;;  %v1182_v42 = vsel %vm476_vm4, %v1166_v18, %v5976_v7  ;;  %v1194_v36 = vmul.f32 %v1181_v0, %v5993_v10  ;;  %v1043_v16 = vsel %vm396_vm5, %v4009_v24, %v4169_v19  ;;  %v5998_v18 = vld [vmem:[#allocation97_spill] sm:$0xff] }
 0x399   :  { %v1197_v46 = vmul.f32 %v1170_v58, %v5994_v37  ;;  %v1198_v29 = vmul.f32 %v1182_v42, %v5993_v10  ;;  %1417 = vmatprep.subr.bf16.mxu0 %v1316_v56  ;;  %v1311_v52 = vpack.c.bf16 %v1123_v62, %v4126_v61  ;;  %v1045_v7 = vsel %vm396_vm5, %v1020_v25, %v5995_v31  ;;  %v5997_v62 = vld [vmem:[#allocation18_spill] sm:$0xff]  ;;  %v6000_v58 = vld [vmem:[#allocation17_spill] sm:$0xff] }
 0x39a   :  { %1418 = vmatpush2.bf16.msra.mxu0 %v1315_v26  ;;  %v1044_v40 = vsel %vm396_vm5, %v4050_v6, %v4116_v5  ;;  %v1056_v0 = vmul.f32 %v1043_v16, %v5997_v62  ;;  %v5999_v26 = vld [vmem:[#allocation98_spill] sm:$0xff]  ;;  %v1322_v53 = vpack.c.bf16 %v1190_v63, %v1186_v48  ;;  %v1063_v42 = vmul.f32 %v1049_v9, %v6000_v58 }
 0x39b   :  { %v4198_v13 = vpop.permute.xlu1 %1007  ;;  %v1325_v21 = vpack.c.bf16 %v1197_v46, %v1193_v1  ;;  %1419 = vmatprep.subr.bf16.mxu0 %v1312_v47  ;;  %v1022_v61 = vpop.permute.xlu0 %1021  ;;  %v1326_v17 = vpack.c.bf16 %v1198_v29, %v1194_v36  ;;  %v1064_v60 = vmul.f32 %v1045_v7, %v5997_v62  ;;  %v1185_v36 = vmul.f32 %v1167_v30, %v5994_v37 }
 0x39c   :  { %v1046_v25 = vsel %vm396_vm5, %v1022_v61, %v5998_v18  ;;  %v1050_v56 = vsel %vm396_vm5, %v5999_v26, %v1022_v61  ;;  %v1060_v16 = vmul.f32 %v1044_v40, %v5997_v62  ;;  %v1047_v46 = vsel %vm396_vm5, %v4198_v13, %v4009_v24 }
 0x39d   :  { %v1067_v1 = vmul.f32 %v1050_v56, %v6000_v58  ;;  %v1068_v47 = vmul.f32 %v1046_v25, %v5997_v62  ;;  %1519 = vmatprep.subr.bf16.mxu1 %v1326_v17  ;;  %v1321_v9 = vpack.c.bf16 %v1189_v28, %v1185_v36  ;;  %v1055_v61 = vmul.f32 %v1047_v46, %v6000_v58  ;;  %v6001_v17 = vld [vmem:[#allocation58_spill] sm:$0xff]  ;;  %v6003_v56 = vld [vmem:[#allocation5_spill] sm:$0xff] }
 0x39e   :  { %1420 = vmatpush2.bf16.msra.mxu0 %v1311_v52  ;;  %1520 = vmatpush2.bf16.msra.mxu1 %v1325_v21  ;;  %v1304_v40 = vpack.c.bf16 %v1060_v16, %v1056_v0  ;;  %v6002_v0 = vld [vmem:[#allocation62_spill] sm:$0xff] }
 0x39f   :  { %v1100_v63 = vpop.permute.xlu1 %1099  ;;  %v1307_v29 = vpack.c.bf16 %v1067_v1, %v1063_v42  ;;  %1521 = vmatprep.subr.bf16.mxu1 %v1322_v53  ;;  %v4222_v48 = vpop.permute.xlu0 %1009  ;;  %v1308_v7 = vpack.c.bf16 %v1068_v47, %v1064_v60  ;;  %v1300_v25 = vpack.c.bf16 %v6002_v0, %v6001_v17  ;;  %v6004_v42 = vld [vmem:[#allocation6_spill] sm:$0xff] }
 0x3a0   :  { %v1048_v30 = vsel %vm396_vm5, %v4222_v48, %v4050_v6  ;;  %v1105_v24 = vsel %vm436_vm3, %v5987_v43, %v1100_v63  ;;  %v1117_v52 = vsel %vm436_vm3, %v1100_v63, %v5985_v22 }
 0x3a1   :  { %v1059_v21 = vmul.f32 %v1048_v30, %v6000_v58  ;;  %1421 = vmatprep.subr.bf16.mxu0 %v1308_v7  ;;  %v1129_v53 = vmul.f32 %v1105_v24, %v6003_v56  ;;  %v1130_v43 = vmul.f32 %v1117_v52, %v6004_v42 }
 0x3a2   :  { %1422 = vmatpush2.bf16.msra.mxu0 %v1307_v29  ;;  %1522 = vmatpush2.bf16.msra.mxu1 %v1321_v9  ;;  %v6005_v9 = vld [vmem:[#allocation41_spill] sm:$0xff] }
 0x3a3   :  { %v1096_v60 = vpop.permute.xlu1 %1095  ;;  %v1303_v28 = vpack.c.bf16 %v1059_v21, %v1055_v61  ;;  %1423 = vmatprep.subr.bf16.mxu0 %v1304_v40  ;;  %v1102_v6 = vpop.permute.xlu0 %1101  ;;  %v6007_v40 = vld [vmem:[#allocation37_spill] sm:$0xff]  ;;  %v6008_v61 = vld [vmem:[#allocation39_spill] sm:$0xff] }
 0x3a4   :  { %v1106_v22 = vsel %vm436_vm3, %v5991_v50, %v1102_v6  ;;  %v1118_v1 = vsel %vm436_vm3, %v1102_v6, %v5992_v3  ;;  %v1103_v47 = vsel %vm436_vm3, %v5981_v11, %v1096_v60  ;;  %v1115_v36 = vsel %vm436_vm3, %v1096_v60, %v5979_v35  ;;  %v6006_v3 = vld [vmem:[#allocation43_spill] sm:$0xff] }
 0x3a5   :  { %v1133_v16 = vmul.f32 %v1106_v22, %v6003_v56  ;;  %v1134_v46 = vmul.f32 %v1118_v1, %v6004_v42  ;;  %v1299_v30 = vpack.c.bf16 %v6006_v3, %v6005_v9  ;;  %v1296_v11 = vpack.c.bf16 %v6008_v61, %v6007_v40 }
 0x3a6   :  { %1424 = vmatpush2.bf16.msra.mxu0 %v1303_v28  ;;  %v1121_v24 = vmul.f32 %v1103_v47, %v6003_v56  ;;  %v1122_v35 = vmul.f32 %v1115_v36, %v6004_v42  ;;  %v6012_v47 = vld [vmem:[#allocation10_spill] sm:$0xff] }
 0x3a7   :  { %v1036_v63 = vpop.permute.xlu1 %1035  ;;  %v1317_v29 = vpack.c.bf16 %v1133_v16, %v1129_v53  ;;  %1425 = vmatprep.subr.bf16.mxu0 %v1300_v25  ;;  %v1098_v50 = vpop.permute.xlu0 %1097  ;;  %v1318_v7 = vpack.c.bf16 %v1134_v46, %v1130_v43  ;;  %v6009_v53 = vld [vmem:[#allocation33_spill] sm:$0xff]  ;;  %v6010_v43 = vld [vmem:[#allocation35_spill] sm:$0xff] }
 0x3a8   :  { %v1104_v52 = vsel %vm436_vm3, %v5982_v33, %v1098_v50  ;;  %v1116_v21 = vsel %vm436_vm3, %v1098_v50, %v5989_v34  ;;  %v1041_v60 = vsel %vm396_vm5, %v5995_v31, %v1036_v63  ;;  %v1053_v28 = vsel %vm396_vm5, %v1036_v63, %v5996_v14  ;;  %v6011_v31 = vld [vmem:[#allocation9_spill] sm:$0xff] }
 0x3a9   :  { %v1125_v6 = vmul.f32 %v1104_v52, %v6003_v56  ;;  %v1126_v17 = vmul.f32 %v1116_v21, %v6004_v42  ;;  %1523 = vmatprep.subr.bf16.mxu1 %v1318_v7  ;;  %v1295_v22 = vpack.c.bf16 %v6010_v43, %v6009_v53  ;;  %v1065_v1 = vmul.f32 %v1041_v60, %v6011_v31  ;;  %v6017_v53 = vld [vmem:[#allocation45_spill] sm:$0xff] }
 0x3aa   :  { %1426 = vmatpush2.bf16.msra.mxu0 %v1299_v30  ;;  %1524 = vmatpush2.bf16.msra.mxu1 %v1317_v29  ;;  %v1066_v36 = vmul.f32 %v1053_v28, %v6012_v47  ;;  %v6013_v28 = vld [vmem:[#allocation3_spill] sm:$0xff] }
 0x3ab   :  { %v1032_v33 = vpop.permute.xlu1 %1031  ;;  %v1313_v0 = vpack.c.bf16 %v1125_v6, %v1121_v24  ;;  %1427 = vmatprep.subr.bf16.mxu0 %v1296_v11  ;;  %v1038_v25 = vpop.permute.xlu0 %1037  ;;  %v1314_v34 = vpack.c.bf16 %v1126_v17, %v1122_v35 }
 0x3ac   :  { %v1042_v14 = vsel %vm396_vm5, %v5998_v18, %v1038_v25  ;;  %v1054_v16 = vsel %vm396_vm5, %v1038_v25, %v5999_v26  ;;  %v1039_v46 = vsel %vm396_vm5, %v4169_v19, %v1032_v33  ;;  %v1051_v63 = vsel %vm396_vm5, %v1032_v33, %v4198_v13  ;;  %v2545_v18 = vld [vmem:[%s5610_s6] ss:$12 sps:$4 sm:$0xff]   ;;  %v2548_v19 = vld [vmem:[%s5610_s6 + $0x1c] ss:$12 sps:$4 sm:$0xff]  }
 0x3ad   :  { %v1069_v29 = vmul.f32 %v1042_v14, %v6011_v31  ;;  %v1070_v50 = vmul.f32 %v1054_v16, %v6012_v47  ;;  %1525 = vmatprep.subr.bf16.mxu1 %v1314_v34  ;;  %v1057_v13 = vmul.f32 %v1039_v46, %v6011_v31  ;;  %v1058_v30 = vmul.f32 %v1051_v63, %v6012_v47  ;;  %v6014_v33 = vld [vmem:[#allocation61_spill] sm:$0xff]  ;;  %v6019_v63 = vld [vmem:[#allocation38_spill] sm:$0xff] }
 0x3ae   :  { %1428 = vmatpush2.bf16.msra.mxu0 %v1295_v22  ;;  %1526 = vmatpush2.bf16.msra.mxu1 %v1313_v0  ;;  %v6015_v0 = vld [vmem:[#allocation64_spill] sm:$0xff] }
 0x3af   :  { %v1228_v26 = vpop.permute.xlu1 %1227  ;;  %v1309_v7 = vpack.c.bf16 %v1069_v29, %v1065_v1  ;;  %v1034_v9 = vpop.permute.xlu0 %1033  ;;  %v1310_v3 = vpack.c.bf16 %v1070_v50, %v1066_v36  ;;  %v1302_v25 = vpack.c.bf16 %v6015_v0, %v6014_v33  ;;  %v6018_v36 = vld [vmem:[#allocation46_spill] sm:$0xff]  ;;  %v6020_v29 = vld [vmem:[#allocation40_spill] sm:$0xff] }
 0x3b0   :  { %v1040_v40 = vsel %vm396_vm5, %v4116_v5, %v1034_v9  ;;  %v1052_v61 = vsel %vm396_vm5, %v1034_v9, %v4222_v48  ;;  %v1233_v11 = vsel %vm516_vm2, %v3470_v2, %v1228_v26  ;;  %v1245_v52 = vsel %vm516_vm2, %v1228_v26, %v3478_v45  ;;  %v6016_v45 = vld [vmem:[#allocation4_spill] sm:$0xff] }
 0x3b1   :  { %v1061_v24 = vmul.f32 %v1040_v40, %v6011_v31  ;;  %v1062_v35 = vmul.f32 %v1052_v61, %v6012_v47  ;;  %1430 = vmatmul.mubr.bf16.vlgmr.msra.gmra.mxu0 %v2545_v18  ;;  %1527 = vmatprep.subr.bf16.mxu1 %v1310_v3  ;;  %v1257_v6 = vmul.f32 %v1233_v11, %v6013_v28  ;;  %v6022_v3 = vld [vmem:[#allocation48_spill] sm:$0xff] }
 0x3b2   :  { %1528 = vmatpush2.bf16.msra.mxu1 %v1309_v7  ;;  %1439 = vmatprep.mubr.bf16.mxu0 %v2548_v19  ;;  %v1258_v34 = vmul.f32 %v1245_v52, %v6016_v45  ;;  %v1298_v50 = vpack.c.bf16 %v6020_v29, %v6019_v63  ;;  %v6021_v7 = vld [vmem:[#allocation47_spill] sm:$0xff]  ;;  %v6024_v40 = vld [vmem:[#allocation44_spill] sm:$0xff] }
 0x3b3   :  { %v1224_v5 = vpop.permute.xlu1 %1223  ;;  %v1305_v21 = vpack.c.bf16 %v1061_v24, %v1057_v13  ;;  %v1230_v60 = vpop.permute.xlu0 %1229  ;;  %v1306_v48 = vpack.c.bf16 %v1062_v35, %v1058_v30  ;;  %v6023_v30 = vld [vmem:[#allocation42_spill] sm:$0xff] }
 0x3b4   :  { %v1234_v2 = vsel %vm516_vm2, %v3480_v15, %v1230_v60  ;;  %v1246_v17 = vsel %vm516_vm2, %v1230_v60, %v3488_v49  ;;  %v1231_v43 = vsel %vm516_vm2, %v6017_v53, %v1224_v5  ;;  %v2550_v15 = vld [vmem:[%s5610_s6 + $0x18] ss:$12 sps:$4 sm:$0xff]   ;;  %v1243_v49 = vsel %vm516_vm2, %v1224_v5, %v6018_v36  ;;  %v6026_v60 = vld [vmem:[#allocation36_spill] sm:$0xff] }
 0x3b5   :  { %v1261_v22 = vmul.f32 %v1234_v2, %v6013_v28  ;;  %v1262_v1 = vmul.f32 %v1246_v17, %v6016_v45  ;;  %1529 = vmatprep.subr.bf16.mxu1 %v1306_v48  ;;  %v1249_v26 = vmul.f32 %v1231_v43, %v6013_v28  ;;  %v1301_v61 = vpack.c.bf16 %v6024_v40, %v6023_v30 }
 0x3b6   :  { %1530 = vmatpush2.bf16.msra.mxu1 %v1305_v21  ;;  %v1250_v11 = vmul.f32 %v1243_v49, %v6016_v45  ;;  %v6025_v21 = vld [vmem:[#allocation34_spill] sm:$0xff] }
 0x3b7   :  { %v1333_v14 = vpack.c.bf16 %v1261_v22, %v1257_v6  ;;  %1531 = vmatprep.subr.bf16.mxu1 %v1302_v25  ;;  %v1226_v16 = vpop.permute.xlu0 %1225  ;;  %v1334_v46 = vpack.c.bf16 %v1262_v1, %v1258_v34  ;;  %v1297_v48 = vpack.c.bf16 %v6026_v60, %v6025_v21 }
 0x3b8   :  { %v1232_v9 = vsel %vm516_vm2, %v6021_v7, %v1226_v16  ;;  %v1244_v13 = vsel %vm516_vm2, %v1226_v16, %v6022_v3 }
 0x3b9   :  { %v1253_v24 = vmul.f32 %v1232_v9, %v6013_v28  ;;  %v1254_v35 = vmul.f32 %v1244_v13, %v6016_v45  ;;  %1440 = vmatmul.mubr.bf16.gmra.mxu0 %v2550_v15  ;;  %1568 = vmatprep.subr.bf16.mxu0 %v1334_v46 }
 0x3ba   :  { %1532 = vmatpush2.bf16.msra.mxu1 %v1301_v61  ;;  %1569 = vmatpush1.bf16.msra.mxu0 %v1333_v14 }
 0x3bb   :  { %v1329_v52 = vpack.c.bf16 %v1253_v24, %v1249_v26  ;;  %1533 = vmatprep.subr.bf16.mxu1 %v1298_v50  ;;  %v1330_v5 = vpack.c.bf16 %v1254_v35, %v1250_v11  ;;  %1588 = vmatprep.mubr.bf16.mxu0 %v5946_v38 }
 0x3bd   :  { %1570 = vmatprep.subr.bf16.mxu0 %v1330_v5 }
 0x3be   :  { %1534 = vmatpush2.bf16.msra.mxu1 %v1297_v48  ;;  %1571 = vmatpush1.bf16.msra.mxu0 %v1329_v52 }
 0x3c0   :  { %v4358_v6 = vpop.permute.xlu1 %1352 }
 0x3c1   :  { %1536 = vmatmul.mubr.bf16.vlgmr.msra.gmra.mxu1 %v2545_v18  ;;  %2523 = vmatmul.mubr.msk.bf16.vlgmr.msra.gmra.mxu0 %vm1390_vm11, %v3873_v57 }
 0x3c2   :  { %1545 = vmatprep.mubr.bf16.mxu1 %v2548_v19  ;;  %1598 = vmatprep.mubr.bf16.mxu0 %v5946_v38 }
 0x3c4   :  { %v4360_v2 = vpop.permute.xlu0 %1357  ;;  %v4362_v33 = vpop.permute.xlu1 %1342 }
 0x3c8   :  { %v4365_v34 = vpop.permute.xlu0 %1347 }
 0x3c9   :  { %1546 = vmatmul.mubr.bf16.gmra.mxu1 %v2550_v15  ;;  %2524 = vmatmul.mubr.msk.bf16.gmra.mxu0 %vm1390_vm11, %v3959_v55 }
 0x3ca   :  { %2311 = vmatprep.mubr.bf16.mxu1 %v5946_v38 }
 0x439   :  { %v1484_v17 = vpop.f32.mrf.mxu1 }
 0x43b   :  { %v1486_v57 = vpop.f32.mrf.mxu1 }
 0x43d   :  { %v1488_v22 = vpop.f32.mrf.mxu1 }
 0x43f   :  { %v1490_v46 = vpop.f32.mrf.mxu1 }
 0x441   :  { %v1494_v9 = vpop.f32.mrf.mxu1 }
 0x443   :  { %v1496_v30 = vpop.f32.mrf.mxu1 }
 0x445   :  { %v1498_v11 = vpop.f32.mrf.mxu1 }
 0x471   :  { %v1431_v18 = vpop.f32.mrf.mxu0 }
 0x472   :  { %v1432_v0 = vadd.f32 %v1431_v18, %v4362_v33 }
 0x473   :  { %v1433_v19 = vpop.f32.mrf.mxu0 }
 0x474   :  { %v1485_v25 = vadd.f32 %v1484_v17, %v1432_v0  ;;  %v1434_v36 = vadd.f32 %v1433_v19, %v4362_v33  ;;  %v1500_v17 = vpop.f32.mrf.mxu1 }
 0x475   :  { %v1435_v53 = vpop.f32.mrf.mxu0 }
 0x476   :  { %v4367_v43 = vmax.f32 %v1485_v25, 0.0  ;;  %v1436_v55 = vadd.f32 %v1435_v53, %v4365_v34  ;;  %v1487_v14 = vadd.f32 %v1486_v57, %v1434_v36 }
 0x477   :  { %v1437_v49 = vpop.f32.mrf.mxu0 }
 0x478   :  { %6027 = vst [vmem:[#allocation66_spill] sm:$0xff] %v4367_v43  ;;  %v1489_v1 = vadd.f32 %v1488_v22, %v1436_v55  ;;  %2075 = vrot.lane.b32.xlu1 %v4367_v43, %s2571_s0  ;;  %v1438_v16 = vadd.f32 %v1437_v49, %v4365_v34  ;;  %v4396_v63 = vmax.f32 %v1487_v14, 0.0 }
 0x479   :  { %v1441_v26 = vpop.f32.mrf.mxu0 }
 0x47a   :  { %v4372_v15 = vmax.f32 %v1489_v1, 0.0  ;;  %6029 = vst [vmem:[#allocation65_spill] sm:$0xff] %v4396_v63  ;;  %v1491_v29 = vadd.f32 %v1490_v46, %v1438_v16  ;;  %v1442_v3 = vadd.f32 %v1441_v26, %v4358_v6 }
 0x47b   :  { %v1443_v7 = vpop.f32.mrf.mxu0 }
 0x47c   :  { %6028 = vst [vmem:[#allocation54_spill] sm:$0xff] %v4372_v15  ;;  %2077 = vrot.lane.b32.xlu0 %v4372_v15, %s2571_s0  ;;  %1819 = vrot.lane.b32.xlu1 %v4367_v43, %s2576_s25  ;;  %v4402_v50 = vmax.f32 %v1491_v29, 0.0  ;;  %v1495_v40 = vadd.f32 %v1494_v9, %v1442_v3  ;;  %v1444_v5 = vadd.f32 %v1443_v7, %v4358_v6 }
 0x47d   :  { %v1445_v13 = vpop.f32.mrf.mxu0 }
 0x47e   :  { %6030 = vst [vmem:[#allocation77_spill] sm:$0xff] %v4402_v50  ;;  %v1446_v61 = vadd.f32 %v1445_v13, %v4360_v2  ;;  %v4430_v24 = vmax.f32 %v1495_v40, 0.0  ;;  %v1497_v60 = vadd.f32 %v1496_v30, %v1444_v5 }
 0x47f   :  { %v1447_v21 = vpop.f32.mrf.mxu0 }
 0x480   :  { %1821 = vrot.lane.b32.xlu0 %v4372_v15, %s2576_s25  ;;  %1755 = vrot.lane.b32.xlu1 %v4367_v43, %s2575_s24  ;;  %6031 = vst [vmem:[#allocation81_spill] sm:$0xff] %v4430_v24  ;;  %v1499_v35 = vadd.f32 %v1498_v11, %v1446_v61  ;;  %v1448_v48 = vadd.f32 %v1447_v21, %v4360_v2  ;;  %v4464_v18 = vmax.f32 %v1497_v60, 0.0 }
 0x481   :  { %v1537_v19 = vpop.f32.mrf.mxu1  ;;  %v1590_v53 = vpop.f32.mrf.mxu0 }
 0x482   :  { %v4436_v52 = vmax.f32 %v1499_v35, 0.0  ;;  %6033 = vst [vmem:[#allocation78_spill] sm:$0xff] %v4464_v18  ;;  %v1501_v0 = vadd.f32 %v1500_v17, %v1448_v48  ;;  %v1538_v55 = vadd.f32 %v1537_v19, %v4362_v33 }
 0x483   :  { %v1539_v25 = vpop.f32.mrf.mxu1  ;;  %v1592_v1 = vpop.f32.mrf.mxu0 }
 0x484   :  { %1757 = vrot.lane.b32.xlu0 %v4372_v15, %s2575_s24  ;;  %1691 = vrot.lane.b32.xlu1 %v4367_v43, %s2578_s29  ;;  %6032 = vst [vmem:[#allocation49_spill] sm:$0xff] %v4436_v52  ;;  %v4470_v57 = vmax.f32 %v1501_v0, 0.0  ;;  %v1591_v36 = vadd.f32 %v1590_v53, %v1538_v55  ;;  %v1540_v30 = vadd.f32 %v1539_v25, %v4362_v33 }
 0x485   :  { %v1541_v22 = vpop.f32.mrf.mxu1  ;;  %v1594_v14 = vpop.f32.mrf.mxu0 }
 0x486   :  { %6034 = vst [vmem:[#allocation79_spill] sm:$0xff] %v4470_v57  ;;  %v1542_v49 = vadd.f32 %v1541_v22, %v4365_v34  ;;  %v4498_v16 = vmax.f32 %v1591_v36, 0.0  ;;  %v1593_v35 = vadd.f32 %v1592_v1, %v1540_v30 }
 0x487   :  { %v1543_v11 = vpop.f32.mrf.mxu1  ;;  %v1596_v48 = vpop.f32.mrf.mxu0 }
 0x488   :  { %1693 = vrot.lane.b32.xlu0 %v4372_v15, %s2578_s29  ;;  %1627 = vrot.lane.b32.xlu1 %v4367_v43, %s2577_s26  ;;  %6035 = vst [vmem:[#allocation80_spill] sm:$0xff] %v4498_v16  ;;  %v1595_v46 = vadd.f32 %v1594_v14, %v1542_v49  ;;  %v1544_v5 = vadd.f32 %v1543_v11, %v4365_v34  ;;  %v4550_v33 = vmax.f32 %v1593_v35, 0.0 }
 0x489   :  { %v1547_v55 = vpop.f32.mrf.mxu1  ;;  %v1600_v49 = vpop.f32.mrf.mxu0 }
 0x48a   :  { %v4504_v29 = vmax.f32 %v1595_v46, 0.0  ;;  %6046 = vst [vmem:[#allocation25_spill] sm:$0xff] %v4550_v33  ;;  %v1597_v17 = vadd.f32 %v1596_v48, %v1544_v5  ;;  %v1548_v14 = vadd.f32 %v1547_v55, %v4358_v6 }
 0x48b   :  { %v1549_v36 = vpop.f32.mrf.mxu1  ;;  %v1602_v35 = vpop.f32.mrf.mxu0 }
 0x48c   :  { %1629 = vrot.lane.b32.xlu0 %v4372_v15, %s2577_s26  ;;  %2011 = vrot.lane.b32.xlu1 %v4367_v43, %s2573_s22  ;;  %6036 = vst [vmem:[#allocation85_spill] sm:$0xff] %v4504_v29  ;;  %v4560_v34 = vmax.f32 %v1597_v17, 0.0  ;;  %v1601_v5 = vadd.f32 %v1600_v49, %v1548_v14  ;;  %v1550_v56 = vadd.f32 %v1549_v36, %v4358_v6 }
 0x48d   :  { %v1551_v11 = vpop.f32.mrf.mxu1  ;;  %v1604_v55 = vpop.f32.mrf.mxu0 }
 0x48e   :  { %6048 = vst [vmem:[#allocation88_spill] sm:$0xff] %v4560_v34  ;;  %v1552_v48 = vadd.f32 %v1551_v11, %v4360_v2  ;;  %v4596_v45 = vmax.f32 %v1601_v5, 0.0 }
 0x490   :  { %2013 = vrot.lane.b32.xlu0 %v4372_v15, %s2573_s22  ;;  %2083 = vrot.lane.b32.xlu1 %v4396_v63, %s2571_s0  ;;  %6050 = vst [vmem:[#allocation72_spill] sm:$0xff] %v4596_v45  ;;  %v1605_v28 = vadd.f32 %v1604_v55, %v1552_v48 }
 0x492   :  { %v4606_v49 = vmax.f32 %v1605_v28, 0.0 }
 0x494   :  { %2085 = vrot.lane.b32.xlu0 %v4402_v50, %s2571_s0  ;;  %1827 = vrot.lane.b32.xlu1 %v4396_v63, %s2576_s25  ;;  %6052 = vst [vmem:[#allocation51_spill] sm:$0xff] %v4606_v49 }
 0x498   :  { %1829 = vrot.lane.b32.xlu0 %v4402_v50, %s2576_s25  ;;  %1763 = vrot.lane.b32.xlu1 %v4396_v63, %s2575_s24 }
 0x49c   :  { %1765 = vrot.lane.b32.xlu0 %v4402_v50, %s2575_s24  ;;  %1699 = vrot.lane.b32.xlu1 %v4396_v63, %s2578_s29 }
 0x4a0   :  { %1701 = vrot.lane.b32.xlu0 %v4402_v50, %s2578_s29  ;;  %1635 = vrot.lane.b32.xlu1 %v4396_v63, %s2577_s26 }
 0x4a4   :  { %1637 = vrot.lane.b32.xlu0 %v4402_v50, %s2577_s26  ;;  %2019 = vrot.lane.b32.xlu1 %v4396_v63, %s2573_s22 }
 0x4a8   :  { %2021 = vrot.lane.b32.xlu0 %v4402_v50, %s2573_s22  ;;  %1955 = vrot.lane.b32.xlu1 %v4396_v63, %s2572_s17 }
 0x4ac   :  { %1957 = vrot.lane.b32.xlu0 %v4402_v50, %s2572_s17  ;;  %2079 = vrot.lane.b32.xlu1 %v4430_v24, %s2571_s0 }
 0x4b0   :  { %2081 = vrot.lane.b32.xlu0 %v4436_v52, %s2571_s0  ;;  %1823 = vrot.lane.b32.xlu1 %v4430_v24, %s2576_s25 }
 0x4b4   :  { %1825 = vrot.lane.b32.xlu0 %v4436_v52, %s2576_s25  ;;  %1759 = vrot.lane.b32.xlu1 %v4430_v24, %s2575_s24 }
 0x4b8   :  { %1761 = vrot.lane.b32.xlu0 %v4436_v52, %s2575_s24  ;;  %1695 = vrot.lane.b32.xlu1 %v4430_v24, %s2578_s29 }
 0x4bc   :  { %1697 = vrot.lane.b32.xlu0 %v4436_v52, %s2578_s29  ;;  %1631 = vrot.lane.b32.xlu1 %v4430_v24, %s2577_s26 }
 0x4c0   :  { %1633 = vrot.lane.b32.xlu0 %v4436_v52, %s2577_s26  ;;  %2015 = vrot.lane.b32.xlu1 %v4430_v24, %s2573_s22 }
 0x4c4   :  { %2017 = vrot.lane.b32.xlu0 %v4436_v52, %s2573_s22  ;;  %1951 = vrot.lane.b32.xlu1 %v4430_v24, %s2572_s17 }
 0x4c8   :  { %1953 = vrot.lane.b32.xlu0 %v4436_v52, %s2572_s17  ;;  %2087 = vrot.lane.b32.xlu1 %v4464_v18, %s2571_s0 }
 0x4cc   :  { %2089 = vrot.lane.b32.xlu0 %v4470_v57, %s2571_s0  ;;  %1831 = vrot.lane.b32.xlu1 %v4464_v18, %s2576_s25 }
 0x4d0   :  { %1833 = vrot.lane.b32.xlu0 %v4470_v57, %s2576_s25  ;;  %1767 = vrot.lane.b32.xlu1 %v4464_v18, %s2575_s24 }
 0x4d4   :  { %1769 = vrot.lane.b32.xlu0 %v4470_v57, %s2575_s24  ;;  %1703 = vrot.lane.b32.xlu1 %v4464_v18, %s2578_s29 }
 0x4d8   :  { %1705 = vrot.lane.b32.xlu0 %v4470_v57, %s2578_s29  ;;  %1639 = vrot.lane.b32.xlu1 %v4464_v18, %s2577_s26 }
 0x4dc   :  { %1641 = vrot.lane.b32.xlu0 %v4470_v57, %s2577_s26  ;;  %2023 = vrot.lane.b32.xlu1 %v4464_v18, %s2573_s22 }
 0x4e0   :  { %2025 = vrot.lane.b32.xlu0 %v4470_v57, %s2573_s22  ;;  %1959 = vrot.lane.b32.xlu1 %v4464_v18, %s2572_s17 }
 0x4e4   :  { %1961 = vrot.lane.b32.xlu0 %v4470_v57, %s2572_s17  ;;  %2091 = vrot.lane.b32.xlu1 %v4498_v16, %s2571_s0 }
 0x4e8   :  { %2093 = vrot.lane.b32.xlu0 %v4504_v29, %s2571_s0  ;;  %1835 = vrot.lane.b32.xlu1 %v4498_v16, %s2576_s25 }
 0x4ea   :  { %v4510_v26 = vpop.permute.xlu1 %2075 }
 0x4eb   :  { %6037 = vst [vmem:[#allocation99_spill] sm:$0xff] %v4510_v26 }
 0x4ec   :  { %1837 = vrot.lane.b32.xlu0 %v4504_v29, %s2576_s25  ;;  %1771 = vrot.lane.b32.xlu1 %v4498_v16, %s2575_s24 }
 0x4ee   :  { %v4516_v7 = vpop.permute.xlu0 %2077  ;;  %v4518_v9 = vpop.permute.xlu1 %1819 }
 0x4ef   :  { %6038 = vst [vmem:[#allocation67_spill] sm:$0xff] %v4516_v7  ;;  %6039 = vst [vmem:[#allocation68_spill] sm:$0xff] %v4518_v9 }
 0x4f0   :  { %1773 = vrot.lane.b32.xlu0 %v4504_v29, %s2575_s24  ;;  %1707 = vrot.lane.b32.xlu1 %v4498_v16, %s2578_s29 }
 0x4f2   :  { %v4524_v3 = vpop.permute.xlu0 %1821  ;;  %v4526_v13 = vpop.permute.xlu1 %1755 }
 0x4f3   :  { %6040 = vst [vmem:[#allocation50_spill] sm:$0xff] %v4524_v3  ;;  %6041 = vst [vmem:[#allocation82_spill] sm:$0xff] %v4526_v13  ;;  %v1606_v3 = vpop.f32.mrf.mxu0 }
 0x4f4   :  { %1709 = vrot.lane.b32.xlu0 %v4504_v29, %s2578_s29  ;;  %1643 = vrot.lane.b32.xlu1 %v4498_v16, %s2577_s26 }
 0x4f6   :  { %v4533_v40 = vpop.permute.xlu0 %1757  ;;  %v4535_v61 = vpop.permute.xlu1 %1691 }
 0x4f7   :  { %6042 = vst [vmem:[#allocation83_spill] sm:$0xff] %v4533_v40  ;;  %6043 = vst [vmem:[#allocation57_spill] sm:$0xff] %v4535_v61 }
 0x4f8   :  { %1645 = vrot.lane.b32.xlu0 %v4504_v29, %s2577_s26  ;;  %2027 = vrot.lane.b32.xlu1 %v4498_v16, %s2573_s22 }
 0x4fa   :  { %v4542_v21 = vpop.permute.xlu0 %1693  ;;  %v4544_v60 = vpop.permute.xlu1 %1627 }
 0x4fb   :  { %6044 = vst [vmem:[#allocation76_spill] sm:$0xff] %v4542_v21  ;;  %6045 = vst [vmem:[#allocation70_spill] sm:$0xff] %v4544_v60  ;;  %v1603_v21 = vadd.f32 %v1602_v35, %v1550_v56 }
 0x4fc   :  { %2029 = vrot.lane.b32.xlu0 %v4504_v29, %s2573_s22  ;;  %1963 = vrot.lane.b32.xlu1 %v4498_v16, %s2572_s17 }
 0x4fd   :  { %v4658_v6 = vmax.f32 %v1603_v21, 0.0 }
 0x4fe   :  { %v4552_v0 = vpop.permute.xlu0 %1629  ;;  %v4554_v19 = vpop.permute.xlu1 %2011 }
 0x4ff   :  { %6047 = vst [vmem:[#allocation91_spill] sm:$0xff] %v4554_v19  ;;  %6062 = vst [vmem:[#allocation56_spill] sm:$0xff] %v4658_v6 }
 0x500   :  { %1965 = vrot.lane.b32.xlu0 %v4504_v29, %s2572_s17  ;;  %1843 = vrot.lane.b32.xlu1 %v4550_v33, %s2576_s25 }
 0x502   :  { %v4562_v25 = vpop.permute.xlu0 %2013  ;;  %v4564_v53 = vpop.permute.xlu1 %2083 }
 0x504   :  { %1845 = vrot.lane.b32.xlu0 %v4560_v34, %s2576_s25  ;;  %1779 = vrot.lane.b32.xlu1 %v4550_v33, %s2575_s24 }
 0x506   :  { %v4570_v22 = vpop.permute.xlu0 %2085  ;;  %v4572_v1 = vpop.permute.xlu1 %1827 }
 0x508   :  { %1781 = vrot.lane.b32.xlu0 %v4560_v34, %s2575_s24  ;;  %1715 = vrot.lane.b32.xlu1 %v4550_v33, %s2578_s29 }
 0x50a   :  { %v4579_v46 = vpop.permute.xlu0 %1829  ;;  %v4581_v30 = vpop.permute.xlu1 %1763 }
 0x50c   :  { %1717 = vrot.lane.b32.xlu0 %v4560_v34, %s2578_s29  ;;  %1651 = vrot.lane.b32.xlu1 %v4550_v33, %s2577_s26 }
 0x50e   :  { %v4588_v17 = vpop.permute.xlu0 %1765  ;;  %v4590_v38 = vpop.permute.xlu1 %1699 }
 0x50f   :  { %6049 = vst [vmem:[#allocation53_spill] sm:$0xff] %v4590_v38 }
 0x510   :  { %1653 = vrot.lane.b32.xlu0 %v4560_v34, %s2577_s26  ;;  %2035 = vrot.lane.b32.xlu1 %v4550_v33, %s2573_s22 }
 0x512   :  { %v4598_v47 = vpop.permute.xlu0 %1701  ;;  %v4600_v31 = vpop.permute.xlu1 %1635 }
 0x513   :  { %6051 = vst [vmem:[#allocation26_spill] sm:$0xff] %v4600_v31 }
 0x514   :  { %2037 = vrot.lane.b32.xlu0 %v4560_v34, %s2573_s22  ;;  %2095 = vrot.lane.b32.xlu1 %v4596_v45, %s2571_s0 }
 0x516   :  { %v4608_v14 = vpop.permute.xlu0 %1637  ;;  %v4610_v11 = vpop.permute.xlu1 %2019 }
 0x517   :  { %6053 = vst [vmem:[#allocation69_spill] sm:$0xff] %v4610_v11 }
 0x518   :  { %2097 = vrot.lane.b32.xlu0 %v4606_v49, %s2571_s0  ;;  %1839 = vrot.lane.b32.xlu1 %v4596_v45, %s2576_s25 }
 0x51a   :  { %v4616_v5 = vpop.permute.xlu0 %2021  ;;  %v4618_v48 = vpop.permute.xlu1 %1955 }
 0x51b   :  { %6054 = vst [vmem:[#allocation52_spill] sm:$0xff] %v4616_v5  ;;  %6055 = vst [vmem:[#allocation84_spill] sm:$0xff] %v4618_v48 }
 0x51c   :  { %1841 = vrot.lane.b32.xlu0 %v4606_v49, %s2576_s25  ;;  %1775 = vrot.lane.b32.xlu1 %v4596_v45, %s2575_s24 }
 0x51e   :  { %v4624_v28 = vpop.permute.xlu0 %1957  ;;  %v4626_v55 = vpop.permute.xlu1 %2079 }
 0x51f   :  { %6056 = vst [vmem:[#allocation86_spill] sm:$0xff] %v4624_v28  ;;  %6057 = vst [vmem:[#allocation55_spill] sm:$0xff] %v4626_v55  ;;  %v1553_v28 = vpop.f32.mrf.mxu1 }
 0x520   :  { %1777 = vrot.lane.b32.xlu0 %v4606_v49, %s2575_s24  ;;  %1711 = vrot.lane.b32.xlu1 %v4596_v45, %s2578_s29  ;;  %v1554_v61 = vadd.f32 %v1553_v28, %v4360_v2 }
 0x522   :  { %v4632_v58 = vpop.permute.xlu0 %2081  ;;  %v4634_v42 = vpop.permute.xlu1 %1823  ;;  %v1607_v36 = vadd.f32 %v1606_v3, %v1554_v61 }
 0x523   :  { %6058 = vst [vmem:[#allocation87_spill] sm:$0xff] %v4632_v58 }
 0x524   :  { %1713 = vrot.lane.b32.xlu0 %v4606_v49, %s2578_s29  ;;  %1647 = vrot.lane.b32.xlu1 %v4596_v45, %s2577_s26  ;;  %v4668_v56 = vmax.f32 %v1607_v36, 0.0 }
 0x526   :  { %v4641_v62 = vpop.permute.xlu0 %1825  ;;  %v4643_v48 = vpop.permute.xlu1 %1759  ;;  %6065 = vst [vmem:[#allocation92_spill] sm:$0xff] %v4668_v56 }
 0x527   :  { %6059 = vst [vmem:[#allocation89_spill] sm:$0xff] %v4641_v62  ;;  %6060 = vst [vmem:[#allocation71_spill] sm:$0xff] %v4643_v48 }
 0x528   :  { %1649 = vrot.lane.b32.xlu0 %v4606_v49, %s2577_s26  ;;  %2031 = vrot.lane.b32.xlu1 %v4596_v45, %s2573_s22 }
 0x52a   :  { %v4650_v40 = vpop.permute.xlu0 %1761  ;;  %v4652_v13 = vpop.permute.xlu1 %1695 }
 0x52b   :  { %6061 = vst [vmem:[#allocation59_spill] sm:$0xff] %v4652_v13 }
 0x52c   :  { %2033 = vrot.lane.b32.xlu0 %v4606_v49, %s2573_s22  ;;  %1967 = vrot.lane.b32.xlu1 %v4596_v45, %s2572_s17 }
 0x52e   :  { %v4660_v48 = vpop.permute.xlu0 %1697  ;;  %v4662_v9 = vpop.permute.xlu1 %1631 }
 0x52f   :  { %6063 = vst [vmem:[#allocation60_spill] sm:$0xff] %v4660_v48  ;;  %6064 = vst [vmem:[#allocation74_spill] sm:$0xff] %v4662_v9 }
 0x530   :  { %1969 = vrot.lane.b32.xlu0 %v4606_v49, %s2572_s17  ;;  %1847 = vrot.lane.b32.xlu1 %v4658_v6, %s2576_s25 }
 0x532   :  { %v4670_v2 = vpop.permute.xlu0 %1633  ;;  %v4672_v35 = vpop.permute.xlu1 %2015 }
 0x533   :  { %6066 = vst [vmem:[#allocation90_spill] sm:$0xff] %v4670_v2  ;;  %6067 = vst [vmem:[#allocation73_spill] sm:$0xff] %v4672_v35 }
 0x534   :  { %1849 = vrot.lane.b32.xlu0 %v4668_v56, %s2576_s25  ;;  %1947 = vrot.lane.b32.xlu1 %v4367_v43, %s2572_s17 }
 0x536   :  { %v4678_v3 = vpop.permute.xlu0 %2017  ;;  %v4680_v61 = vpop.permute.xlu1 %1951 }
 0x537   :  { %6068 = vst [vmem:[#allocation63_spill] sm:$0xff] %v4678_v3  ;;  %6069 = vst [vmem:[#allocation75_spill] sm:$0xff] %v4680_v61 }
 0x538   :  { %1949 = vrot.lane.b32.xlu0 %v4372_v15, %s2572_s17  ;;  %1783 = vrot.lane.b32.xlu1 %v4658_v6, %s2575_s24 }
 0x53a   :  { %v4686_v21 = vpop.permute.xlu0 %1953  ;;  %v4688_v28 = vpop.permute.xlu1 %2087 }
 0x53b   :  { %6070 = vst [vmem:[#allocation93_spill] sm:$0xff] %v4686_v21 }
 0x53c   :  { %1785 = vrot.lane.b32.xlu0 %v4668_v56, %s2575_s24  ;;  %1719 = vrot.lane.b32.xlu1 %v4658_v6, %s2578_s29 }
 0x53e   :  { %v4694_v36 = vpop.permute.xlu0 %2089  ;;  %v4696_v35 = vpop.permute.xlu1 %1831 }
 0x53f   :  { %v1861_v61 = vsel %vm356_vm6, %v4634_v42, %v4696_v35 }
 0x540   :  { %1897 = vrot.lane.b32.xlu0 %v4470_v57, %s2574_s23  ;;  %1655 = vrot.lane.b32.xlu1 %v4658_v6, %s2577_s26  ;;  %v1876_v2 = vmul.f32 %v1861_v61, %v2910_v54 }
 0x542   :  { %v4706_v21 = vpop.permute.xlu0 %1833  ;;  %v4708_v3 = vpop.permute.xlu1 %1767 }
 0x543   :  { %6071 = vst [vmem:[#allocation95_spill] sm:$0xff] %v4708_v3  ;;  %v1862_v9 = vsel %vm356_vm6, %v4641_v62, %v4706_v21 }
 0x544   :  { %v1880_v57 = vmul.f32 %v1862_v9, %v2910_v54  ;;  %1721 = vrot.lane.b32.xlu0 %v4668_v56, %s2578_s29  ;;  %2039 = vrot.lane.b32.xlu1 %v4658_v6, %s2573_s22 }
 0x546   :  { %v4720_v13 = vpop.permute.xlu0 %1769  ;;  %v4722_v48 = vpop.permute.xlu1 %1703  ;;  %v2168_v3 = vpack.c.bf16 %v1880_v57, %v1876_v2 }
 0x547   :  { %6072 = vst [vmem:[#allocation94_spill] sm:$0xff] %v4722_v48  ;;  %v6086_v48 = vld [vmem:[#allocation2_spill] sm:$0xff] }
 0x548   :  { %1905 = vrot.lane.b32.xlu0 %v4606_v49, %s2574_s23  ;;  %1975 = vrot.lane.b32.xlu1 %v4658_v6, %s2572_s17 }
 0x549   :  { %2238 = vmatprep.subr.bf16.mxu0 %v2168_v3 }
 0x54a   :  { %v4728_v61 = vpop.permute.xlu0 %1705  ;;  %v4730_v9 = vpop.permute.xlu1 %1639 }
 0x54b   :  { %6073 = vst [vmem:[#allocation96_spill] sm:$0xff] %v4728_v61  ;;  %6074 = vst [vmem:[#allocation97_spill] sm:$0xff] %v4730_v9 }
 0x54c   :  { %1657 = vrot.lane.b32.xlu0 %v4668_v56, %s2577_s26  ;;  %1895 = vrot.lane.b32.xlu1 %v4464_v18, %s2574_s23 }
 0x54e   :  { %v4736_v62 = vpop.permute.xlu0 %1641  ;;  %v4738_v57 = vpop.permute.xlu1 %2023 }
 0x54f   :  { %6075 = vst [vmem:[#allocation98_spill] sm:$0xff] %v4736_v62  ;;  %6076 = vst [vmem:[#allocation58_spill] sm:$0xff] %v4738_v57 }
 0x550   :  { %1889 = vrot.lane.b32.xlu0 %v4436_v52, %s2574_s23  ;;  %1903 = vrot.lane.b32.xlu1 %v4596_v45, %s2574_s23 }
 0x552   :  { %v4744_v2 = vpop.permute.xlu0 %2025  ;;  %v4746_v3 = vpop.permute.xlu1 %1959 }
 0x553   :  { %6077 = vst [vmem:[#allocation62_spill] sm:$0xff] %v4744_v2  ;;  %6078 = vst [vmem:[#allocation41_spill] sm:$0xff] %v4746_v3  ;;  %v2579_v3 = vmov 1983009808  }
 0x554   :  { %1973 = vrot.lane.b32.xlu0 %v4560_v34, %s2572_s17  ;;  %1887 = vrot.lane.b32.xlu1 %v4430_v24, %s2574_s23 }
 0x556   :  { %v4752_v49 = vpop.permute.xlu0 %1961  ;;  %v4754_v18 = vpop.permute.xlu1 %2091 }
 0x557   :  { %6079 = vst [vmem:[#allocation43_spill] sm:$0xff] %v4752_v49  ;;  %6080 = vst [vmem:[#allocation37_spill] sm:$0xff] %v4754_v18 }
 0x558   :  { %1893 = vrot.lane.b32.xlu0 %v4402_v50, %s2574_s23  ;;  %1971 = vrot.lane.b32.xlu1 %v4550_v33, %s2572_s17  ;;  %v2219_v50 = vunpack.c.l.s4 %v2579_v3 }
 0x55a   :  { %v4760_v45 = vpop.permute.xlu0 %2093  ;;  %v4762_v52 = vpop.permute.xlu1 %1835 }
 0x55b   :  { %6081 = vst [vmem:[#allocation39_spill] sm:$0xff] %v4760_v45  ;;  %v1855_v24 = vsel %vm356_vm6, %v4572_v1, %v4762_v52 }
 0x55c   :  { %2041 = vrot.lane.b32.xlu0 %v4668_v56, %s2573_s22  ;;  %1891 = vrot.lane.b32.xlu1 %v4396_v63, %s2574_s23  ;;  %v4778_v9 = vmul.f32 %v1855_v24, %v2913_v59  ;;  %v2220_v63 = vunpack.c.0.s8 %v2219_v50 }
 0x55e   :  { %v1838_v49 = vpop.permute.xlu0 %1837  ;;  %v4772_v57 = vpop.permute.xlu1 %1771  ;;  %6082 = vst [vmem:[#allocation33_spill] sm:$0xff] %v4778_v9  ;;  %v4813_v9 = vsub.s32 %v2220_v63, %v6086_v48 }
 0x55f   :  { %v1856_v2 = vsel %vm356_vm6, %v4579_v46, %v1838_v49  ;;  %v1791_v3 = vsel %vm316_vm7, %v4581_v30, %v4772_v57 }
 0x560   :  { %v4781_v62 = vmul.f32 %v1856_v2, %v2913_v59  ;;  %1901 = vrot.lane.b32.xlu0 %v4504_v29, %s2574_s23  ;;  %1899 = vrot.lane.b32.xlu1 %v4498_v16, %s2574_s23  ;;  %v4799_v29 = vmul.f32 %v1791_v3, %v2907_v51 }
 0x562   :  { %6083 = vst [vmem:[#allocation35_spill] sm:$0xff] %v4781_v62  ;;  %v1774_v24 = vpop.permute.xlu0 %1773  ;;  %v4793_v61 = vpop.permute.xlu1 %1707  ;;  %6084 = vst [vmem:[#allocation61_spill] sm:$0xff] %v4799_v29 }
 0x563   :  { %v1792_v2 = vsel %vm316_vm7, %v4588_v17, %v1774_v24  ;;  %v1727_v50 = vsel %vm276_vm9, %v4590_v38, %v4793_v61 }
 0x564   :  { %v4802_v16 = vmul.f32 %v1792_v2, %v2907_v51  ;;  %1977 = vrot.lane.b32.xlu0 %v4668_v56, %s2572_s17  ;;  %1883 = vrot.lane.b32.xlu1 %v4367_v43, %s2574_s23  ;;  %v4820_v51 = vld [vmem:[%s5611_s7] sm:$0x3f]  ;;  %v4830_v63 = vmul.f32 %v1727_v50, %v3050_v20 }
 0x565   :  { %v4827_v38 = vrot.slane %v4820_v51, %v4813_v9 }
 0x566   :  { %6085 = vst [vmem:[#allocation64_spill] sm:$0xff] %v4802_v16  ;;  %v1710_v62 = vpop.permute.xlu0 %1709  ;;  %v1644_v2 = vpop.permute.xlu1 %1643  ;;  %6088 = vst [vmem:[#allocation46_spill] sm:$0xff] %v4830_v63 }
 0x567   :  { %v1728_v43 = vsel %vm276_vm9, %v4598_v47, %v1710_v62  ;;  %6087 = vst [vmem:[#allocation45_spill] sm:$0xff] %v4827_v38  ;;  %v1663_v3 = vsel %vm237_vm8, %v4600_v31, %v1644_v2  ;;  %v4844_v29 = vcombine.high %v4827_v38, %v4827_v38 }
 0x568   :  { %v4833_v48 = vmul.f32 %v1728_v43, %v3050_v20  ;;  %1885 = vrot.lane.b32.xlu0 %v4372_v15, %s2574_s23  ;;  %1911 = vrot.lane.b32.xlu1 %v4658_v6, %s2574_s23  ;;  %v4853_v20 = vmul.f32 %v1663_v3, %v5945_v8 }
 0x569   :  { %2270 = vmatprep.mubr.bf16.mxu0 %v4844_v29 }
 0x56a   :  { %6089 = vst [vmem:[#allocation38_spill] sm:$0xff] %v4833_v48  ;;  %v1646_v16 = vpop.permute.xlu0 %1645  ;;  %v2028_v43 = vpop.permute.xlu1 %2027  ;;  %6090 = vst [vmem:[#allocation40_spill] sm:$0xff] %v4853_v20 }
 0x56b   :  { %v1664_v15 = vsel %vm237_vm8, %v4608_v14, %v1646_v16  ;;  %v2047_v50 = vsel %vm476_vm4, %v4610_v11, %v2028_v43 }
 0x56c   :  { %v4856_v31 = vmul.f32 %v1664_v15, %v5945_v8  ;;  %1913 = vrot.lane.b32.xlu0 %v4668_v56, %s2574_s23  ;;  %1907 = vrot.lane.b32.xlu1 %v4550_v33, %s2574_s23  ;;  %v4873_v3 = vmul.f32 %v2047_v50, %v5974_v12 }
 0x56e   :  { %6091 = vst [vmem:[#allocation47_spill] sm:$0xff] %v4856_v31  ;;  %v2030_v63 = vpop.permute.xlu0 %2029  ;;  %v4867_v48 = vpop.permute.xlu1 %1963  ;;  %6093 = vst [vmem:[#allocation42_spill] sm:$0xff] %v4873_v3 }
 0x56f   :  { %6092 = vst [vmem:[#allocation48_spill] sm:$0xff] %v4867_v48  ;;  %v2048_v15 = vsel %vm476_vm4, %v4616_v5, %v2030_v63 }
 0x570   :  { %v4876_v8 = vmul.f32 %v2048_v15, %v5974_v12  ;;  %1909 = vrot.lane.b32.xlu0 %v4560_v34, %s2574_s23  ;;  %2103 = vrot.lane.b32.xlu1 %v4658_v6, %s2571_s0 }
 0x572   :  { %6094 = vst [vmem:[#allocation44_spill] sm:$0xff] %v4876_v8  ;;  %v4882_v38 = vpop.permute.xlu0 %1965  ;;  %v4884_v20 = vpop.permute.xlu1 %1843 }
 0x573   :  { %6095 = vst [vmem:[#allocation34_spill] sm:$0xff] %v4882_v38  ;;  %v1851_v50 = vsel %vm356_vm6, %v4762_v52, %v4884_v20  ;;  %v1625_v38 = vld [vmem:[%s5612_s8] sm:$0x3f]  ;;  %v38_v52 = vld [vmem:[%s5605_s3 + $0x8] sm:$0x3] }
 0x574   :  { %2105 = vrot.lane.b32.xlu0 %v4668_v56, %s2571_s0  ;;  %2099 = vrot.lane.b32.xlu1 %v4550_v33, %s2571_s0  ;;  %v4907_v56 = vmul.f32 %v1851_v50, %v2947_v27 }
 0x576   :  { %v4896_v15 = vpop.permute.xlu0 %1845  ;;  %v4898_v6 = vpop.permute.xlu1 %1779 }
 0x577   :  { %v1852_v48 = vsel %vm356_vm6, %v1838_v49, %v4896_v15  ;;  %v1787_v3 = vsel %vm316_vm7, %v4772_v57, %v4898_v6 }
 0x578   :  { %v4910_v33 = vmul.f32 %v1852_v48, %v2947_v27  ;;  %2101 = vrot.lane.b32.xlu0 %v4560_v34, %s2571_s0  ;;  %2213 = vperm.xlu1 %2539, %v1625_v38   ;;  %v4931_v8 = vmul.f32 %v1787_v3, %v2931_v4 }
 0x57a   :  { %v4921_v49 = vpop.permute.xlu0 %1781  ;;  %v4923_v50 = vpop.permute.xlu1 %1715 }
 0x57b   :  { %v1788_v34 = vsel %vm316_vm7, %v1774_v24, %v4921_v49  ;;  %v1723_v38 = vsel %vm276_vm9, %v4793_v61, %v4923_v50 }
 0x57c   :  { %v4934_v31 = vmul.f32 %v1788_v34, %v2931_v4  ;;  %46 = vperm.xlu0 %2538, %v38_v52   ;;  %v4948_v3 = vmul.f32 %v1723_v38, %v3059_v23 }
 0x57e   :  { %v4940_v57 = vpop.permute.xlu0 %1717  ;;  %v1652_v11 = vpop.permute.xlu1 %1651  ;;  %6096 = vst [vmem:[#allocation36_spill] sm:$0xff] %v4948_v3 }
 0x57f   :  { %v1724_v24 = vsel %vm276_vm9, %v1710_v62, %v4940_v57  ;;  %v1659_v52 = vsel %vm237_vm8, %v1644_v2, %v1652_v11  ;;  %v1671_v61 = vsel %vm237_vm8, %v1652_v11, %v4544_v60 }
 0x580   :  { %v4951_v34 = vmul.f32 %v1724_v24, %v3059_v23  ;;  %v4968_v2 = vmul.f32 %v1671_v61, %v5961_v44  ;;  %v4971_v11 = vmul.f32 %v1659_v52, %v5967_v39  ;;  %v2118_v61 = vsel %vm516_vm2, %v4632_v58, %v4694_v36 }
 0x582   :  { %v1654_v5 = vpop.permute.xlu0 %1653  ;;  %v2036_v12 = vpop.permute.xlu1 %2035  ;;  %6097 = vst [vmem:[#allocation2_spill] sm:$0xff] %v4968_v2  ;;  %6098 = vst [vmem:[#allocation100_spill] sm:$0xff] %v4971_v11 }
 0x583   :  { %v1660_v62 = vsel %vm237_vm8, %v1646_v16, %v1654_v5  ;;  %v1672_v38 = vsel %vm237_vm8, %v1654_v5, %v4552_v0  ;;  %v2043_v24 = vsel %vm476_vm4, %v2028_v43, %v2036_v12  ;;  %v2055_v16 = vsel %vm476_vm4, %v2036_v12, %v4554_v19  ;;  %v6121_v19 = vld [vmem:[#allocation57_spill] sm:$0xff] }
 0x584   :  { %v4974_v60 = vmul.f32 %v1672_v38, %v5961_v44  ;;  %v4977_v48 = vmul.f32 %v1660_v62, %v5967_v39  ;;  %v4998_v38 = vmul.f32 %v2043_v24, %v5994_v37  ;;  %v5001_v5 = vmul.f32 %v2055_v16, %v5993_v10 }
 0x585   :  { %v2117_v16 = vsel %vm516_vm2, %v4626_v55, %v4688_v28  ;;  %v6106_v55 = vld [vmem:[#allocation11_spill] sm:$0xff] }
 0x586   :  { %6099 = vst [vmem:[#allocation101_spill] sm:$0xff] %v4974_v60  ;;  %v2038_v43 = vpop.permute.xlu0 %2037  ;;  %v4984_v3 = vpop.permute.xlu1 %2095  ;;  %6101 = vst [vmem:[#allocation103_spill] sm:$0xff] %v4998_v38  ;;  %v6120_v60 = vld [vmem:[#allocation53_spill] sm:$0xff] }
 0x587   :  { %6100 = vst [vmem:[#allocation102_spill] sm:$0xff] %v4984_v3  ;;  %v2044_v62 = vsel %vm476_vm4, %v2030_v63, %v2038_v43  ;;  %v2056_v12 = vsel %vm476_vm4, %v2038_v43, %v4562_v25  ;;  %6102 = vst [vmem:[#allocation104_spill] sm:$0xff] %v5001_v5  ;;  %v2112_v63 = vsel %vm516_vm2, %v4570_v22, %v4760_v45 }
 0x588   :  { %v5004_v52 = vmul.f32 %v2044_v62, %v5994_v37  ;;  %v5007_v2 = vmul.f32 %v2056_v12, %v5993_v10  ;;  %v2113_v24 = vsel %vm516_vm2, %v4688_v28, %v4984_v3  ;;  %v2135_v45 = vmul.f32 %v2118_v61, %v2882_v41 }
 0x589   :  { %v2111_v3 = vsel %vm516_vm2, %v4564_v53, %v4754_v18  ;;  %v2116_v43 = vsel %vm516_vm2, %v4516_v7, %v4570_v22  ;;  %v2128_v38 = vmul.f32 %v2112_v63, %v6106_v55  ;;  %v2132_v58 = vmul.f32 %v2113_v24, %v6106_v55 }
 0x58a   :  { %6103 = vst [vmem:[#allocation105_spill] sm:$0xff] %v5004_v52  ;;  %6104 = vst [vmem:[#allocation106_spill] sm:$0xff] %v5007_v2  ;;  %v5023_v62 = vpop.permute.xlu0 %2097  ;;  %v1840_v12 = vpop.permute.xlu1 %1839  ;;  %v2131_v52 = vmul.f32 %v2117_v16, %v2882_v41  ;;  %v2115_v18 = vsel %vm516_vm2, %v4510_v26, %v4564_v53  ;;  %v2127_v22 = vmul.f32 %v2116_v43, %v2882_v41  ;;  %v6116_v26 = vld [vmem:[#allocation20_spill] sm:$0xff] }
 0x58b   :  { %6105 = vst [vmem:[#allocation107_spill] sm:$0xff] %v5023_v62  ;;  %v2114_v28 = vsel %vm516_vm2, %v4694_v36, %v5023_v62  ;;  %v2124_v36 = vmul.f32 %v2111_v3, %v6106_v55  ;;  %v2123_v16 = vmul.f32 %v2115_v18, %v2882_v41 }
 0x58c   :  { %v2136_v61 = vmul.f32 %v2114_v28, %v6106_v55  ;;  %v2207_v63 = vpack.c.bf16 %v2135_v45, %v2131_v52  ;;  %v2217_v28 = vcombine.high %v4820_v51, %v4820_v51 }
 0x58d   :  { %v2204_v24 = vpack.c.bf16 %v2128_v38, %v2124_v36  ;;  %v2203_v55 = vpack.c.bf16 %v2127_v22, %v2123_v16  ;;  %v6113_v16 = vld [vmem:[#allocation83_spill] sm:$0xff] }
 0x58e   :  { %v1842_v62 = vpop.permute.xlu0 %1841  ;;  %v5049_v5 = vpop.permute.xlu1 %1775  ;;  %v2208_v2 = vpack.c.bf16 %v2136_v61, %v2132_v58  ;;  %v5060_v3 = vrot.slane %v2217_v28, %v4813_v9  ;;  %v6109_v9 = vld [vmem:[#allocation68_spill] sm:$0xff]  ;;  %v6111_v61 = vld [vmem:[#allocation50_spill] sm:$0xff] }
 0x58f   :  { %v1859_v52 = vsel %vm356_vm6, %v6109_v9, %v4572_v1  ;;  %v1858_v36 = vsel %vm356_vm6, %v4706_v21, %v1842_v62  ;;  %v1796_v21 = vsel %vm316_vm7, %v6113_v16, %v4588_v17 }
 0x590   :  { %2291 = vmatprep.subr.bf16.mxu1 %v2208_v2  ;;  %6107 = vst [vmem:[#allocation11_spill] sm:$0xff] %v5060_v3  ;;  %v1868_v22 = vmul.f32 %v1859_v52, %v2910_v54 }
 0x591   :  { %2292 = vmatpush1.bf16.msra.mxu1 %v2207_v63  ;;  %v6112_v63 = vld [vmem:[#allocation82_spill] sm:$0xff] }
 0x592   :  { %v5055_v7 = vpop.permute.xlu0 %1777  ;;  %2293 = vmatprep.subr.bf16.mxu1 %v2204_v24  ;;  %v5057_v53 = vpop.permute.xlu1 %1711  ;;  %v1795_v24 = vsel %vm316_vm7, %v6112_v63, %v4581_v30  ;;  %v1857_v30 = vsel %vm356_vm6, %v4696_v35, %v1840_v12 }
 0x595   :  { %2294 = vmatpush1.bf16.msra.mxu1 %v2203_v55  ;;  %v1798_v55 = vsel %vm316_vm7, %v4650_v40, %v4720_v13 }
 0x596   :  { %v5062_v58 = vpop.permute.xlu0 %1713  ;;  %v5064_v45 = vpop.permute.xlu1 %1647 }
 0x598   :  { %2525 = vmatmul.mubr.msk.bf16.vlgmr.msra.gmra.mxu1 %vm1390_vm11, %v5060_v3 }
 0x599   :  { %2352 = vmatprep.mubr.bf16.mxu1 %v4844_v29  ;;  %v1860_v29 = vsel %vm356_vm6, %v6111_v61, %v4579_v46 }
 0x59a   :  { %v5069_v41 = vpop.permute.xlu0 %1649  ;;  %v5071_v51 = vpop.permute.xlu1 %2031  ;;  %v1872_v46 = vmul.f32 %v1860_v29, %v2910_v54  ;;  %v1864_v54 = vsel %vm356_vm6, %v4896_v15, %v6111_v61  ;;  %v6118_v15 = vld [vmem:[#allocation95_spill] sm:$0xff] }
 0x59b   :  { %v6119_v61 = vld [vmem:[#allocation71_spill] sm:$0xff] }
 0x59e   :  { %v5073_v18 = vpop.permute.xlu0 %2033  ;;  %v5075_v2 = vpop.permute.xlu1 %1967 }
 0x59f   :  { %6108 = vst [vmem:[#allocation108_spill] sm:$0xff] %v5075_v2 }
 0x5a2   :  { %v5081_v38 = vpop.permute.xlu0 %1969  ;;  %v1848_v43 = vpop.permute.xlu1 %1847 }
 0x5a3   :  { %6110 = vst [vmem:[#allocation68_spill] sm:$0xff] %v5081_v38  ;;  %v1853_v1 = vsel %vm356_vm6, %v1840_v12, %v1848_v43  ;;  %v1865_v28 = vsel %vm356_vm6, %v1848_v43, %v4634_v42  ;;  %v1881_v42 = vmul.f32 %v1858_v36, %v2913_v59  ;;  %v6115_v43 = vld [vmem:[#allocation89_spill] sm:$0xff]  ;;  %v1863_v36 = vsel %vm356_vm6, %v4884_v20, %v6109_v9 }
 0x5a4   :  { %v1875_v10 = vmul.f32 %v1865_v28, %v6116_v26  ;;  %v1878_v35 = vmul.f32 %v1853_v1, %v2947_v27  ;;  %v1877_v28 = vmul.f32 %v1857_v30, %v2913_v59  ;;  %v1731_v38 = vsel %vm276_vm9, %v6121_v19, %v6120_v60 }
 0x5a5   :  { %v2164_v20 = vpack.c.bf16 %v1872_v46, %v1868_v22  ;;  %v1867_v9 = vmul.f32 %v1863_v36, %v6116_v26  ;;  %v6124_v22 = vld [vmem:[#allocation60_spill] sm:$0xff]  ;;  %v6125_v30 = vpack.c.bf16 %v4910_v33, %v4907_v56 }
 0x5a6   :  { %v1850_v52 = vpop.permute.xlu0 %1849  ;;  %v5112_v3 = vpop.permute.xlu1 %1947  ;;  %v2169_v11 = vpack.c.bf16 %v1881_v42, %v1877_v28 }
 0x5a7   :  { %6114 = vst [vmem:[#allocation50_spill] sm:$0xff] %v5112_v3  ;;  %v1854_v17 = vsel %vm356_vm6, %v1842_v62, %v1850_v52  ;;  %v1866_v29 = vsel %vm356_vm6, %v1850_v52, %v6115_v43  ;;  %v6117_v3 = vld [vmem:[#allocation19_spill] sm:$0xff]  ;;  %v1797_v62 = vsel %vm316_vm7, %v6119_v61, %v6118_v15  ;;  %v1871_v52 = vmul.f32 %v1864_v54, %v6116_v26 }
 0x5a8   :  { %v1879_v12 = vmul.f32 %v1866_v29, %v6116_v26  ;;  %v1882_v37 = vmul.f32 %v1854_v17, %v2947_v27  ;;  %v5129_v2 = vmul.f32 %v1795_v24, %v6117_v3  ;;  %v1816_v1 = vmul.f32 %v1798_v55, %v6117_v3 }
 0x5a9   :  { %v1808_v29 = vmul.f32 %v1796_v21, %v6117_v3  ;;  %v1812_v59 = vmul.f32 %v1797_v62, %v6117_v3  ;;  %v6123_v3 = vld [vmem:[#allocation96_spill] sm:$0xff]  ;;  %v2163_v46 = vpack.c.bf16 %v1871_v52, %v1867_v9  ;;  %v6131_v52 = vld [vmem:[#allocation33_spill] sm:$0xff] }
 0x5aa   :  { %v2167_v27 = vpack.c.bf16 %v1879_v12, %v1875_v10  ;;  %v5142_v17 = vpop.permute.xlu0 %1949  ;;  %v1784_v24 = vpop.permute.xlu1 %1783  ;;  %v2170_v43 = vpack.c.bf16 %v1882_v37, %v1878_v35  ;;  %v1794_v10 = vsel %vm316_vm7, %v4720_v13, %v5055_v7  ;;  %v6122_v37 = vld [vmem:[#allocation76_spill] sm:$0xff]  ;;  %v1734_v13 = vsel %vm276_vm9, %v6124_v22, %v6123_v3 }
 0x5ab   :  { %v1732_v21 = vsel %vm276_vm9, %v6122_v37, %v4598_v47  ;;  %v1789_v60 = vsel %vm316_vm7, %v5049_v5, %v1784_v24  ;;  %v1801_v26 = vsel %vm316_vm7, %v1784_v24, %v6119_v61  ;;  %v1793_v47 = vsel %vm316_vm7, %v6118_v15, %v5049_v5  ;;  %v6126_v35 = vld [vmem:[#allocation12_spill] sm:$0xff]  ;;  %v6127_v15 = vld [vmem:[#allocation22_spill] sm:$0xff]  ;;  %v6133_v24 = vld [vmem:[#allocation21_spill] sm:$0xff] }
 0x5ac   :  { %2239 = vmatpush1.bf16.msra.mxu0 %v2167_v27  ;;  %2320 = vmatprep.subr.bf16.mxu1 %v2170_v43  ;;  %v2160_v42 = vpack.c.bf16 %v1816_v1, %v1812_v59  ;;  %v1817_v12 = vmul.f32 %v1794_v10, %v6126_v35  ;;  %v1811_v33 = vmul.f32 %v1801_v26, %v6127_v15  ;;  %v6130_v1 = vld [vmem:[#allocation35_spill] sm:$0xff] }
 0x5ad   :  { %2240 = vmatprep.subr.bf16.mxu0 %v2164_v20  ;;  %2321 = vmatpush1.bf16.msra.mxu1 %v2169_v11  ;;  %v1800_v11 = vsel %vm316_vm7, %v4921_v49, %v6113_v16  ;;  %v1814_v56 = vmul.f32 %v1789_v60, %v2931_v4  ;;  %v6128_v49 = vld [vmem:[#allocation94_spill] sm:$0xff]  ;;  %v6129_v16 = vld [vmem:[#allocation59_spill] sm:$0xff]  ;;  %v6132_v27 = vpack.c.bf16 %v6130_v1, %v6131_v52 }
 0x5ae   :  { %v1786_v55 = vpop.permute.xlu0 %1785  ;;  %2322 = vmatprep.subr.bf16.mxu1 %v6125_v30  ;;  %v1720_v54 = vpop.permute.xlu1 %1719  ;;  %v1733_v28 = vsel %vm276_vm9, %v6129_v16, %v6128_v49  ;;  %v1807_v43 = vmul.f32 %v1800_v11, %v6127_v15  ;;  %v1740_v60 = vmul.f32 %v1731_v38, %v6133_v24  ;;  %v6136_v11 = vpack.c.bf16 %v4934_v31, %v4931_v8  ;;  %v6138_v8 = vld [vmem:[#allocation28_spill] sm:$0xff] }
 0x5af   :  { %v1790_v61 = vsel %vm316_vm7, %v5055_v7, %v1786_v55  ;;  %v1802_v5 = vsel %vm316_vm7, %v1786_v55, %v4650_v40  ;;  %v1799_v7 = vsel %vm316_vm7, %v4898_v6, %v6112_v63  ;;  %v1813_v40 = vmul.f32 %v1793_v47, %v6126_v35  ;;  %v6135_v55 = vld [vmem:[#allocation90_spill] sm:$0xff] }
 0x5b0   :  { %v1815_v62 = vmul.f32 %v1802_v5, %v6127_v15  ;;  %v1818_v36 = vmul.f32 %v1790_v61, %v2931_v4  ;;  %2241 = vmatpush1.bf16.msra.mxu0 %v2163_v46  ;;  %v1752_v4 = vmul.f32 %v1734_v13, %v6133_v24  ;;  %v2156_v6 = vpack.c.bf16 %v1808_v29, %v5129_v2  ;;  %v6134_v29 = vld [vmem:[#allocation98_spill] sm:$0xff]  ;;  %v6137_v61 = vld [vmem:[#allocation27_spill] sm:$0xff] }
 0x5b1   :  { %2242 = vmatprep.subr.bf16.mxu0 %v2160_v42  ;;  %2323 = vmatpush1.bf16.msra.mxu1 %v6132_v27  ;;  %v2161_v26 = vpack.c.bf16 %v1817_v12, %v1813_v40  ;;  %v1748_v63 = vmul.f32 %v1733_v28, %v6133_v24  ;;  %v1803_v46 = vmul.f32 %v1799_v7, %v6127_v15  ;;  %v6144_v7 = vld [vmem:[#allocation23_spill] sm:$0xff] }
 0x5b2   :  { %v2159_v20 = vpack.c.bf16 %v1815_v62, %v1811_v33  ;;  %v5205_v59 = vpop.permute.xlu0 %1897  ;;  %v1656_v9 = vpop.permute.xlu1 %1655  ;;  %v2162_v10 = vpack.c.bf16 %v1818_v36, %v1814_v56  ;;  %v1730_v13 = vsel %vm276_vm9, %v6123_v3, %v5062_v58  ;;  %v1744_v47 = vmul.f32 %v1732_v21, %v6133_v24 }
 0x5b3   :  { %v1725_v38 = vsel %vm276_vm9, %v5057_v53, %v1720_v54  ;;  %v1737_v2 = vsel %vm276_vm9, %v1720_v54, %v6129_v16  ;;  %v1670_v30 = vsel %vm237_vm8, %v6135_v55, %v6134_v29  ;;  %v2155_v3 = vpack.c.bf16 %v1807_v43, %v1803_v46  ;;  %v6142_v16 = vld [vmem:[#allocation61_spill] sm:$0xff] }
 0x5b4   :  { %2243 = vmatpush1.bf16.msra.mxu0 %v2159_v20  ;;  %2324 = vmatprep.subr.bf16.mxu1 %v2162_v10  ;;  %v1729_v21 = vsel %vm276_vm9, %v6128_v49, %v5057_v53  ;;  %v2152_v54 = vpack.c.bf16 %v1752_v4, %v1748_v63  ;;  %v1736_v12 = vsel %vm276_vm9, %v4940_v57, %v6122_v37  ;;  %v6139_v57 = vld [vmem:[#allocation97_spill] sm:$0xff]  ;;  %v6140_v37 = vld [vmem:[#allocation74_spill] sm:$0xff]  ;;  %v6141_v49 = vld [vmem:[#allocation64_spill] sm:$0xff] }
 0x5b5   :  { %2244 = vmatprep.subr.bf16.mxu0 %v2156_v6  ;;  %2325 = vmatpush1.bf16.msra.mxu1 %v2161_v26  ;;  %v1753_v5 = vmul.f32 %v1730_v13, %v6137_v61  ;;  %v1747_v31 = vmul.f32 %v1737_v2, %v6138_v8  ;;  %v1750_v33 = vmul.f32 %v1725_v38, %v3059_v23  ;;  %v6145_v26 = vld [vmem:[#allocation26_spill] sm:$0xff]  ;;  %v6147_v38 = vld [vmem:[#allocation36_spill] sm:$0xff] }
 0x5b6   :  { %v1722_v42 = vpop.permute.xlu0 %1721  ;;  %2326 = vmatprep.subr.bf16.mxu1 %v6136_v11  ;;  %v5233_v35 = vpop.permute.xlu1 %2039  ;;  %v1669_v36 = vsel %vm237_vm8, %v6140_v37, %v6139_v57  ;;  %v6143_v28 = vpack.c.bf16 %v6141_v49, %v6142_v16  ;;  %v1743_v40 = vmul.f32 %v1736_v12, %v6138_v8  ;;  %v2148_v4 = vpack.c.bf16 %v1744_v47, %v1740_v60  ;;  %v6146_v6 = vld [vmem:[#allocation70_spill] sm:$0xff]  ;;  %v6157_v49 = vld [vmem:[#allocation73_spill] sm:$0xff] }
 0x5b7   :  { %v1726_v15 = vsel %vm276_vm9, %v5062_v58, %v1722_v42  ;;  %v1738_v53 = vsel %vm276_vm9, %v1722_v42, %v6124_v22  ;;  %v1735_v58 = vsel %vm276_vm9, %v4923_v50, %v6121_v19  ;;  %v1749_v22 = vmul.f32 %v1729_v21, %v6137_v61  ;;  %v6150_v21 = vld [vmem:[#allocation62_spill] sm:$0xff] }
 0x5b8   :  { %v1751_v56 = vmul.f32 %v1738_v53, %v6138_v8  ;;  %v1754_v62 = vmul.f32 %v1726_v15, %v3059_v23  ;;  %2245 = vmatpush1.bf16.msra.mxu0 %v2155_v3  ;;  %v1688_v23 = vmul.f32 %v1670_v30, %v6144_v7  ;;  %v1668_v19 = vsel %vm237_vm8, %v4552_v0, %v4608_v14  ;;  %v6149_v3 = vld [vmem:[#allocation24_spill] sm:$0xff]  ;;  %v6151_v53 = vld [vmem:[#allocation38_spill] sm:$0xff] }
 0x5b9   :  { %2246 = vmatprep.subr.bf16.mxu0 %v2152_v54  ;;  %2327 = vmatpush1.bf16.msra.mxu1 %v6143_v28  ;;  %v2153_v50 = vpack.c.bf16 %v1753_v5, %v1749_v22  ;;  %v1684_v43 = vmul.f32 %v1669_v36, %v6144_v7  ;;  %v1739_v20 = vmul.f32 %v1735_v58, %v6138_v8  ;;  %v6156_v36 = vld [vmem:[#allocation16_spill] sm:$0xff] }
 0x5ba   :  { %v2151_v1 = vpack.c.bf16 %v1751_v56, %v1747_v31  ;;  %v5264_v52 = vpop.permute.xlu0 %1905  ;;  %v5266_v27 = vpop.permute.xlu1 %1975  ;;  %v2154_v24 = vpack.c.bf16 %v1754_v62, %v1750_v33  ;;  %v1666_v10 = vsel %vm237_vm8, %v6134_v29, %v5069_v41  ;;  %v1667_v63 = vsel %vm237_vm8, %v6146_v6, %v6145_v26  ;;  %v6155_v62 = vld [vmem:[#allocation63_spill] sm:$0xff]  ;;  %v6164_v26 = vld [vmem:[#allocation68_spill] sm:$0xff] }
 0x5bb   :  { %v1661_v0 = vsel %vm237_vm8, %v5064_v45, %v1656_v9  ;;  %v1673_v14 = vsel %vm237_vm8, %v1656_v9, %v6140_v37  ;;  %v1680_v60 = vmul.f32 %v1668_v19, %v6144_v7  ;;  %v2147_v46 = vpack.c.bf16 %v1743_v40, %v1739_v20  ;;  %v6159_v40 = vld [vmem:[#allocation15_spill] sm:$0xff]  ;;  %v6161_v19 = vld [vmem:[#allocation93_spill] sm:$0xff] }
 0x5bc   :  { %2247 = vmatpush1.bf16.msra.mxu0 %v2151_v1  ;;  %2328 = vmatprep.subr.bf16.mxu1 %v2154_v24  ;;  %v1665_v13 = vsel %vm237_vm8, %v6139_v57, %v5064_v45  ;;  %v6148_v2 = vpack.c.bf16 %v4951_v34, %v6147_v38  ;;  %v2144_v30 = vpack.c.bf16 %v1688_v23, %v1684_v43  ;;  %v6160_v24 = vld [vmem:[#allocation43_spill] sm:$0xff]  ;;  %v6162_v43 = vld [vmem:[#allocation100_spill] sm:$0xff]  ;;  %v6170_v38 = vld [vmem:[#allocation2_spill] sm:$0xff] }
 0x5bd   :  { %2248 = vmatprep.subr.bf16.mxu0 %v2148_v4  ;;  %2329 = vmatpush1.bf16.msra.mxu1 %v2153_v50  ;;  %v1689_v9 = vmul.f32 %v1666_v10, %v6149_v3  ;;  %v2050_v42 = vsel %vm476_vm4, %v6150_v21, %v5073_v18  ;;  %v1683_v34 = vmul.f32 %v1673_v14, %v5961_v44 }
 0x5be   :  { %v1658_v47 = vpop.permute.xlu0 %1657  ;;  %2330 = vmatprep.subr.bf16.mxu1 %v6148_v2  ;;  %v5296_v29 = vpop.permute.xlu1 %1895  ;;  %v1686_v54 = vmul.f32 %v1661_v0, %v5967_v39  ;;  %v1676_v5 = vmul.f32 %v1667_v63, %v6144_v7  ;;  %v1685_v15 = vmul.f32 %v1665_v13, %v6149_v3  ;;  %v2054_v57 = vsel %vm476_vm4, %v6155_v62, %v6150_v21  ;;  %v6158_v7 = vld [vmem:[#allocation52_spill] sm:$0xff]  ;;  %v6165_v63 = vld [vmem:[#allocation69_spill] sm:$0xff]  ;;  %v6166_v0 = vld [vmem:[#allocation91_spill] sm:$0xff] }
 0x5bf   :  { %v1662_v11 = vsel %vm237_vm8, %v5069_v41, %v1658_v47  ;;  %v1674_v45 = vsel %vm237_vm8, %v1658_v47, %v6135_v55  ;;  %v6152_v41 = vld [vmem:[#allocation46_spill] sm:$0xff]  ;;  %v2072_v58 = vmul.f32 %v2050_v42, %v6156_v36  ;;  %v2052_v23 = vsel %vm476_vm4, %v4562_v25, %v6158_v7  ;;  %v6168_v13 = vld [vmem:[#allocation75_spill] sm:$0xff]  ;;  %v6169_v47 = vld [vmem:[#allocation101_spill] sm:$0xff] }
 0x5c0   :  { %v1687_v12 = vmul.f32 %v1674_v45, %v5961_v44  ;;  %v1690_v61 = vmul.f32 %v1662_v11, %v5967_v39  ;;  %2249 = vmatpush1.bf16.msra.mxu0 %v2147_v46  ;;  %v6153_v8 = vpack.c.bf16 %v6151_v53, %v6152_v41  ;;  %v6154_v55 = vld [vmem:[#allocation58_spill] sm:$0xff]  ;;  %v2145_v37 = vpack.c.bf16 %v1689_v9, %v1685_v15  ;;  %v6167_v46 = vld [vmem:[#allocation41_spill] sm:$0xff]  ;;  %v6173_v21 = vld [vmem:[#allocation108_spill] sm:$0xff] }
 0x5c1   :  { %2250 = vmatprep.subr.bf16.mxu0 %v2144_v30  ;;  %v2049_v31 = vsel %vm476_vm4, %v6154_v55, %v5071_v51  ;;  %v2140_v22 = vpack.c.bf16 %v1680_v60, %v1676_v5  ;;  %v2053_v16 = vsel %vm476_vm4, %v6157_v49, %v6154_v55  ;;  %v2071_v1 = vmul.f32 %v2054_v57, %v6159_v40  ;;  %v6172_v3 = vld [vmem:[#allocation13_spill] sm:$0xff]  ;;  %v6174_v11 = vld [vmem:[#allocation47_spill] sm:$0xff]  ;;  %v6175_v45 = vld [vmem:[#allocation40_spill] sm:$0xff] }
 0x5c2   :  { %2331 = vmatpush1.bf16.msra.mxu1 %v6153_v8  ;;  %v2143_v33 = vpack.c.bf16 %v1687_v12, %v1683_v34  ;;  %v5322_v56 = vpop.permute.xlu0 %1889  ;;  %v5324_v44 = vpop.permute.xlu1 %1903  ;;  %v2146_v39 = vpack.c.bf16 %v1690_v61, %v1686_v54  ;;  %v2068_v28 = vmul.f32 %v2049_v31, %v6156_v36  ;;  %v1990_v50 = vsel %vm436_vm3, %v6161_v19, %v6160_v24  ;;  %v6177_v12 = vld [vmem:[#allocation14_spill] sm:$0xff]  ;;  %v6183_v7 = vld [vmem:[#allocation48_spill] sm:$0xff] }
 0x5c3   :  { %v6163_v20 = vpack.c.bf16 %v4977_v48, %v6162_v43  ;;  %v1986_v25 = vsel %vm436_vm3, %v6160_v24, %v6164_v26  ;;  %v2051_v14 = vsel %vm476_vm4, %v6166_v0, %v6165_v63  ;;  %v2067_v60 = vmul.f32 %v2053_v16, %v6159_v40  ;;  %v6178_v8 = vld [vmem:[#allocation34_spill] sm:$0xff]  ;;  %v6186_v63 = vld [vmem:[#allocation7_spill] sm:$0xff] }
 0x5c4   :  { %2251 = vmatpush1.bf16.msra.mxu0 %v2143_v33  ;;  %2332 = vmatprep.subr.bf16.mxu1 %v2146_v39  ;;  %v2200_v6 = vpack.c.bf16 %v2072_v58, %v2068_v28  ;;  %v1989_v48 = vsel %vm436_vm3, %v6168_v13, %v6167_v46  ;;  %v6171_v2 = vpack.c.bf16 %v6169_v47, %v6170_v38  ;;  %v6179_v55 = vld [vmem:[#allocation86_spill] sm:$0xff] }
 0x5c5   :  { %2252 = vmatprep.subr.bf16.mxu0 %v2140_v22  ;;  %v2063_v30 = vmul.f32 %v2052_v23, %v6159_v40  ;;  %v2007_v9 = vmul.f32 %v1990_v50, %v6172_v3  ;;  %v1985_v42 = vsel %vm436_vm3, %v6167_v46, %v6173_v21  ;;  %v6176_v34 = vpack.c.bf16 %v6174_v11, %v6175_v45  ;;  %v6180_v22 = vld [vmem:[#allocation44_spill] sm:$0xff]  ;;  %v6181_v16 = vld [vmem:[#allocation42_spill] sm:$0xff] }
 0x5c6   :  { %2333 = vmatpush1.bf16.msra.mxu1 %v2145_v37  ;;  %v5345_v4 = vpop.permute.xlu0 %1973  ;;  %v5350_v10 = vpop.permute.xlu1 %1887  ;;  %v2199_v54 = vpack.c.bf16 %v2071_v1, %v2067_v60  ;;  %v2008_v61 = vmul.f32 %v1986_v25, %v6177_v12  ;;  %v2059_v53 = vmul.f32 %v2051_v14, %v6159_v40  ;;  %v2003_v41 = vmul.f32 %v1989_v48, %v6172_v3  ;;  %v6184_v23 = vld [vmem:[#allocation84_spill] sm:$0xff]  ;;  %v6185_v24 = vld [vmem:[#allocation50_spill] sm:$0xff] }
 0x5c7   :  { %2334 = vmatprep.subr.bf16.mxu1 %v6163_v20  ;;  %v1984_v31 = vsel %vm436_vm3, %v6179_v55, %v6178_v8  ;;  %v2004_v33 = vmul.f32 %v1985_v42, %v6177_v12  ;;  %v1988_v39 = vsel %vm436_vm3, %v5142_v17, %v6179_v55  ;;  %v2045_v36 = vsel %vm476_vm4, %v5071_v51, %v5233_v35  ;;  %v6187_v14 = vld [vmem:[#allocation8_spill] sm:$0xff] }
 0x5c8   :  { %2253 = vmatpush1.bf16.msra.mxu0 %v6171_v2  ;;  %v2195_v57 = vpack.c.bf16 %v2063_v30, %v2059_v53  ;;  %v2191_v37 = vpack.c.bf16 %v2007_v9, %v2003_v41  ;;  %v2057_v58 = vsel %vm476_vm4, %v5233_v35, %v6157_v49  ;;  %v6182_v28 = vpack.c.bf16 %v6180_v22, %v6181_v16  ;;  %v6188_v30 = vld [vmem:[#allocation18_spill] sm:$0xff]  ;;  %v6193_v22 = vld [vmem:[#allocation104_spill] sm:$0xff] }
 0x5c9   :  { %2254 = vmatprep.subr.bf16.mxu0 %v2200_v6  ;;  %v1983_v40 = vsel %vm436_vm3, %v6184_v23, %v6183_v7  ;;  %v2000_v1 = vmul.f32 %v1984_v31, %v6177_v12  ;;  %v1987_v51 = vsel %vm436_vm3, %v6185_v24, %v6184_v23  ;;  %v2192_v20 = vpack.c.bf16 %v2008_v61, %v2004_v33  ;;  %v6190_v41 = vld [vmem:[#allocation6_spill] sm:$0xff] }
 0x5ca   :  { %2335 = vmatpush1.bf16.msra.mxu1 %v6176_v34  ;;  %v5378_v5 = vpop.permute.xlu0 %1893  ;;  %v5380_v15 = vpop.permute.xlu1 %1971  ;;  %v1999_v35 = vmul.f32 %v1988_v39, %v6172_v3  ;;  %v1921_v49 = vsel %vm396_vm5, %v5296_v29, %v5324_v44  ;;  %v2069_v0 = vmul.f32 %v2045_v36, %v6186_v63  ;;  %v2070_v60 = vmul.f32 %v2057_v58, %v6187_v14  ;;  %v6191_v39 = vld [vmem:[#allocation17_spill] sm:$0xff]  ;;  %v6192_v58 = vld [vmem:[#allocation106_spill] sm:$0xff] }
 0x5cb   :  { %v1996_v47 = vmul.f32 %v1983_v40, %v6177_v12  ;;  %v1995_v38 = vmul.f32 %v1987_v51, %v6172_v3  ;;  %v1993_v2 = vsel %vm436_vm3, %v5266_v27, %v6168_v13  ;;  %v1940_v9 = vmul.f32 %v1921_v49, %v6188_v30  ;;  %v6195_v49 = vld [vmem:[#allocation105_spill] sm:$0xff] }
 0x5cc   :  { %2255 = vmatpush2.bf16.msra.mxu0 %v2199_v54  ;;  %v1991_v54 = vsel %vm436_vm3, %v5380_v15, %v6185_v24  ;;  %v2006_v55 = vmul.f32 %v1993_v2, %v6190_v41  ;;  %v1926_v31 = vsel %vm396_vm5, %v5322_v56, %v5205_v59  ;;  %v1992_v33 = vsel %vm436_vm3, %v5345_v4, %v5142_v17 }
 0x5cd   :  { %2256 = vmatprep.subr.bf16.mxu0 %v6182_v28  ;;  %v2187_v34 = vpack.c.bf16 %v1999_v35, %v1995_v38  ;;  %v6194_v16 = vpack.c.bf16 %v6192_v58, %v6193_v22  ;;  %v1943_v24 = vmul.f32 %v1926_v31, %v6191_v39  ;;  %v1979_v51 = vsel %vm436_vm3, %v6183_v7, %v5380_v15 }
 0x5ce   :  { %v2042_v50 = vpop.permute.xlu0 %2041  ;;  %v1892_v43 = vpop.permute.xlu1 %1891  ;;  %v2002_v35 = vmul.f32 %v1992_v33, %v6190_v41  ;;  %v1980_v15 = vsel %vm436_vm3, %v6178_v8, %v5345_v4 }
 0x5cf   :  { %v2046_v25 = vsel %vm476_vm4, %v5073_v18, %v2042_v50  ;;  %v2058_v6 = vsel %vm476_vm4, %v2042_v50, %v6155_v62  ;;  %v1922_v18 = vsel %vm396_vm5, %v5205_v59, %v5264_v52  ;;  %v1981_v62 = vsel %vm436_vm3, %v6173_v21, %v5266_v27 }
 0x5d0   :  { %v2073_v46 = vmul.f32 %v2046_v25, %v6186_v63  ;;  %v2074_v48 = vmul.f32 %v2058_v6, %v6187_v14  ;;  %2257 = vmatpush2.bf16.msra.mxu0 %v2195_v57  ;;  %v1925_v21 = vsel %vm396_vm5, %v5350_v10, %v5296_v29  ;;  %v2188_v27 = vpack.c.bf16 %v2000_v1, %v1996_v47  ;;  %v6189_v29 = vld [vmem:[#allocation5_spill] sm:$0xff] }
 0x5d1   :  { %2258 = vmatprep.subr.bf16.mxu0 %v2192_v20  ;;  %v1944_v13 = vmul.f32 %v1922_v18, %v6188_v30  ;;  %v2005_v53 = vmul.f32 %v1981_v62, %v6189_v29  ;;  %v1939_v57 = vmul.f32 %v1925_v21, %v6191_v39  ;;  %v2001_v8 = vmul.f32 %v1980_v15, %v6189_v29  ;;  %v6212_v15 = vld [vmem:[#allocation87_spill] sm:$0xff] }
 0x5d2   :  { %v2201_v42 = vpack.c.bf16 %v2073_v46, %v2069_v0  ;;  %v5443_v3 = vpop.permute.xlu0 %1901  ;;  %v5445_v11 = vpop.permute.xlu1 %1899  ;;  %v2202_v45 = vpack.c.bf16 %v2074_v48, %v2070_v60  ;;  %v1997_v60 = vmul.f32 %v1979_v51, %v6189_v29  ;;  %v6208_v51 = vld [vmem:[#allocation66_spill] sm:$0xff] }
 0x5d3   :  { %v1920_v12 = vsel %vm396_vm5, %v5378_v5, %v5443_v3  ;;  %v1919_v61 = vsel %vm396_vm5, %v1892_v43, %v5445_v11  ;;  %v2184_v23 = vpack.c.bf16 %v1944_v13, %v1940_v9  ;;  %v2183_v7 = vpack.c.bf16 %v1943_v24, %v1939_v57  ;;  %v6199_v9 = vld [vmem:[#allocation79_spill] sm:$0xff] }
 0x5d4   :  { %2259 = vmatpush2.bf16.msra.mxu0 %v2191_v37  ;;  %2336 = vmatprep.subr.bf16.mxu1 %v2202_v45  ;;  %v1998_v37 = vmul.f32 %v1991_v54, %v6190_v41  ;;  %v1936_v59 = vmul.f32 %v1920_v12, %v6188_v30  ;;  %v1932_v40 = vmul.f32 %v1919_v61, %v6188_v30  ;;  %v6198_v30 = vld [vmem:[#allocation78_spill] sm:$0xff] }
 0x5d5   :  { %2260 = vmatprep.subr.bf16.mxu0 %v2188_v27  ;;  %2337 = vmatpush2.bf16.msra.mxu1 %v2201_v42  ;;  %v2176_v42 = vpack.c.bf16 %v6199_v9, %v6198_v30  ;;  %v2189_v45 = vpack.c.bf16 %v2001_v8, %v1997_v60  ;;  %v6201_v54 = vld [vmem:[#allocation10_spill] sm:$0xff]  ;;  %v6214_v60 = vld [vmem:[#allocation37_spill] sm:$0xff] }
 0x5d6   :  { %v1978_v36 = vpop.permute.xlu0 %1977  ;;  %2338 = vmatprep.subr.bf16.mxu1 %v6194_v16  ;;  %v1884_v28 = vpop.permute.xlu1 %1883  ;;  %v2180_v46 = vpack.c.bf16 %v1936_v59, %v1932_v40  ;;  %v2190_v48 = vpack.c.bf16 %v2002_v35, %v1998_v37  ;;  %v6204_v37 = vld [vmem:[#allocation65_spill] sm:$0xff]  ;;  %v6207_v40 = vld [vmem:[#allocation55_spill] sm:$0xff] }
 0x5d7   :  { %v1982_v1 = vsel %vm436_vm3, %v6164_v26, %v1978_v36  ;;  %v1994_v17 = vsel %vm436_vm3, %v1978_v36, %v6161_v19  ;;  %v1923_v26 = vsel %vm396_vm5, %v1884_v28, %v1892_v43  ;;  %v6196_v19 = vld [vmem:[#allocation103_spill] sm:$0xff]  ;;  %v6205_v36 = vld [vmem:[#allocation77_spill] sm:$0xff] }
 0x5d8   :  { %v2009_v50 = vmul.f32 %v1982_v1, %v6189_v29  ;;  %v2010_v20 = vmul.f32 %v1994_v17, %v6190_v41  ;;  %2261 = vmatpush2.bf16.msra.mxu0 %v2187_v34  ;;  %v6197_v25 = vpack.c.bf16 %v6195_v49, %v6196_v19  ;;  %v1931_v47 = vmul.f32 %v1923_v26, %v6191_v39  ;;  %v6200_v34 = vld [vmem:[#allocation9_spill] sm:$0xff]  ;;  %v6210_v26 = vld [vmem:[#allocation3_spill] sm:$0xff] }
 0x5d9   :  { %2262 = vmatprep.subr.bf16.mxu0 %v2184_v23  ;;  %v2172_v58 = vpack.c.bf16 %v6205_v36, %v6204_v37  ;;  %v6206_v23 = vld [vmem:[#allocation102_spill] sm:$0xff]  ;;  %v6211_v19 = vld [vmem:[#allocation107_spill] sm:$0xff] }
 0x5da   :  { %2339 = vmatpush2.bf16.msra.mxu1 %v6197_v25  ;;  %v2193_v6 = vpack.c.bf16 %v2009_v50, %v2005_v53  ;;  %v1886_v63 = vpop.permute.xlu0 %1885  ;;  %v1912_v0 = vpop.permute.xlu1 %1911  ;;  %v2194_v14 = vpack.c.bf16 %v2010_v20, %v2006_v55  ;;  %v6203_v55 = vld [vmem:[#allocation49_spill] sm:$0xff]  ;;  %v6209_v50 = vld [vmem:[#allocation54_spill] sm:$0xff] }
 0x5db   :  { %v1924_v43 = vsel %vm396_vm5, %v1886_v63, %v5378_v5  ;;  %v1917_v4 = vsel %vm396_vm5, %v5324_v44, %v1912_v0  ;;  %v1929_v18 = vsel %vm396_vm5, %v1912_v0, %v5350_v10  ;;  %v2171_v20 = vpack.c.bf16 %v6209_v50, %v6208_v51 }
 0x5dc   :  { %v1935_v38 = vmul.f32 %v1924_v43, %v6191_v39  ;;  %2263 = vmatpush2.bf16.msra.mxu0 %v2183_v7  ;;  %2340 = vmatprep.subr.bf16.mxu1 %v2194_v14  ;;  %v1941_v44 = vmul.f32 %v1917_v4, %v6200_v34  ;;  %v1942_v27 = vmul.f32 %v1929_v18, %v6201_v54 }
 0x5dd   :  { %2264 = vmatprep.subr.bf16.mxu0 %v2180_v46  ;;  %v6215_v46 = vld [vmem:[#allocation99_spill] sm:$0xff] }
 0x5de   :  { %2341 = vmatpush2.bf16.msra.mxu1 %v2193_v6  ;;  %v2179_v5 = vpack.c.bf16 %v1935_v38, %v1931_v47  ;;  %v1914_v62 = vpop.permute.xlu0 %1913  ;;  %v1908_v2 = vpop.permute.xlu1 %1907  ;;  %v6213_v6 = vld [vmem:[#allocation4_spill] sm:$0xff] }
 0x5df   :  { %2342 = vmatprep.subr.bf16.mxu1 %v2190_v48  ;;  %v1918_v21 = vsel %vm396_vm5, %v5264_v52, %v1914_v62  ;;  %v1930_v10 = vsel %vm396_vm5, %v1914_v62, %v5322_v56  ;;  %v1915_v61 = vsel %vm396_vm5, %v5445_v11, %v1908_v2  ;;  %v1927_v29 = vsel %vm396_vm5, %v1908_v2, %v1884_v28  ;;  %v6202_v56 = vld [vmem:[#allocation81_spill] sm:$0xff]  ;;  %v6216_v47 = vld [vmem:[#allocation56_spill] sm:$0xff]  ;;  %v6219_v2 = vld [vmem:[#allocation51_spill] sm:$0xff] }
 0x5e0   :  { %v1945_v13 = vmul.f32 %v1918_v21, %v6200_v34  ;;  %v1946_v12 = vmul.f32 %v1930_v10, %v6201_v54  ;;  %2265 = vmatpush2.bf16.msra.mxu0 %v2179_v5  ;;  %v2175_v31 = vpack.c.bf16 %v6203_v55, %v6202_v56  ;;  %v1933_v39 = vmul.f32 %v1915_v61, %v6200_v34  ;;  %v6217_v38 = vld [vmem:[#allocation92_spill] sm:$0xff]  ;;  %v6222_v21 = vld [vmem:[#allocation45_spill] sm:$0xff]  ;;  %v6228_v55 = vld [vmem:[#allocation11_spill] sm:$0xff] }
 0x5e1   :  { %2266 = vmatprep.subr.bf16.mxu0 %v2176_v42  ;;  %v1934_v22 = vmul.f32 %v1927_v29, %v6201_v54  ;;  %v2178_v4 = vpack.c.bf16 %v6217_v38, %v6216_v47  ;;  %v6218_v62 = vld [vmem:[#allocation72_spill] sm:$0xff]  ;;  %v6220_v42 = vld [vmem:[#allocation39_spill] sm:$0xff] }
 0x5e2   :  { %2343 = vmatpush2.bf16.msra.mxu1 %v2189_v45  ;;  %v2185_v52 = vpack.c.bf16 %v1945_v13, %v1941_v44  ;;  %v1910_v53 = vpop.permute.xlu0 %1909  ;;  %v2104_v41 = vpop.permute.xlu1 %2103  ;;  %v2186_v33 = vpack.c.bf16 %v1946_v12, %v1942_v27  ;;  %v2177_v30 = vpack.c.bf16 %v6219_v2, %v6218_v62  ;;  %v6223_v13 = vmov 0   ;;  %v6224_v12 = vld [vmem:[#allocation25_spill] sm:$0xff]  ;;  %v6225_v61 = vld [vmem:[#allocation88_spill] sm:$0xff]  ;;  %v6229_v2 = vld [vmem:[#allocation30_spill] sm:$0xff] }
 0x5e3   :  { %v1916_v57 = vsel %vm396_vm5, %v5443_v3, %v1910_v53  ;;  %v1928_v11 = vsel %vm396_vm5, %v1910_v53, %v1886_v63  ;;  %v2109_v59 = vsel %vm516_vm2, %v6206_v23, %v2104_v41  ;;  %v2121_v3 = vsel %vm516_vm2, %v2104_v41, %v6207_v40  ;;  %v6226_v53 = vld [vmem:[#allocation80_spill] sm:$0xff]  ;;  %v6227_v41 = vld [vmem:[#allocation85_spill] sm:$0xff] }
 0x5e4   :  { %v1937_v16 = vmul.f32 %v1916_v57, %v6200_v34  ;;  %v1938_v28 = vmul.f32 %v1928_v11, %v6201_v54  ;;  %2267 = vmatpush2.bf16.msra.mxu0 %v2175_v31  ;;  %2344 = vmatprep.subr.bf16.mxu1 %v2186_v33  ;;  %v2133_v49 = vmul.f32 %v2109_v59, %v6210_v26  ;;  %v6221_v34 = vld [vmem:[#allocation67_spill] sm:$0xff] }
 0x5e5   :  { %2268 = vmatprep.subr.bf16.mxu0 %v2172_v58  ;;  %v2134_v63 = vmul.f32 %v2121_v3, %v6213_v6  ;;  %v2174_v29 = vpack.c.bf16 %v6225_v61, %v6224_v12  ;;  %v2173_v56 = vpack.c.bf16 %v6227_v41, %v6226_v53 }
 0x5e6   :  { %v2181_v1 = vpack.c.bf16 %v1937_v16, %v1933_v39  ;;  %2345 = vmatpush2.bf16.msra.mxu1 %v2185_v52  ;;  %v2106_v17 = vpop.permute.xlu0 %2105  ;;  %v2100_v24 = vpop.permute.xlu1 %2099  ;;  %v2182_v35 = vpack.c.bf16 %v1938_v28, %v1934_v22 }
 0x5e7   :  { %v2110_v25 = vsel %vm516_vm2, %v6211_v19, %v2106_v17  ;;  %v2122_v7 = vsel %vm516_vm2, %v2106_v17, %v6212_v15  ;;  %v2107_v43 = vsel %vm516_vm2, %v6214_v60, %v2100_v24  ;;  %v2119_v48 = vsel %vm516_vm2, %v2100_v24, %v6215_v46 }
 0x5e8   :  { %v2137_v0 = vmul.f32 %v2110_v25, %v6210_v26  ;;  %v2138_v14 = vmul.f32 %v2122_v7, %v6213_v6  ;;  %2269 = vmatpush2.bf16.msra.mxu0 %v2171_v20  ;;  %2346 = vmatprep.subr.bf16.mxu1 %v2182_v35  ;;  %v2125_v9 = vmul.f32 %v2107_v43, %v6210_v26 }
 0x5e9   :  { %v2126_v10 = vmul.f32 %v2119_v48, %v6213_v6 }
 0x5ea   :  { %v2209_v8 = vpack.c.bf16 %v2137_v0, %v2133_v49  ;;  %2347 = vmatpush2.bf16.msra.mxu1 %v2181_v1  ;;  %v2102_v18 = vpop.permute.xlu0 %2101  ;;  %v2210_v5 = vpack.c.bf16 %v2138_v14, %v2134_v63 }
 0x5eb   :  { %v2108_v45 = vsel %vm516_vm2, %v6220_v42, %v2102_v18  ;;  %v2120_v44 = vsel %vm516_vm2, %v2102_v18, %v6221_v34  ;;  %2348 = vmatprep.subr.bf16.mxu1 %v2178_v4  ;;  %2271 = vmatmul.mubr.bf16.vlgmr.msra.gmra.mxu0 %v6222_v21 }
 0x5ec   :  { %v2129_v54 = vmul.f32 %v2108_v45, %v6210_v26  ;;  %v2130_v27 = vmul.f32 %v2120_v44, %v6213_v6  ;;  %2373 = vmatprep.subr.bf16.mxu0 %v2210_v5  ;;  %2393 = vmatprep.mubr.bf16.mxu0 %v6223_v13  ;;  %v6230_v45 = vld [vmem:[#allocation32_spill] sm:$0xff] }
 0x5ed   :  { %2374 = vmatpush1.bf16.msra.mxu0 %v2209_v8 }
 0x5ee   :  { %v2205_v52 = vpack.c.bf16 %v2129_v54, %v2125_v9  ;;  %2349 = vmatpush2.bf16.msra.mxu1 %v2177_v30  ;;  %v2206_v32 = vpack.c.bf16 %v2130_v27, %v2126_v10 }
 0x5ef   :  { %2350 = vmatprep.subr.bf16.mxu1 %v2174_v29 }
 0x5f0   :  { %2375 = vmatprep.subr.bf16.mxu0 %v2206_v32 }
 0x5f1   :  { %2376 = vmatpush1.bf16.msra.mxu0 %v2205_v52  ;;  %v6231_v52 = vld [vmem:[#allocation29_spill] sm:$0xff] }
 0x5f2   :  { %2351 = vmatpush2.bf16.msra.mxu1 %v2173_v56 }
 0x5f3   :  { %v2214_v11 = vpop.permute.xlu1 %2213 }
 0x5f4   :  { %2526 = vmatmul.mubr.msk.bf16.vlgmr.msra.gmra.mxu0 %vm1390_vm11, %v6228_v55  ;;  %v6232_v55 = vld [vmem:[#allocation31_spill] sm:$0xff] }
 0x5f5   :  { %2353 = vmatmul.mubr.bf16.vlgmr.msra.gmra.mxu1 %v6222_v21 }
 0x5f7   :  { %v47_v5 = vpop.permute.xlu0 %46 }
 0x5f8   :  { %v142_v30 = vadd.f32 %v6229_v2, %v47_v5  ;;  %v144_v34 = vadd.f32 %v6230_v45, %v47_v5  ;;  %v219_v32 = vadd.f32 %v6231_v52, %v47_v5 }
 0x658   :  { %v2313_v31 = vpop.f32.mrf.mxu1 }
 0x65a   :  { %v2315_v33 = vpop.f32.mrf.mxu1 }
 0x65c   :  { %v2317_v39 = vpop.f32.mrf.mxu1 }
 0x65e   :  { %v2318_v57 = vpop.f32.mrf.mxu1 }
 0x6ab   :  { %v2272_v37 = vpop.f32.mrf.mxu0 }
 0x6ac   :  { %v2273_v36 = vadd.f32 %v2272_v37, %v2214_v11 }
 0x6ad   :  { %v2274_v58 = vpop.f32.mrf.mxu0 }
 0x6ae   :  { %v2314_v22 = vadd.f32 %v2313_v31, %v2273_v36  ;;  %v2275_v16 = vadd.f32 %v2274_v58, %v2214_v11  ;;  %v221_v31 = vadd.f32 %v6232_v55, %v47_v5 }
 0x6af   :  { %v2276_v28 = vpop.f32.mrf.mxu0 }
 0x6b0   :  { %2553 = vtanh.f32 %v2314_v22  ;;  %v2316_v23 = vadd.f32 %v2315_v33, %v2275_v16  ;;  %v2460_v10 = vrot.slane %v2314_v22, 2 }
 0x6b1   :  { %v2277_v59 = vpop.f32.mrf.mxu0 }
 0x6b2   :  { %2555 = vtanh.f32 %v2316_v23  ;;  %v2461_v27 = vrot.slane %v2316_v23, 2 }
 0x6b4   :  { %v2395_v40 = vpop.f32.mrf.mxu0 }
 0x6b5   :  { %v2354_v3 = vpop.f32.mrf.mxu1 }
 0x6b6   :  { %v2355_v1 = vadd.f32 %v2354_v3, %v2214_v11  ;;  %v2397_v17 = vpop.f32.mrf.mxu0 }
 0x6b7   :  { %v2356_v24 = vpop.f32.mrf.mxu1 }
 0x6b8   :  { %v2396_v51 = vadd.f32 %v2395_v40, %v2355_v1  ;;  %v2357_v50 = vadd.f32 %v2356_v24, %v2214_v11  ;;  %v2399_v20 = vpop.f32.mrf.mxu0 }
 0x6b9   :  { %v2358_v35 = vpop.f32.mrf.mxu1 }
 0x6ba   :  { %2557 = vtanh.f32 %v2396_v51  ;;  %v2398_v26 = vadd.f32 %v2397_v17, %v2357_v50  ;;  %v2400_v49 = vpop.f32.mrf.mxu0  ;;  %v2462_v57 = vrot.slane %v2396_v51, 2 }
 0x6bb   :  { %v2359_v19 = vpop.f32.mrf.mxu1 }
 0x6bc   :  { %2559 = vtanh.f32 %v2398_v26  ;;  %v2463_v37 = vrot.slane %v2398_v26, 2 }
 0x6bd   :  { %v2554_v25 = vpop.eup %2553 }
 0x6be   :  { %v2410_v15 = vrot.slane %v2554_v25, 4 }
 0x6bf   :  { %v2556_v7 = vpop.eup %2555 }
 0x6c0   :  { %v2418_v6 = vmul.f32 %v2410_v15, %v2214_v11  ;;  %v2411_v63 = vrot.slane %v2556_v7, 4 }
 0x6c2   :  { %v2432_v0 = vmul.f32 1.442695, %v2418_v6  ;;  %v2419_v14 = vmul.f32 %v2411_v63, %v2214_v11 }
 0x6c4   :  { %2561 = vpow2.f32 %v2432_v0  ;;  %v2434_v60 = vmul.f32 1.442695, %v2419_v14 }
 0x6c6   :  { %2563 = vpow2.f32 %v2434_v60 }
 0x6c7   :  { %v2558_v43 = vpop.eup %2557 }
 0x6c8   :  { %v2412_v46 = vrot.slane %v2558_v43, 4 }
 0x6c9   :  { %v2560_v48 = vpop.eup %2559 }
 0x6ca   :  { %v2420_v47 = vmul.f32 %v2412_v46, %v2214_v11  ;;  %v2413_v38 = vrot.slane %v2560_v48, 4 }
 0x6cc   :  { %v2436_v4 = vmul.f32 1.442695, %v2420_v47  ;;  %v2421_v8 = vmul.f32 %v2413_v38, %v2214_v11 }
 0x6ce   :  { %2565 = vpow2.f32 %v2436_v4  ;;  %v2438_v18 = vmul.f32 1.442695, %v2421_v8 }
 0x6d0   :  { %2567 = vpow2.f32 %v2438_v18 }
 0x6d1   :  { %v2562_v62 = vpop.eup %2561 }
 0x6d2   :  { %v2444_v9 = vrot.slane %v2562_v62, 4 }
 0x6d3   :  { %v2564_v42 = vpop.eup %2563 }
 0x6d4   :  { %v2452_v44 = vmul.f32 %v2444_v9, %v142_v30  ;;  %v2445_v21 = vrot.slane %v2564_v42, 4 }
 0x6d6   :  { %v2453_v54 = vmul.f32 %v2445_v21, %v144_v34  ;;  %v2468_v13 = vadd.f32 %v2460_v10, %v2452_v44 }
 0x6d8   :  { %v2469_v12 = vadd.f32 %v2461_v27, %v2453_v54 }
 0x6da   :  { %v2476_v61 = vcombine.low %v2468_v13, %v2469_v12 }
 0x6db   :  { %v2566_v29 = vpop.eup %2565 }
 0x6dc   :  { %v2478_v53 = vrot.slane %v2476_v61, 6  ;;  %v2446_v41 = vrot.slane %v2566_v29, 4 }
 0x6dd   :  { %v2568_v56 = vpop.eup %2567 }
 0x6de   :  { %2482 = vst [vmem:[%s5606_s9] sm:$0xcc] %v2478_v53  ;;  %v2454_v33 = vmul.f32 %v2446_v41, %v219_v32  ;;  %v2447_v39 = vrot.slane %v2568_v56, 4 }
 0x6e0   :  { %v2455_v11 = vmul.f32 %v2447_v39, %v221_v31  ;;  %v2470_v36 = vadd.f32 %v2462_v57, %v2454_v33 }
 0x6e2   :  { %v2471_v58 = vadd.f32 %v2463_v37, %v2455_v11 }
 0x6e4   :  { %v2477_v22 = vcombine.low %v2470_v36, %v2471_v58 }
 0x6e6   :  { %v2479_v16 = vrot.slane %v2477_v22, 6 }
 0x6e8   :  { %2483 = vst [vmem:[%s5606_s9 + $0x8] sm:$0xcc] %v2479_v16 }

</bundles_post_ra>
